<compile_context>
chip_gen: v5e
topology: v5e:2x2
jax: 0.10.0
libtpu: 0.0.40
codegen_flags: <defaults>
</compile_context>

<pallas_src>
import functools
import math

import jax
import jax.numpy as jnp
from jax.experimental import pallas as pl
from jax.experimental.pallas import tpu as pltpu

EXPANSION = 4
SE_REDUCTION = 16
BN_EPS = 1e-5


# ----------------------------------------------------------------------------
# Compiler params / tiling helpers
# ----------------------------------------------------------------------------
@functools.lru_cache(maxsize=1)
def _vmem_cap():
    try:
        return int(pltpu.get_tpu_info().vmem_capacity_bytes)
    except Exception:
        return 64 * 1024 * 1024  # conservative (v7x-sized) fallback


def _vmem_limit():
    return min((_vmem_cap() * 3) // 4, 96 * 1024 * 1024)


def _tm_target():
    # Smaller M-tiles on v7x-class VMEM (<=64 MiB); bigger on v5e/v6e (128 MiB).
    return 512 if _vmem_cap() <= 64 * 1024 * 1024 else 1024


def _compiler_params(n_parallel_axes=1):
    return pltpu.CompilerParams(
        dimension_semantics=("parallel",) * n_parallel_axes,
        vmem_limit_bytes=_vmem_limit())


def _round_up(x, m):
    return ((x + m - 1) // m) * m


def _row_tiling(m, target=None):
    """Pick a tile height (mult of 8).  Prefer a divisor of m (no pad copy)."""
    if target is None:
        target = _tm_target()
    limit = min(m, 2 * target)
    best = None
    for tm in range(8, limit + 1, 8):
        if m % tm == 0 and (best is None or
                            abs(tm - target) <= abs(best - target)):
            best = tm
    if best is not None:
        return best, m                       # exact tiling, no padding
    nt = -(-m // target)
    tm = _round_up(-(-m // nt), 8)
    return tm, tm * nt                       # fallback: pad rows


def _pad_rows(x2d, mp):
    m = x2d.shape[0]
    if mp == m:
        return x2d
    return jnp.pad(x2d, ((0, mp - m), (0, 0)))


# ----------------------------------------------------------------------------
# Pallas kernels
# ----------------------------------------------------------------------------
def _mm_stats_kernel(x_ref, w_ref, z_ref, ps_ref, pss_ref):
    """Tiled 1x1-conv matmul: z = x @ w (bf16 in, f32 acc); z stored bf16,
    per-tile stats (sum / sumsq) in f32."""
    x = x_ref[...].astype(jnp.bfloat16)
    z = jnp.dot(x, w_ref[...], preferred_element_type=jnp.float32)
    z_ref[...] = z.astype(z_ref.dtype)
    ps_ref[...] = jnp.sum(z, axis=0, keepdims=True)[None]
    pss_ref[...] = jnp.sum(z * z, axis=0, keepdims=True)[None]


def _bnrelu_mm_stats_kernel(m_valid, tm, z2_ref, sc_ref, sh_ref, w_ref,
                            z_ref, ps_ref, pss_ref):
    """conv3 matmul with the previous layer's BN+ReLU fused onto the input
    tile.  Padded tail rows are zeroed after the BN apply so stats stay exact."""
    x = z2_ref[...].astype(jnp.float32) * sc_ref[...] + sh_ref[...]
    x = jnp.maximum(x, 0.0)
    if m_valid is not None:
        rows = (pl.program_id(0) * tm
                + jax.lax.broadcasted_iota(jnp.int32, (tm, 1), 0))
        x = jnp.where(rows < m_valid, x, 0.0)
    z = jnp.dot(x.astype(jnp.bfloat16), w_ref[...],
                preferred_element_type=jnp.float32)
    z_ref[...] = z.astype(z_ref.dtype)
    ps_ref[...] = jnp.sum(z, axis=0, keepdims=True)[None]
    pss_ref[...] = jnp.sum(z * z, axis=0, keepdims=True)[None]


def _conv3x3_stats_kernel(stride, ho, wo, rs, *refs):
    """Per-image 3x3 conv from parity-split padded inputs, strip-tiled over
    output rows so the accumulator stays vreg/VMEM resident; emits bf16 z and
    per-image f32 stats."""
    n_src = stride * stride
    src_refs = refs[:n_src]
    w_ref = refs[n_src]
    z_ref, ps_ref, pss_ref = refs[n_src + 1:]
    cout = w_ref.shape[2]
    psum = jnp.zeros((1, cout), jnp.float32)
    psumsq = jnp.zeros((1, cout), jnp.float32)
    for start in range(0, ho, rs):           # static strip loop
        nrows = min(rs, ho - start)
        acc = jnp.zeros((nrows * wo, cout), jnp.float32)
        # TODO(synk): per-strip deep-K im2col (single K=9*cin dot) would cut
        #             MXU issue count further when cin is a multiple of 128.
        for i in range(3):
            for j in range(3):
                src = src_refs[(i % stride) * stride + (j % stride)]
                oi, oj = i // stride, j // stride
                tap = src[0, start + oi:start + oi + nrows, oj:oj + wo, :]
                tap = tap.reshape(nrows * wo, -1).astype(jnp.bfloat16)
                acc = acc + jnp.dot(tap, w_ref[i * 3 + j],
                                    preferred_element_type=jnp.float32)
        z_ref[:, start * wo:(start + nrows) * wo, :] = (
            acc.astype(z_ref.dtype)[None])
        psum = psum + jnp.sum(acc, axis=0, keepdims=True)
        psumsq = psumsq + jnp.sum(acc * acc, axis=0, keepdims=True)
    ps_ref[...] = psum[None]
    pss_ref[...] = psumsq[None]


def _bn_act_kernel(relu, z_ref, sc_ref, sh_ref, o_ref):
    """Tiled BN apply: y = z*scale + shift (+ReLU); bf16 in, out_dtype out."""
    y = z_ref[...].astype(jnp.float32) * sc_ref[...] + sh_ref[...]
    if relu:
        y = jnp.maximum(y, 0.0)
    o_ref[...] = y.astype(o_ref.dtype)


def _bn_se_add_relu_kernel(z_ref, sc_ref, sh_ref, w1_ref, w2_ref, r_ref,
                           o_ref):
    """Fused conv3 epilogue (per image): BN3 apply -> SE global pool ->
    SE FCs + sigmoid -> channel scale -> residual add -> ReLU."""
    y = z_ref[0].astype(jnp.float32) * sc_ref[0] + sh_ref[0]      # (hw, c)
    pool = jnp.mean(y, axis=0, keepdims=True)                      # (1, c)
    h = jnp.maximum(
        jnp.dot(pool, w1_ref[...], preferred_element_type=jnp.float32), 0.0)
    s = jax.nn.sigmoid(
        jnp.dot(h, w2_ref[...], preferred_element_type=jnp.float32))
    out = jnp.maximum(y * s + r_ref[0].astype(jnp.float32), 0.0)
    o_ref[...] = out[None]


def _bn_add_relu_kernel(z_ref, sc_ref, sh_ref, r_ref, o_ref):
    """Fused conv3 epilogue without SE: BN3 apply + residual add + ReLU."""
    y = z_ref[0].astype(jnp.float32) * sc_ref[0] + sh_ref[0]
    o_ref[...] = jnp.maximum(y + r_ref[0].astype(jnp.float32), 0.0)[None]


# ----------------------------------------------------------------------------
# Pallas wrappers
# ----------------------------------------------------------------------------
def _matmul_stats(x2d, w_bf16):
    m, k = x2d.shape
    cout = w_bf16.shape[1]
    tm, mp = _row_tiling(m)
    t = mp // tm
    xpad = _pad_rows(x2d, mp)
    z, ps, pss = pl.pallas_call(
        _mm_stats_kernel,
        out_shape=(jax.ShapeDtypeStruct((mp, cout), jnp.bfloat16),
                   jax.ShapeDtypeStruct((t, 1, cout), jnp.float32),
                   jax.ShapeDtypeStruct((t, 1, cout), jnp.float32)),
        grid=(t,),
        in_specs=[pl.BlockSpec((tm, k), lambda i: (i, 0)),
                  pl.BlockSpec((k, cout), lambda i: (0, 0))],
        out_specs=(pl.BlockSpec((tm, cout), lambda i: (i, 0)),
                   pl.BlockSpec((1, 1, cout), lambda i: (i, 0, 0)),
                   pl.BlockSpec((1, 1, cout), lambda i: (i, 0, 0))),
        compiler_params=_compiler_params(1),
    )(xpad, w_bf16)
    return z, ps, pss, tm, m


def _bnrelu_matmul_stats(z2, sc2, sh2, w_bf16):
    """conv3: y2 = relu(z2*sc2+sh2) computed on the fly, then y2 @ w."""
    m, k = z2.shape
    cout = w_bf16.shape[1]
    tm, mp = _row_tiling(m)
    t = mp // tm
    z2p = _pad_rows(z2, mp)
    m_valid = None if mp == m else m
    kernel = functools.partial(_bnrelu_mm_stats_kernel, m_valid, tm)
    z, ps, pss = pl.pallas_call(
        kernel,
        out_shape=(jax.ShapeDtypeStruct((mp, cout), jnp.bfloat16),
                   jax.ShapeDtypeStruct((t, 1, cout), jnp.float32),
                   jax.ShapeDtypeStruct((t, 1, cout), jnp.float32)),
        grid=(t,),
        in_specs=[pl.BlockSpec((tm, k), lambda i: (i, 0)),
                  pl.BlockSpec((1, k), lambda i: (0, 0)),
                  pl.BlockSpec((1, k), lambda i: (0, 0)),
                  pl.BlockSpec((k, cout), lambda i: (0, 0))],
        out_specs=(pl.BlockSpec((tm, cout), lambda i: (i, 0)),
                   pl.BlockSpec((1, 1, cout), lambda i: (i, 0, 0)),
                   pl.BlockSpec((1, 1, cout), lambda i: (i, 0, 0))),
        compiler_params=_compiler_params(1),
    )(z2p, sc2, sh2, w_bf16)
    return z, ps, pss, tm, m


def _bn_scale_shift(psum, psumsq, count, gamma, beta):
    """Fold batch mean/var (biased) + affine into per-channel scale/shift."""
    s = jnp.sum(psum, axis=0).reshape(-1)
    ss = jnp.sum(psumsq, axis=0).reshape(-1)
    mean = s / count
    var = jnp.maximum(ss / count - mean * mean, 0.0)
    scale = gamma * jax.lax.rsqrt(var + BN_EPS)
    shift = beta - mean * scale
    return scale.reshape(1, -1), shift.reshape(1, -1)


def _bn_act(z_padded, scale, shift, relu, out_dtype, tm):
    mp, c = z_padded.shape
    t = mp // tm
    return pl.pallas_call(
        functools.partial(_bn_act_kernel, relu),
        out_shape=jax.ShapeDtypeStruct((mp, c), out_dtype),
        grid=(t,),
        in_specs=[pl.BlockSpec((tm, c), lambda i: (i, 0)),
                  pl.BlockSpec((1, c), lambda i: (0, 0)),
                  pl.BlockSpec((1, c), lambda i: (0, 0))],
        out_specs=pl.BlockSpec((tm, c), lambda i: (i, 0)),
        compiler_params=_compiler_params(1),
    )(z_padded, scale, shift)


def conv1x1_bn(x2d, w_pt, gamma, beta, relu, out_dtype):
    """1x1 conv + training-mode BN (+ReLU) on an (M, Cin) activation view."""
    cout, cin = w_pt.shape[0], w_pt.shape[1]
    w = jnp.transpose(w_pt.reshape(cout, cin)).astype(jnp.bfloat16)
    z, ps, pss, tm, m = _matmul_stats(x2d, w)
    scale, shift = _bn_scale_shift(ps, pss, m, gamma, beta)
    y = _bn_act(z, scale, shift, relu, out_dtype, tm)
    return y[:m]


def conv3x3_stats(x_nhwc, w_pt, stride):
    """3x3 conv (pad=1, stride in {1,2}); returns bf16 z2 + per-image stats.
    No im2col in HBM; strip-tiled accumulation inside the kernel."""
    n, h, w_dim, cin = x_nhwc.shape
    cout = w_pt.shape[0]
    s = stride
    ho = (h + 2 - 3) // s + 1
    wo = (w_dim + 2 - 3) // s + 1
    xp = jnp.pad(x_nhwc, ((0, 0), (1, 1), (1, 1), (0, 0)))
    ext_h = ho + (2 // s)
    ext_w = wo + (2 // s)
    srcs = []
    for p_ in range(s):               # parity split (space-to-depth) glue
        for q_ in range(s):
            t = xp[:, p_::s, q_::s, :][:, :ext_h, :ext_w, :]
            dh, dw = ext_h - t.shape[1], ext_w - t.shape[2]
            if dh or dw:              # padded entries are never read by any tap
                t = jnp.pad(t, ((0, 0), (0, dh), (0, dw), (0, 0)))
            srcs.append(t)
    wmat = jnp.transpose(w_pt, (2, 3, 1, 0)).reshape(9, cin, cout)
    wmat = wmat.astype(jnp.bfloat16)

    rs = max(1, min(ho, -(-256 // max(wo, 1))))   # ~256 output rows per strip
    kernel = functools.partial(_conv3x3_stats_kernel, s, ho, wo, rs)
    z, ps, pss = pl.pallas_call(
        kernel,
        out_shape=(jax.ShapeDtypeStruct((n, ho * wo, cout), jnp.bfloat16),
                   jax.ShapeDtypeStruct((n, 1, cout), jnp.float32),
                   jax.ShapeDtypeStruct((n, 1, cout), jnp.float32)),
        grid=(n,),
        in_specs=([pl.BlockSpec((1, ext_h, ext_w, cin),
                                lambda b: (b, 0, 0, 0))] * len(srcs)
                  + [pl.BlockSpec((9, cin, cout), lambda b: (0, 0, 0))]),
        out_specs=(pl.BlockSpec((1, ho * wo, cout), lambda b: (b, 0, 0)),
                   pl.BlockSpec((1, 1, cout), lambda b: (b, 0, 0)),
                   pl.BlockSpec((1, 1, cout), lambda b: (b, 0, 0))),
        compiler_params=_compiler_params(1),
    )(*srcs, wmat)
    return z, ps, pss, ho, wo


def _bn_se_add_relu(z3, sc3, sh3, w1, w2, residual):
    n, hw, c = z3.shape
    r = w1.shape[1]
    return pl.pallas_call(
        _bn_se_add_relu_kernel,
        out_shape=jax.ShapeDtypeStruct((n, hw, c), jnp.float32),
        grid=(n,),
        in_specs=[pl.BlockSpec((1, hw, c), lambda b: (b, 0, 0)),
                  pl.BlockSpec((1, 1, c), lambda b: (0, 0, 0)),
                  pl.BlockSpec((1, 1, c), lambda b: (0, 0, 0)),
                  pl.BlockSpec((c, r), lambda b: (0, 0)),
                  pl.BlockSpec((r, c), lambda b: (0, 0)),
                  pl.BlockSpec((1, hw, c), lambda b: (b, 0, 0))],
        out_specs=pl.BlockSpec((1, hw, c), lambda b: (b, 0, 0)),
        compiler_params=_compiler_params(1),
    )(z3, sc3.reshape(1, 1, c), sh3.reshape(1, 1, c), w1, w2, residual)


def _bn_add_relu(z3, sc3, sh3, residual):
    n, hw, c = z3.shape
    return pl.pallas_call(
        _bn_add_relu_kernel,
        out_shape=jax.ShapeDtypeStruct((n, hw, c), jnp.float32),
        grid=(n,),
        in_specs=[pl.BlockSpec((1, hw, c), lambda b: (b, 0, 0)),
                  pl.BlockSpec((1, 1, c), lambda b: (0, 0, 0)),
                  pl.BlockSpec((1, 1, c), lambda b: (0, 0, 0)),
                  pl.BlockSpec((1, hw, c), lambda b: (b, 0, 0))],
        out_specs=pl.BlockSpec((1, hw, c), lambda b: (b, 0, 0)),
        compiler_params=_compiler_params(1),
    )(z3, sc3.reshape(1, 1, c), sh3.reshape(1, 1, c), residual)


# ----------------------------------------------------------------------------
# Bottleneck forward (conv1 1x1 -> conv2 3x3(stride) -> conv3 1x1(x4)
#                     -> SE -> +residual -> ReLU), BN in training mode.
# ----------------------------------------------------------------------------
def bottleneck_forward_nhwc(x, p, stride=1, with_se=True):
    """NHWC f32 in -> NHWC f32 out (use this when chaining blocks)."""
    n, h, w, cin = x.shape
    planes = p["w1"].shape[0]
    c_out = planes * EXPANSION

    # conv1 (1x1) + bn1 + relu  -- bf16 intermediate activation.
    y1 = conv1x1_bn(x.reshape(n * h * w, cin), p["w1"], p["g1"], p["b1"],
                    relu=True, out_dtype=jnp.bfloat16)
    y1 = y1.reshape(n, h, w, planes)

    # conv2 (3x3, stride): bf16 z2 + stats; BN2+ReLU are fused into conv3.
    z2, ps2, pss2, ho, wo = conv3x3_stats(y1, p["w2"], stride)
    m2 = n * ho * wo
    sc2, sh2 = _bn_scale_shift(ps2, pss2, m2, p["g2"], p["b2"])

    # conv3 (1x1, x4) with fused BN2+ReLU on the input tiles; bf16 z3 + stats.
    w3 = jnp.transpose(p["w3"].reshape(c_out, planes)).astype(jnp.bfloat16)
    z3, ps3, pss3, _, _ = _bnrelu_matmul_stats(z2.reshape(m2, planes),
                                               sc2, sh2, w3)
    sc3, sh3 = _bn_scale_shift(ps3, pss3, m2, p["g3"], p["b3"])
    z3 = z3[:m2].reshape(n, ho * wo, c_out)

    # Residual branch (optional downsample: strided 1x1 conv + BN), kept bf16.
    if "wd" in p:
        xd = x[:, ::stride, ::stride, :] if stride > 1 else x
        res = conv1x1_bn(xd.reshape(m2, cin), p["wd"], p["gd"], p["bd"],
                         relu=False, out_dtype=jnp.bfloat16)
        residual = res.reshape(n, ho * wo, c_out)
    else:
        residual = x.reshape(n, ho * wo, c_out)

    # Fused epilogue: BN3 apply -> SE pool/FCs -> scale -> add -> ReLU.
    if with_se:
        out = _bn_se_add_relu(z3, sc3, sh3, p["se_w1"], p["se_w2"], residual)
    else:
        out = _bn_add_relu(z3, sc3, sh3, residual)
    return out.reshape(n, ho, wo, c_out)


def bottleneck_forward(x_nchw, p, stride=1, with_se=True):
    """PyTorch-compatible NCHW f32 interface (layout glue around the NHWC core)."""
    x = jnp.transpose(x_nchw, (0, 2, 3, 1)).astype(jnp.float32)
    out = bottleneck_forward_nhwc(x, p, stride=stride, with_se=with_se)
    return jnp.transpose(out, (0, 3, 1, 2))


# ----------------------------------------------------------------------------
# Deterministic parameter construction (mirrors fastreid's random_init)
# ----------------------------------------------------------------------------
def init_params(key, inplanes, planes, stride, with_se=True):
    keys = jax.random.split(key, 8)

    def conv_w(k, cout, cin, ksz):
        std = math.sqrt(2.0 / (ksz * ksz * cout))
        return std * jax.random.normal(k, (cout, cin, ksz, ksz), jnp.float32)

    def linear_w(k, cin, cout):                       # stored as (in, out)
        std = 1.0 / math.sqrt(cin)
        return std * jax.random.normal(k, (cin, cout), jnp.float32)

    def bn(c):
        return jnp.ones((c,), jnp.float32), jnp.zeros((c,), jnp.float32)

    c_out = planes * EXPANSION
    p = {}
    p["w1"] = conv_w(keys[0], planes, inplanes, 1)
    p["g1"], p["b1"] = bn(planes)
    p["w2"] = conv_w(keys[1], planes, planes, 3)
    p["g2"], p["b2"] = bn(planes)
    p["w3"] = conv_w(keys[2], c_out, planes, 1)
    p["g3"], p["b3"] = bn(c_out)
    if with_se:
        p["se_w1"] = linear_w(keys[3], c_out, c_out // SE_REDUCTION)
        p["se_w2"] = linear_w(keys[4], c_out // SE_REDUCTION, c_out)
    if stride != 1 or inplanes != c_out:
        p["wd"] = conv_w(keys[5], c_out, inplanes, 1)
        p["gd"], p["bd"] = bn(c_out)
    return p


# ----------------------------------------------------------------------------
if __name__ == "__main__":
    key = jax.random.PRNGKey(0)
    k_params, k_x = jax.random.split(key)

    inplanes, planes, stride = 64, 32, 2
    params = init_params(k_params, inplanes, planes, stride, with_se=True)

    # Small input consistent with the module: NCHW, inplanes channels.
    x = jax.random.normal(k_x, (2, inplanes, 16, 16), jnp.float32)

    fwd = jax.jit(functools.partial(bottleneck_forward, stride=stride,
                                    with_se=True))
    out = fwd(x, params)
    out = jax.block_until_ready(out)

    assert out.shape == (2, planes * EXPANSION, 8, 8), out.shape
    assert bool(jnp.all(jnp.isfinite(out)))
    print("KERNEL_OK")
</pallas_src>

<mosaic_0001>
module attributes {stable_mosaic.version = 11 : i64} {
  func.func @_mm_stats_kernel(%arg0: i32, %arg1: memref<512x64xf32, #tpu.memory_space<vmem>>, %arg2: memref<64x32xbf16, #tpu.memory_space<vmem>>, %arg3: memref<512x32xbf16, #tpu.memory_space<vmem>>, %arg4: memref<1x1x32xf32, #tpu.memory_space<vmem>>, %arg5: memref<1x1x32xf32, #tpu.memory_space<vmem>>) attributes {dimension_semantics = [#tpu.dimension_semantics<parallel>], iteration_bounds = array<i64: 1>, scalar_prefetch = 0 : i64, scratch_operands = 0 : i64, tpu.core_type = #tpu.core_type<tc>, window_params = [{transform_indices = @transform_0, window_bounds = array<i64: 512, 64>}, {pipeline_mode = #tpu.pipeline_mode<synchronous>, transform_indices = @transform_1, window_bounds = array<i64: 64, 32>}, {transform_indices = @transform_2, window_bounds = array<i64: 512, 32>}, {transform_indices = @transform_3, window_bounds = array<i64: 1, 1, 32>}, {transform_indices = @transform_4, window_bounds = array<i64: 1, 1, 32>}]} {
    %c0 = arith.constant 0 : index
    %c0_0 = arith.constant 0 : index
    %0 = vector.load %arg1[%c0, %c0_0] : memref<512x64xf32, #tpu.memory_space<vmem>>, vector<512x64xf32>
    %1 = arith.truncf %0 : vector<512x64xf32> to vector<512x64xbf16>
    %c0_1 = arith.constant 0 : index
    %c0_2 = arith.constant 0 : index
    %2 = vector.load %arg2[%c0_1, %c0_2] : memref<64x32xbf16, #tpu.memory_space<vmem>>, vector<64x32xbf16>
    %cst = arith.constant dense<0.000000e+00> : vector<512x32xf32>
    %3 = tpu.matmul %1, %2, %cst {dimension_numbers = #tpu.dot_dimension_numbers<[1], [0], [0], [1], [0, 0, 1, 1], [], []>} : vector<512x64xbf16>, vector<64x32xbf16>, vector<512x32xf32> -> vector<512x32xf32>
    %4 = arith.truncf %3 : vector<512x32xf32> to vector<512x32xbf16>
    %c0_3 = arith.constant 0 : index
    %c0_4 = arith.constant 0 : index
    %5 = vector.load %arg3[%c0_3, %c0_4] : memref<512x32xbf16, #tpu.memory_space<vmem>>, vector<512x32xbf16>
    tpu.vector_store %arg3[%c0_3, %c0_4], %4 {strides = array<i32>} : memref<512x32xbf16, #tpu.memory_space<vmem>>, vector<512x32xbf16>,
    %cst_5 = arith.constant dense<0.000000e+00> : vector<32xf32>
    %6 = vector.multi_reduction <add>, %3, %cst_5 [0] : vector<512x32xf32> to vector<32xf32>
    %7 = vector.shape_cast %6 : vector<32xf32> to vector<1x32xf32>
    %8 = vector.shape_cast %7 : vector<1x32xf32> to vector<1x1x32xf32>
    %c0_6 = arith.constant 0 : index
    %c0_7 = arith.constant 0 : index
    %c0_8 = arith.constant 0 : index
    %9 = vector.load %arg4[%c0_6, %c0_7, %c0_8] : memref<1x1x32xf32, #tpu.memory_space<vmem>>, vector<1x1x32xf32>
    tpu.vector_store %arg4[%c0_6, %c0_7, %c0_8], %8 {strides = array<i32>} : memref<1x1x32xf32, #tpu.memory_space<vmem>>, vector<1x1x32xf32>,
    %10 = arith.mulf %3, %3 : vector<512x32xf32>
    %cst_9 = arith.constant dense<0.000000e+00> : vector<32xf32>
    %11 = vector.multi_reduction <add>, %10, %cst_9 [0] : vector<512x32xf32> to vector<32xf32>
    %12 = vector.shape_cast %11 : vector<32xf32> to vector<1x32xf32>
    %13 = vector.shape_cast %12 : vector<1x32xf32> to vector<1x1x32xf32>
    %c0_10 = arith.constant 0 : index
    %c0_11 = arith.constant 0 : index
    %c0_12 = arith.constant 0 : index
    %14 = vector.load %arg5[%c0_10, %c0_11, %c0_12] : memref<1x1x32xf32, #tpu.memory_space<vmem>>, vector<1x1x32xf32>
    tpu.vector_store %arg5[%c0_10, %c0_11, %c0_12], %13 {strides = array<i32>} : memref<1x1x32xf32, #tpu.memory_space<vmem>>, vector<1x1x32xf32>,
    return
  }
  func.func @transform_0(%arg0: i32) -> (i32, i32) {
    %c0_i32 = arith.constant 0 : i32
    %c0_i32_0 = arith.constant 0 : i32
    return %arg0, %c0_i32 : i32, i32
  }
  func.func @transform_1(%arg0: i32) -> (i32, i32) {
    %c0_i32 = arith.constant 0 : i32
    %c0_i32_0 = arith.constant 0 : i32
    %c0_i32_1 = arith.constant 0 : i32
    return %c0_i32, %c0_i32_0 : i32, i32
  }
  func.func @transform_2(%arg0: i32) -> (i32, i32) {
    %c0_i32 = arith.constant 0 : i32
    %c0_i32_0 = arith.constant 0 : i32
    return %arg0, %c0_i32 : i32, i32
  }
  func.func @transform_3(%arg0: i32) -> (i32, i32, i32) {
    %c0_i32 = arith.constant 0 : i32
    %c0_i32_0 = arith.constant 0 : i32
    %c0_i32_1 = arith.constant 0 : i32
    return %arg0, %c0_i32, %c0_i32_0 : i32, i32, i32
  }
  func.func @transform_4(%arg0: i32) -> (i32, i32, i32) {
    %c0_i32 = arith.constant 0 : i32
    %c0_i32_0 = arith.constant 0 : i32
    %c0_i32_1 = arith.constant 0 : i32
    return %arg0, %c0_i32, %c0_i32_0 : i32, i32, i32
  }
}

module attributes {stable_mosaic.version = 11 : i64} {
  func.func @_bn_act_kernel(%arg0: i32, %arg1: memref<512x32xbf16, #tpu.memory_space<vmem>>, %arg2: memref<1x32xf32, #tpu.memory_space<vmem>>, %arg3: memref<1x32xf32, #tpu.memory_space<vmem>>, %arg4: memref<512x32xbf16, #tpu.memory_space<vmem>>) attributes {dimension_semantics = [#tpu.dimension_semantics<parallel>], iteration_bounds = array<i64: 1>, scalar_prefetch = 0 : i64, scratch_operands = 0 : i64, tpu.core_type = #tpu.core_type<tc>, window_params = [{transform_indices = @transform_0, window_bounds = array<i64: 512, 32>}, {pipeline_mode = #tpu.pipeline_mode<synchronous>, transform_indices = @transform_1, window_bounds = array<i64: 1, 32>}, {pipeline_mode = #tpu.pipeline_mode<synchronous>, transform_indices = @transform_2, window_bounds = array<i64: 1, 32>}, {transform_indices = @transform_3, window_bounds = array<i64: 512, 32>}]} {
    %c0 = arith.constant 0 : index
    %c0_0 = arith.constant 0 : index
    %0 = vector.load %arg1[%c0, %c0_0] : memref<512x32xbf16, #tpu.memory_space<vmem>>, vector<512x32xbf16>
    %1 = arith.extf %0 : vector<512x32xbf16> to vector<512x32xf32>
    %c0_1 = arith.constant 0 : index
    %c0_2 = arith.constant 0 : index
    %2 = vector.load %arg2[%c0_1, %c0_2] : memref<1x32xf32, #tpu.memory_space<vmem>>, vector<1x32xf32>
    %3 = vector.broadcast %2 : vector<1x32xf32> to vector<512x32xf32>
    %4 = arith.mulf %1, %3 : vector<512x32xf32>
    %c0_3 = arith.constant 0 : index
    %c0_4 = arith.constant 0 : index
    %5 = vector.load %arg3[%c0_3, %c0_4] : memref<1x32xf32, #tpu.memory_space<vmem>>, vector<1x32xf32>
    %6 = vector.broadcast %5 : vector<1x32xf32> to vector<512x32xf32>
    %7 = arith.addf %4, %6 : vector<512x32xf32>
    %cst = arith.constant 0.000000e+00 : f32
    %8 = vector.broadcast %cst : f32 to vector<512x32xf32>
    %9 = arith.maximumf %7, %8 : vector<512x32xf32>
    %10 = arith.truncf %9 : vector<512x32xf32> to vector<512x32xbf16>
    %c0_5 = arith.constant 0 : index
    %c0_6 = arith.constant 0 : index
    %11 = vector.load %arg4[%c0_5, %c0_6] : memref<512x32xbf16, #tpu.memory_space<vmem>>, vector<512x32xbf16>
    tpu.vector_store %arg4[%c0_5, %c0_6], %10 {strides = array<i32>} : memref<512x32xbf16, #tpu.memory_space<vmem>>, vector<512x32xbf16>,
    return
  }
  func.func @transform_0(%arg0: i32) -> (i32, i32) {
    %c0_i32 = arith.constant 0 : i32
    %c0_i32_0 = arith.constant 0 : i32
    return %arg0, %c0_i32 : i32, i32
  }
  func.func @transform_1(%arg0: i32) -> (i32, i32) {
    %c0_i32 = arith.constant 0 : i32
    %c0_i32_0 = arith.constant 0 : i32
    %c0_i32_1 = arith.constant 0 : i32
    return %c0_i32, %c0_i32_0 : i32, i32
  }
  func.func @transform_2(%arg0: i32) -> (i32, i32) {
    %c0_i32 = arith.constant 0 : i32
    %c0_i32_0 = arith.constant 0 : i32
    %c0_i32_1 = arith.constant 0 : i32
    return %c0_i32, %c0_i32_0 : i32, i32
  }
  func.func @transform_3(%arg0: i32) -> (i32, i32) {
    %c0_i32 = arith.constant 0 : i32
    %c0_i32_0 = arith.constant 0 : i32
    return %arg0, %c0_i32 : i32, i32
  }
}

module attributes {stable_mosaic.version = 11 : i64} {
  func.func @_conv3x3_stats_kernel(%arg0: i32, %arg1: memref<1x9x9x32xbf16, #tpu.memory_space<vmem>>, %arg2: memref<1x9x9x32xbf16, #tpu.memory_space<vmem>>, %arg3: memref<1x9x9x32xbf16, #tpu.memory_space<vmem>>, %arg4: memref<1x9x9x32xbf16, #tpu.memory_space<vmem>>, %arg5: memref<9x32x32xbf16, #tpu.memory_space<vmem>>, %arg6: memref<1x64x32xbf16, #tpu.memory_space<vmem>>, %arg7: memref<1x1x32xf32, #tpu.memory_space<vmem>>, %arg8: memref<1x1x32xf32, #tpu.memory_space<vmem>>) attributes {dimension_semantics = [#tpu.dimension_semantics<parallel>], iteration_bounds = array<i64: 2>, scalar_prefetch = 0 : i64, scratch_operands = 0 : i64, tpu.core_type = #tpu.core_type<tc>, window_params = [{transform_indices = @transform_0, window_bounds = array<i64: 1, 9, 9, 32>}, {transform_indices = @transform_1, window_bounds = array<i64: 1, 9, 9, 32>}, {transform_indices = @transform_2, window_bounds = array<i64: 1, 9, 9, 32>}, {transform_indices = @transform_3, window_bounds = array<i64: 1, 9, 9, 32>}, {pipeline_mode = #tpu.pipeline_mode<synchronous>, transform_indices = @transform_4, window_bounds = array<i64: 9, 32, 32>}, {transform_indices = @transform_5, window_bounds = array<i64: 1, 64, 32>}, {transform_indices = @transform_6, window_bounds = array<i64: 1, 1, 32>}, {transform_indices = @transform_7, window_bounds = array<i64: 1, 1, 32>}]} {
    %cst = arith.constant 0.000000e+00 : f32
    %0 = vector.broadcast %cst : f32 to vector<1x32xf32>
    %cst_0 = arith.constant 0.000000e+00 : f32
    %1 = vector.broadcast %cst_0 : f32 to vector<1x32xf32>
    %cst_1 = arith.constant 0.000000e+00 : f32
    %2 = vector.broadcast %cst_1 : f32 to vector<64x32xf32>
    %c0 = arith.constant 0 : index
    %c0_2 = arith.constant 0 : index
    %c0_3 = arith.constant 0 : index
    %c0_4 = arith.constant 0 : index
    %3 = vector.load %arg1[%c0, %c0_2, %c0_3, %c0_4] : memref<1x9x9x32xbf16, #tpu.memory_space<vmem>>, vector<1x8x8x32xbf16>
    %4 = vector.shape_cast %3 : vector<1x8x8x32xbf16> to vector<8x8x32xbf16>
    %5 = vector.shape_cast %4 : vector<8x8x32xbf16> to vector<64x32xbf16>
    %c0_5 = arith.constant 0 : index
    %c0_6 = arith.constant 0 : index
    %c0_7 = arith.constant 0 : index
    %6 = vector.load %arg5[%c0_5, %c0_6, %c0_7] : memref<9x32x32xbf16, #tpu.memory_space<vmem>>, vector<1x32x32xbf16>
    %7 = vector.shape_cast %6 : vector<1x32x32xbf16> to vector<32x32xbf16>
    %cst_8 = arith.constant dense<0.000000e+00> : vector<64x32xf32>
    %8 = tpu.matmul %5, %7, %cst_8 {dimension_numbers = #tpu.dot_dimension_numbers<[1], [0], [0], [1], [0, 0, 1, 1], [], []>} : vector<64x32xbf16>, vector<32x32xbf16>, vector<64x32xf32> -> vector<64x32xf32>
    %9 = arith.addf %2, %8 : vector<64x32xf32>
    %c0_9 = arith.constant 0 : index
    %c0_10 = arith.constant 0 : index
    %c0_11 = arith.constant 0 : index
    %c0_12 = arith.constant 0 : index
    %10 = vector.load %arg2[%c0_9, %c0_10, %c0_11, %c0_12] : memref<1x9x9x32xbf16, #tpu.memory_space<vmem>>, vector<1x8x8x32xbf16>
    %11 = vector.shape_cast %10 : vector<1x8x8x32xbf16> to vector<8x8x32xbf16>
    %12 = vector.shape_cast %11 : vector<8x8x32xbf16> to vector<64x32xbf16>
    %c1 = arith.constant 1 : index
    %c0_13 = arith.constant 0 : index
    %c0_14 = arith.constant 0 : index
    %13 = vector.load %arg5[%c1, %c0_13, %c0_14] : memref<9x32x32xbf16, #tpu.memory_space<vmem>>, vector<1x32x32xbf16>
    %14 = vector.shape_cast %13 : vector<1x32x32xbf16> to vector<32x32xbf16>
    %cst_15 = arith.constant dense<0.000000e+00> : vector<64x32xf32>
    %15 = tpu.matmul %12, %14, %cst_15 {dimension_numbers = #tpu.dot_dimension_numbers<[1], [0], [0], [1], [0, 0, 1, 1], [], []>} : vector<64x32xbf16>, vector<32x32xbf16>, vector<64x32xf32> -> vector<64x32xf32>
    %16 = arith.addf %9, %15 : vector<64x32xf32>
    %c0_16 = arith.constant 0 : index
    %c0_17 = arith.constant 0 : index
    %c1_18 = arith.constant 1 : index
    %c0_19 = arith.constant 0 : index
    %17 = vector.load %arg1[%c0_16, %c0_17, %c1_18, %c0_19] : memref<1x9x9x32xbf16, #tpu.memory_space<vmem>>, vector<1x8x8x32xbf16>
    %18 = vector.shape_cast %17 : vector<1x8x8x32xbf16> to vector<8x8x32xbf16>
    %19 = vector.shape_cast %18 : vector<8x8x32xbf16> to vector<64x32xbf16>
    %c2 = arith.constant 2 : index
    %c0_20 = arith.constant 0 : index
    %c0_21 = arith.constant 0 : index
    %20 = vector.load %arg5[%c2, %c0_20, %c0_21] : memref<9x32x32xbf16, #tpu.memory_space<vmem>>, vector<1x32x32xbf16>
    %21 = vector.shape_cast %20 : vector<1x32x32xbf16> to vector<32x32xbf16>
    %cst_22 = arith.constant dense<0.000000e+00> : vector<64x32xf32>
    %22 = tpu.matmul %19, %21, %cst_22 {dimension_numbers = #tpu.dot_dimension_numbers<[1], [0], [0], [1], [0, 0, 1, 1], [], []>} : vector<64x32xbf16>, vector<32x32xbf16>, vector<64x32xf32> -> vector<64x32xf32>
    %23 = arith.addf %16, %22 : vector<64x32xf32>
    %c0_23 = arith.constant 0 : index
    %c0_24 = arith.constant 0 : index
    %c0_25 = arith.constant 0 : index
    %c0_26 = arith.constant 0 : index
    %24 = vector.load %arg3[%c0_23, %c0_24, %c0_25, %c0_26] : memref<1x9x9x32xbf16, #tpu.memory_space<vmem>>, vector<1x8x8x32xbf16>
    %25 = vector.shape_cast %24 : vector<1x8x8x32xbf16> to vector<8x8x32xbf16>
    %26 = vector.shape_cast %25 : vector<8x8x32xbf16> to vector<64x32xbf16>
    %c3 = arith.constant 3 : index
    %c0_27 = arith.constant 0 : index
    %c0_28 = arith.constant 0 : index
    %27 = vector.load %arg5[%c3, %c0_27, %c0_28] : memref<9x32x32xbf16, #tpu.memory_space<vmem>>, vector<1x32x32xbf16>
    %28 = vector.shape_cast %27 : vector<1x32x32xbf16> to vector<32x32xbf16>
    %cst_29 = arith.constant dense<0.000000e+00> : vector<64x32xf32>
    %29 = tpu.matmul %26, %28, %cst_29 {dimension_numbers = #tpu.dot_dimension_numbers<[1], [0], [0], [1], [0, 0, 1, 1], [], []>} : vector<64x32xbf16>, vector<32x32xbf16>, vector<64x32xf32> -> vector<64x32xf32>
    %30 = arith.addf %23, %29 : vector<64x32xf32>
    %c0_30 = arith.constant 0 : index
    %c0_31 = arith.constant 0 : index
    %c0_32 = arith.constant 0 : index
    %c0_33 = arith.constant 0 : index
    %31 = vector.load %arg4[%c0_30, %c0_31, %c0_32, %c0_33] : memref<1x9x9x32xbf16, #tpu.memory_space<vmem>>, vector<1x8x8x32xbf16>
    %32 = vector.shape_cast %31 : vector<1x8x8x32xbf16> to vector<8x8x32xbf16>
    %33 = vector.shape_cast %32 : vector<8x8x32xbf16> to vector<64x32xbf16>
    %c4 = arith.constant 4 : index
    %c0_34 = arith.constant 0 : index
    %c0_35 = arith.constant 0 : index
    %34 = vector.load %arg5[%c4, %c0_34, %c0_35] : memref<9x32x32xbf16, #tpu.memory_space<vmem>>, vector<1x32x32xbf16>
    %35 = vector.shape_cast %34 : vector<1x32x32xbf16> to vector<32x32xbf16>
    %cst_36 = arith.constant dense<0.000000e+00> : vector<64x32xf32>
    %36 = tpu.matmul %33, %35, %cst_36 {dimension_numbers = #tpu.dot_dimension_numbers<[1], [0], [0], [1], [0, 0, 1, 1], [], []>} : vector<64x32xbf16>, vector<32x32xbf16>, vector<64x32xf32> -> vector<64x32xf32>
    %37 = arith.addf %30, %36 : vector<64x32xf32>
    %c0_37 = arith.constant 0 : index
    %c0_38 = arith.constant 0 : index
    %c1_39 = arith.constant 1 : index
    %c0_40 = arith.constant 0 : index
    %38 = vector.load %arg3[%c0_37, %c0_38, %c1_39, %c0_40] : memref<1x9x9x32xbf16, #tpu.memory_space<vmem>>, vector<1x8x8x32xbf16>
    %39 = vector.shape_cast %38 : vector<1x8x8x32xbf16> to vector<8x8x32xbf16>
    %40 = vector.shape_cast %39 : vector<8x8x32xbf16> to vector<64x32xbf16>
    %c5 = arith.constant 5 : index
    %c0_41 = arith.constant 0 : index
    %c0_42 = arith.constant 0 : index
    %41 = vector.load %arg5[%c5, %c0_41, %c0_42] : memref<9x32x32xbf16, #tpu.memory_space<vmem>>, vector<1x32x32xbf16>
    %42 = vector.shape_cast %41 : vector<1x32x32xbf16> to vector<32x32xbf16>
    %cst_43 = arith.constant dense<0.000000e+00> : vector<64x32xf32>
    %43 = tpu.matmul %40, %42, %cst_43 {dimension_numbers = #tpu.dot_dimension_numbers<[1], [0], [0], [1], [0, 0, 1, 1], [], []>} : vector<64x32xbf16>, vector<32x32xbf16>, vector<64x32xf32> -> vector<64x32xf32>
    %44 = arith.addf %37, %43 : vector<64x32xf32>
    %c0_44 = arith.constant 0 : index
    %c1_45 = arith.constant 1 : index
    %c0_46 = arith.constant 0 : index
    %c0_47 = arith.constant 0 : index
    %45 = vector.load %arg1[%c0_44, %c1_45, %c0_46, %c0_47] : memref<1x9x9x32xbf16, #tpu.memory_space<vmem>>, vector<1x8x8x32xbf16>
    %46 = vector.shape_cast %45 : vector<1x8x8x32xbf16> to vector<8x8x32xbf16>
    %47 = vector.shape_cast %46 : vector<8x8x32xbf16> to vector<64x32xbf16>
    %c6 = arith.constant 6 : index
    %c0_48 = arith.constant 0 : index
    %c0_49 = arith.constant 0 : index
    %48 = vector.load %arg5[%c6, %c0_48, %c0_49] : memref<9x32x32xbf16, #tpu.memory_space<vmem>>, vector<1x32x32xbf16>
    %49 = vector.shape_cast %48 : vector<1x32x32xbf16> to vector<32x32xbf16>
    %cst_50 = arith.constant dense<0.000000e+00> : vector<64x32xf32>
    %50 = tpu.matmul %47, %49, %cst_50 {dimension_numbers = #tpu.dot_dimension_numbers<[1], [0], [0], [1], [0, 0, 1, 1], [], []>} : vector<64x32xbf16>, vector<32x32xbf16>, vector<64x32xf32> -> vector<64x32xf32>
    %51 = arith.addf %44, %50 : vector<64x32xf32>
    %c0_51 = arith.constant 0 : index
    %c1_52 = arith.constant 1 : index
    %c0_53 = arith.constant 0 : index
    %c0_54 = arith.constant 0 : index
    %52 = vector.load %arg2[%c0_51, %c1_52, %c0_53, %c0_54] : memref<1x9x9x32xbf16, #tpu.memory_space<vmem>>, vector<1x8x8x32xbf16>
    %53 = vector.shape_cast %52 : vector<1x8x8x32xbf16> to vector<8x8x32xbf16>
    %54 = vector.shape_cast %53 : vector<8x8x32xbf16> to vector<64x32xbf16>
    %c7 = arith.constant 7 : index
    %c0_55 = arith.constant 0 : index
    %c0_56 = arith.constant 0 : index
    %55 = vector.load %arg5[%c7, %c0_55, %c0_56] : memref<9x32x32xbf16, #tpu.memory_space<vmem>>, vector<1x32x32xbf16>
    %56 = vector.shape_cast %55 : vector<1x32x32xbf16> to vector<32x32xbf16>
    %cst_57 = arith.constant dense<0.000000e+00> : vector<64x32xf32>
    %57 = tpu.matmul %54, %56, %cst_57 {dimension_numbers = #tpu.dot_dimension_numbers<[1], [0], [0], [1], [0, 0, 1, 1], [], []>} : vector<64x32xbf16>, vector<32x32xbf16>, vector<64x32xf32> -> vector<64x32xf32>
    %58 = arith.addf %51, %57 : vector<64x32xf32>
    %c0_58 = arith.constant 0 : index
    %c1_59 = arith.constant 1 : index
    %c1_60 = arith.constant 1 : index
    %c0_61 = arith.constant 0 : index
    %59 = vector.load %arg1[%c0_58, %c1_59, %c1_60, %c0_61] : memref<1x9x9x32xbf16, #tpu.memory_space<vmem>>, vector<1x8x8x32xbf16>
    %60 = vector.shape_cast %59 : vector<1x8x8x32xbf16> to vector<8x8x32xbf16>
    %61 = vector.shape_cast %60 : vector<8x8x32xbf16> to vector<64x32xbf16>
    %c8 = arith.constant 8 : index
    %c0_62 = arith.constant 0 : index
    %c0_63 = arith.constant 0 : index
    %62 = vector.load %arg5[%c8, %c0_62, %c0_63] : memref<9x32x32xbf16, #tpu.memory_space<vmem>>, vector<1x32x32xbf16>
    %63 = vector.shape_cast %62 : vector<1x32x32xbf16> to vector<32x32xbf16>
    %cst_64 = arith.constant dense<0.000000e+00> : vector<64x32xf32>
    %64 = tpu.matmul %61, %63, %cst_64 {dimension_numbers = #tpu.dot_dimension_numbers<[1], [0], [0], [1], [0, 0, 1, 1], [], []>} : vector<64x32xbf16>, vector<32x32xbf16>, vector<64x32xf32> -> vector<64x32xf32>
    %65 = arith.addf %58, %64 : vector<64x32xf32>
    %66 = arith.truncf %65 : vector<64x32xf32> to vector<64x32xbf16>
    %67 = vector.shape_cast %66 : vector<64x32xbf16> to vector<1x64x32xbf16>
    %c0_65 = arith.constant 0 : index
    %c0_66 = arith.constant 0 : index
    %c0_67 = arith.constant 0 : index
    %68 = vector.load %arg6[%c0_65, %c0_66, %c0_67] : memref<1x64x32xbf16, #tpu.memory_space<vmem>>, vector<1x64x32xbf16>
    tpu.vector_store %arg6[%c0_65, %c0_66, %c0_67], %67 {strides = array<i32>} : memref<1x64x32xbf16, #tpu.memory_space<vmem>>, vector<1x64x32xbf16>,
    %cst_68 = arith.constant dense<0.000000e+00> : vector<32xf32>
    %69 = vector.multi_reduction <add>, %65, %cst_68 [0] : vector<64x32xf32> to vector<32xf32>
    %70 = vector.shape_cast %69 : vector<32xf32> to vector<1x32xf32>
    %71 = arith.addf %0, %70 : vector<1x32xf32>
    %72 = arith.mulf %65, %65 : vector<64x32xf32>
    %cst_69 = arith.constant dense<0.000000e+00> : vector<32xf32>
    %73 = vector.multi_reduction <add>, %72, %cst_69 [0] : vector<64x32xf32> to vector<32xf32>
    %74 = vector.shape_cast %73 : vector<32xf32> to vector<1x32xf32>
    %75 = arith.addf %1, %74 : vector<1x32xf32>
    %76 = vector.shape_cast %71 : vector<1x32xf32> to vector<1x1x32xf32>
    %c0_70 = arith.constant 0 : index
    %c0_71 = arith.constant 0 : index
    %c0_72 = arith.constant 0 : index
    %77 = vector.load %arg7[%c0_70, %c0_71, %c0_72] : memref<1x1x32xf32, #tpu.memory_space<vmem>>, vector<1x1x32xf32>
    tpu.vector_store %arg7[%c0_70, %c0_71, %c0_72], %76 {strides = array<i32>} : memref<1x1x32xf32, #tpu.memory_space<vmem>>, vector<1x1x32xf32>,
    %78 = vector.shape_cast %75 : vector<1x32xf32> to vector<1x1x32xf32>
    %c0_73 = arith.constant 0 : index
    %c0_74 = arith.constant 0 : index
    %c0_75 = arith.constant 0 : index
    %79 = vector.load %arg8[%c0_73, %c0_74, %c0_75] : memref<1x1x32xf32, #tpu.memory_space<vmem>>, vector<1x1x32xf32>
    tpu.vector_store %arg8[%c0_73, %c0_74, %c0_75], %78 {strides = array<i32>} : memref<1x1x32xf32, #tpu.memory_space<vmem>>, vector<1x1x32xf32>,
    return
  }
  func.func @transform_0(%arg0: i32) -> (i32, i32, i32, i32) {
    %c0_i32 = arith.constant 0 : i32
    %c0_i32_0 = arith.constant 0 : i32
    %c0_i32_1 = arith.constant 0 : i32
    %c0_i32_2 = arith.constant 0 : i32
    return %arg0, %c0_i32, %c0_i32_0, %c0_i32_1 : i32, i32, i32, i32
  }
  func.func @transform_1(%arg0: i32) -> (i32, i32, i32, i32) {
    %c0_i32 = arith.constant 0 : i32
    %c0_i32_0 = arith.constant 0 : i32
    %c0_i32_1 = arith.constant 0 : i32
    %c0_i32_2 = arith.constant 0 : i32
    return %arg0, %c0_i32, %c0_i32_0, %c0_i32_1 : i32, i32, i32, i32
  }
  func.func @transform_2(%arg0: i32) -> (i32, i32, i32, i32) {
    %c0_i32 = arith.constant 0 : i32
    %c0_i32_0 = arith.constant 0 : i32
    %c0_i32_1 = arith.constant 0 : i32
    %c0_i32_2 = arith.constant 0 : i32
    return %arg0, %c0_i32, %c0_i32_0, %c0_i32_1 : i32, i32, i32, i32
  }
  func.func @transform_3(%arg0: i32) -> (i32, i32, i32, i32) {
    %c0_i32 = arith.constant 0 : i32
    %c0_i32_0 = arith.constant 0 : i32
    %c0_i32_1 = arith.constant 0 : i32
    %c0_i32_2 = arith.constant 0 : i32
    return %arg0, %c0_i32, %c0_i32_0, %c0_i32_1 : i32, i32, i32, i32
  }
  func.func @transform_4(%arg0: i32) -> (i32, i32, i32) {
    %c0_i32 = arith.constant 0 : i32
    %c0_i32_0 = arith.constant 0 : i32
    %c0_i32_1 = arith.constant 0 : i32
    %c0_i32_2 = arith.constant 0 : i32
    return %c0_i32, %c0_i32_0, %c0_i32_1 : i32, i32, i32
  }
  func.func @transform_5(%arg0: i32) -> (i32, i32, i32) {
    %c0_i32 = arith.constant 0 : i32
    %c0_i32_0 = arith.constant 0 : i32
    %c0_i32_1 = arith.constant 0 : i32
    return %arg0, %c0_i32, %c0_i32_0 : i32, i32, i32
  }
  func.func @transform_6(%arg0: i32) -> (i32, i32, i32) {
    %c0_i32 = arith.constant 0 : i32
    %c0_i32_0 = arith.constant 0 : i32
    %c0_i32_1 = arith.constant 0 : i32
    return %arg0, %c0_i32, %c0_i32_0 : i32, i32, i32
  }
  func.func @transform_7(%arg0: i32) -> (i32, i32, i32) {
    %c0_i32 = arith.constant 0 : i32
    %c0_i32_0 = arith.constant 0 : i32
    %c0_i32_1 = arith.constant 0 : i32
    return %arg0, %c0_i32, %c0_i32_0 : i32, i32, i32
  }
}

module attributes {stable_mosaic.version = 11 : i64} {
  func.func @_mm_stats_kernel(%arg0: i32, %arg1: memref<128x64xf32, #tpu.memory_space<vmem>>, %arg2: memref<64x128xbf16, #tpu.memory_space<vmem>>, %arg3: memref<128x128xbf16, #tpu.memory_space<vmem>>, %arg4: memref<1x1x128xf32, #tpu.memory_space<vmem>>, %arg5: memref<1x1x128xf32, #tpu.memory_space<vmem>>) attributes {dimension_semantics = [#tpu.dimension_semantics<parallel>], iteration_bounds = array<i64: 1>, scalar_prefetch = 0 : i64, scratch_operands = 0 : i64, tpu.core_type = #tpu.core_type<tc>, window_params = [{transform_indices = @transform_0, window_bounds = array<i64: 128, 64>}, {pipeline_mode = #tpu.pipeline_mode<synchronous>, transform_indices = @transform_1, window_bounds = array<i64: 64, 128>}, {transform_indices = @transform_2, window_bounds = array<i64: 128, 128>}, {transform_indices = @transform_3, window_bounds = array<i64: 1, 1, 128>}, {transform_indices = @transform_4, window_bounds = array<i64: 1, 1, 128>}]} {
    %c0 = arith.constant 0 : index
    %c0_0 = arith.constant 0 : index
    %0 = vector.load %arg1[%c0, %c0_0] : memref<128x64xf32, #tpu.memory_space<vmem>>, vector<128x64xf32>
    %1 = arith.truncf %0 : vector<128x64xf32> to vector<128x64xbf16>
    %c0_1 = arith.constant 0 : index
    %c0_2 = arith.constant 0 : index
    %2 = vector.load %arg2[%c0_1, %c0_2] : memref<64x128xbf16, #tpu.memory_space<vmem>>, vector<64x128xbf16>
    %cst = arith.constant dense<0.000000e+00> : vector<128x128xf32>
    %3 = tpu.matmul %1, %2, %cst {dimension_numbers = #tpu.dot_dimension_numbers<[1], [0], [0], [1], [0, 0, 1, 1], [], []>} : vector<128x64xbf16>, vector<64x128xbf16>, vector<128x128xf32> -> vector<128x128xf32>
    %4 = arith.truncf %3 : vector<128x128xf32> to vector<128x128xbf16>
    %c0_3 = arith.constant 0 : index
    %c0_4 = arith.constant 0 : index
    %5 = vector.load %arg3[%c0_3, %c0_4] : memref<128x128xbf16, #tpu.memory_space<vmem>>, vector<128x128xbf16>
    tpu.vector_store %arg3[%c0_3, %c0_4], %4 {strides = array<i32>} : memref<128x128xbf16, #tpu.memory_space<vmem>>, vector<128x128xbf16>,
    %cst_5 = arith.constant dense<0.000000e+00> : vector<128xf32>
    %6 = vector.multi_reduction <add>, %3, %cst_5 [0] : vector<128x128xf32> to vector<128xf32>
    %7 = vector.shape_cast %6 : vector<128xf32> to vector<1x128xf32>
    %8 = vector.shape_cast %7 : vector<1x128xf32> to vector<1x1x128xf32>
    %c0_6 = arith.constant 0 : index
    %c0_7 = arith.constant 0 : index
    %c0_8 = arith.constant 0 : index
    %9 = vector.load %arg4[%c0_6, %c0_7, %c0_8] : memref<1x1x128xf32, #tpu.memory_space<vmem>>, vector<1x1x128xf32>
    tpu.vector_store %arg4[%c0_6, %c0_7, %c0_8], %8 {strides = array<i32>} : memref<1x1x128xf32, #tpu.memory_space<vmem>>, vector<1x1x128xf32>,
    %10 = arith.mulf %3, %3 : vector<128x128xf32>
    %cst_9 = arith.constant dense<0.000000e+00> : vector<128xf32>
    %11 = vector.multi_reduction <add>, %10, %cst_9 [0] : vector<128x128xf32> to vector<128xf32>
    %12 = vector.shape_cast %11 : vector<128xf32> to vector<1x128xf32>
    %13 = vector.shape_cast %12 : vector<1x128xf32> to vector<1x1x128xf32>
    %c0_10 = arith.constant 0 : index
    %c0_11 = arith.constant 0 : index
    %c0_12 = arith.constant 0 : index
    %14 = vector.load %arg5[%c0_10, %c0_11, %c0_12] : memref<1x1x128xf32, #tpu.memory_space<vmem>>, vector<1x1x128xf32>
    tpu.vector_store %arg5[%c0_10, %c0_11, %c0_12], %13 {strides = array<i32>} : memref<1x1x128xf32, #tpu.memory_space<vmem>>, vector<1x1x128xf32>,
    return
  }
  func.func @transform_0(%arg0: i32) -> (i32, i32) {
    %c0_i32 = arith.constant 0 : i32
    %c0_i32_0 = arith.constant 0 : i32
    return %arg0, %c0_i32 : i32, i32
  }
  func.func @transform_1(%arg0: i32) -> (i32, i32) {
    %c0_i32 = arith.constant 0 : i32
    %c0_i32_0 = arith.constant 0 : i32
    %c0_i32_1 = arith.constant 0 : i32
    return %c0_i32, %c0_i32_0 : i32, i32
  }
  func.func @transform_2(%arg0: i32) -> (i32, i32) {
    %c0_i32 = arith.constant 0 : i32
    %c0_i32_0 = arith.constant 0 : i32
    return %arg0, %c0_i32 : i32, i32
  }
  func.func @transform_3(%arg0: i32) -> (i32, i32, i32) {
    %c0_i32 = arith.constant 0 : i32
    %c0_i32_0 = arith.constant 0 : i32
    %c0_i32_1 = arith.constant 0 : i32
    return %arg0, %c0_i32, %c0_i32_0 : i32, i32, i32
  }
  func.func @transform_4(%arg0: i32) -> (i32, i32, i32) {
    %c0_i32 = arith.constant 0 : i32
    %c0_i32_0 = arith.constant 0 : i32
    %c0_i32_1 = arith.constant 0 : i32
    return %arg0, %c0_i32, %c0_i32_0 : i32, i32, i32
  }
}

module attributes {stable_mosaic.version = 11 : i64} {
  func.func @_bnrelu_mm_stats_kernel(%arg0: i32, %arg1: memref<128x32xbf16, #tpu.memory_space<vmem>>, %arg2: memref<1x32xf32, #tpu.memory_space<vmem>>, %arg3: memref<1x32xf32, #tpu.memory_space<vmem>>, %arg4: memref<32x128xbf16, #tpu.memory_space<vmem>>, %arg5: memref<128x128xbf16, #tpu.memory_space<vmem>>, %arg6: memref<1x1x128xf32, #tpu.memory_space<vmem>>, %arg7: memref<1x1x128xf32, #tpu.memory_space<vmem>>) attributes {dimension_semantics = [#tpu.dimension_semantics<parallel>], iteration_bounds = array<i64: 1>, scalar_prefetch = 0 : i64, scratch_operands = 0 : i64, tpu.core_type = #tpu.core_type<tc>, window_params = [{transform_indices = @transform_0, window_bounds = array<i64: 128, 32>}, {pipeline_mode = #tpu.pipeline_mode<synchronous>, transform_indices = @transform_1, window_bounds = array<i64: 1, 32>}, {pipeline_mode = #tpu.pipeline_mode<synchronous>, transform_indices = @transform_2, window_bounds = array<i64: 1, 32>}, {pipeline_mode = #tpu.pipeline_mode<synchronous>, transform_indices = @transform_3, window_bounds = array<i64: 32, 128>}, {transform_indices = @transform_4, window_bounds = array<i64: 128, 128>}, {transform_indices = @transform_5, window_bounds = array<i64: 1, 1, 128>}, {transform_indices = @transform_6, window_bounds = array<i64: 1, 1, 128>}]} {
    %c0 = arith.constant 0 : index
    %c0_0 = arith.constant 0 : index
    %0 = vector.load %arg1[%c0, %c0_0] : memref<128x32xbf16, #tpu.memory_space<vmem>>, vector<128x32xbf16>
    %1 = arith.extf %0 : vector<128x32xbf16> to vector<128x32xf32>
    %c0_1 = arith.constant 0 : index
    %c0_2 = arith.constant 0 : index
    %2 = vector.load %arg2[%c0_1, %c0_2] : memref<1x32xf32, #tpu.memory_space<vmem>>, vector<1x32xf32>
    %3 = vector.broadcast %2 : vector<1x32xf32> to vector<128x32xf32>
    %4 = arith.mulf %1, %3 : vector<128x32xf32>
    %c0_3 = arith.constant 0 : index
    %c0_4 = arith.constant 0 : index
    %5 = vector.load %arg3[%c0_3, %c0_4] : memref<1x32xf32, #tpu.memory_space<vmem>>, vector<1x32xf32>
    %6 = vector.broadcast %5 : vector<1x32xf32> to vector<128x32xf32>
    %7 = arith.addf %4, %6 : vector<128x32xf32>
    %cst = arith.constant 0.000000e+00 : f32
    %8 = vector.broadcast %cst : f32 to vector<128x32xf32>
    %9 = arith.maximumf %7, %8 : vector<128x32xf32>
    %10 = arith.truncf %9 : vector<128x32xf32> to vector<128x32xbf16>
    %c0_5 = arith.constant 0 : index
    %c0_6 = arith.constant 0 : index
    %11 = vector.load %arg4[%c0_5, %c0_6] : memref<32x128xbf16, #tpu.memory_space<vmem>>, vector<32x128xbf16>
    %cst_7 = arith.constant dense<0.000000e+00> : vector<128x128xf32>
    %12 = tpu.matmul %10, %11, %cst_7 {dimension_numbers = #tpu.dot_dimension_numbers<[1], [0], [0], [1], [0, 0, 1, 1], [], []>} : vector<128x32xbf16>, vector<32x128xbf16>, vector<128x128xf32> -> vector<128x128xf32>
    %13 = arith.truncf %12 : vector<128x128xf32> to vector<128x128xbf16>
    %c0_8 = arith.constant 0 : index
    %c0_9 = arith.constant 0 : index
    %14 = vector.load %arg5[%c0_8, %c0_9] : memref<128x128xbf16, #tpu.memory_space<vmem>>, vector<128x128xbf16>
    tpu.vector_store %arg5[%c0_8, %c0_9], %13 {strides = array<i32>} : memref<128x128xbf16, #tpu.memory_space<vmem>>, vector<128x128xbf16>,
    %cst_10 = arith.constant dense<0.000000e+00> : vector<128xf32>
    %15 = vector.multi_reduction <add>, %12, %cst_10 [0] : vector<128x128xf32> to vector<128xf32>
    %16 = vector.shape_cast %15 : vector<128xf32> to vector<1x128xf32>
    %17 = vector.shape_cast %16 : vector<1x128xf32> to vector<1x1x128xf32>
    %c0_11 = arith.constant 0 : index
    %c0_12 = arith.constant 0 : index
    %c0_13 = arith.constant 0 : index
    %18 = vector.load %arg6[%c0_11, %c0_12, %c0_13] : memref<1x1x128xf32, #tpu.memory_space<vmem>>, vector<1x1x128xf32>
    tpu.vector_store %arg6[%c0_11, %c0_12, %c0_13], %17 {strides = array<i32>} : memref<1x1x128xf32, #tpu.memory_space<vmem>>, vector<1x1x128xf32>,
    %19 = arith.mulf %12, %12 : vector<128x128xf32>
    %cst_14 = arith.constant dense<0.000000e+00> : vector<128xf32>
    %20 = vector.multi_reduction <add>, %19, %cst_14 [0] : vector<128x128xf32> to vector<128xf32>
    %21 = vector.shape_cast %20 : vector<128xf32> to vector<1x128xf32>
    %22 = vector.shape_cast %21 : vector<1x128xf32> to vector<1x1x128xf32>
    %c0_15 = arith.constant 0 : index
    %c0_16 = arith.constant 0 : index
    %c0_17 = arith.constant 0 : index
    %23 = vector.load %arg7[%c0_15, %c0_16, %c0_17] : memref<1x1x128xf32, #tpu.memory_space<vmem>>, vector<1x1x128xf32>
    tpu.vector_store %arg7[%c0_15, %c0_16, %c0_17], %22 {strides = array<i32>} : memref<1x1x128xf32, #tpu.memory_space<vmem>>, vector<1x1x128xf32>,
    return
  }
  func.func @transform_0(%arg0: i32) -> (i32, i32) {
    %c0_i32 = arith.constant 0 : i32
    %c0_i32_0 = arith.constant 0 : i32
    return %arg0, %c0_i32 : i32, i32
  }
  func.func @transform_1(%arg0: i32) -> (i32, i32) {
    %c0_i32 = arith.constant 0 : i32
    %c0_i32_0 = arith.constant 0 : i32
    %c0_i32_1 = arith.constant 0 : i32
    return %c0_i32, %c0_i32_0 : i32, i32
  }
  func.func @transform_2(%arg0: i32) -> (i32, i32) {
    %c0_i32 = arith.constant 0 : i32
    %c0_i32_0 = arith.constant 0 : i32
    %c0_i32_1 = arith.constant 0 : i32
    return %c0_i32, %c0_i32_0 : i32, i32
  }
  func.func @transform_3(%arg0: i32) -> (i32, i32) {
    %c0_i32 = arith.constant 0 : i32
    %c0_i32_0 = arith.constant 0 : i32
    %c0_i32_1 = arith.constant 0 : i32
    return %c0_i32, %c0_i32_0 : i32, i32
  }
  func.func @transform_4(%arg0: i32) -> (i32, i32) {
    %c0_i32 = arith.constant 0 : i32
    %c0_i32_0 = arith.constant 0 : i32
    return %arg0, %c0_i32 : i32, i32
  }
  func.func @transform_5(%arg0: i32) -> (i32, i32, i32) {
    %c0_i32 = arith.constant 0 : i32
    %c0_i32_0 = arith.constant 0 : i32
    %c0_i32_1 = arith.constant 0 : i32
    return %arg0, %c0_i32, %c0_i32_0 : i32, i32, i32
  }
  func.func @transform_6(%arg0: i32) -> (i32, i32, i32) {
    %c0_i32 = arith.constant 0 : i32
    %c0_i32_0 = arith.constant 0 : i32
    %c0_i32_1 = arith.constant 0 : i32
    return %arg0, %c0_i32, %c0_i32_0 : i32, i32, i32
  }
}

module attributes {stable_mosaic.version = 11 : i64} {
  func.func @_bn_act_kernel(%arg0: i32, %arg1: memref<128x128xbf16, #tpu.memory_space<vmem>>, %arg2: memref<1x128xf32, #tpu.memory_space<vmem>>, %arg3: memref<1x128xf32, #tpu.memory_space<vmem>>, %arg4: memref<128x128xbf16, #tpu.memory_space<vmem>>) attributes {dimension_semantics = [#tpu.dimension_semantics<parallel>], iteration_bounds = array<i64: 1>, scalar_prefetch = 0 : i64, scratch_operands = 0 : i64, tpu.core_type = #tpu.core_type<tc>, window_params = [{transform_indices = @transform_0, window_bounds = array<i64: 128, 128>}, {pipeline_mode = #tpu.pipeline_mode<synchronous>, transform_indices = @transform_1, window_bounds = array<i64: 1, 128>}, {pipeline_mode = #tpu.pipeline_mode<synchronous>, transform_indices = @transform_2, window_bounds = array<i64: 1, 128>}, {transform_indices = @transform_3, window_bounds = array<i64: 128, 128>}]} {
    %c0 = arith.constant 0 : index
    %c0_0 = arith.constant 0 : index
    %0 = vector.load %arg1[%c0, %c0_0] : memref<128x128xbf16, #tpu.memory_space<vmem>>, vector<128x128xbf16>
    %1 = arith.extf %0 : vector<128x128xbf16> to vector<128x128xf32>
    %c0_1 = arith.constant 0 : index
    %c0_2 = arith.constant 0 : index
    %2 = vector.load %arg2[%c0_1, %c0_2] : memref<1x128xf32, #tpu.memory_space<vmem>>, vector<1x128xf32>
    %3 = vector.broadcast %2 : vector<1x128xf32> to vector<128x128xf32>
    %4 = arith.mulf %1, %3 : vector<128x128xf32>
    %c0_3 = arith.constant 0 : index
    %c0_4 = arith.constant 0 : index
    %5 = vector.load %arg3[%c0_3, %c0_4] : memref<1x128xf32, #tpu.memory_space<vmem>>, vector<1x128xf32>
    %6 = vector.broadcast %5 : vector<1x128xf32> to vector<128x128xf32>
    %7 = arith.addf %4, %6 : vector<128x128xf32>
    %8 = arith.truncf %7 : vector<128x128xf32> to vector<128x128xbf16>
    %c0_5 = arith.constant 0 : index
    %c0_6 = arith.constant 0 : index
    %9 = vector.load %arg4[%c0_5, %c0_6] : memref<128x128xbf16, #tpu.memory_space<vmem>>, vector<128x128xbf16>
    tpu.vector_store %arg4[%c0_5, %c0_6], %8 {strides = array<i32>} : memref<128x128xbf16, #tpu.memory_space<vmem>>, vector<128x128xbf16>,
    return
  }
  func.func @transform_0(%arg0: i32) -> (i32, i32) {
    %c0_i32 = arith.constant 0 : i32
    %c0_i32_0 = arith.constant 0 : i32
    return %arg0, %c0_i32 : i32, i32
  }
  func.func @transform_1(%arg0: i32) -> (i32, i32) {
    %c0_i32 = arith.constant 0 : i32
    %c0_i32_0 = arith.constant 0 : i32
    %c0_i32_1 = arith.constant 0 : i32
    return %c0_i32, %c0_i32_0 : i32, i32
  }
  func.func @transform_2(%arg0: i32) -> (i32, i32) {
    %c0_i32 = arith.constant 0 : i32
    %c0_i32_0 = arith.constant 0 : i32
    %c0_i32_1 = arith.constant 0 : i32
    return %c0_i32, %c0_i32_0 : i32, i32
  }
  func.func @transform_3(%arg0: i32) -> (i32, i32) {
    %c0_i32 = arith.constant 0 : i32
    %c0_i32_0 = arith.constant 0 : i32
    return %arg0, %c0_i32 : i32, i32
  }
}

module attributes {stable_mosaic.version = 11 : i64} {
  func.func @_bn_se_add_relu_kernel(%arg0: i32, %arg1: memref<1x64x128xbf16, #tpu.memory_space<vmem>>, %arg2: memref<1x1x128xf32, #tpu.memory_space<vmem>>, %arg3: memref<1x1x128xf32, #tpu.memory_space<vmem>>, %arg4: memref<128x8xf32, #tpu.memory_space<vmem>>, %arg5: memref<8x128xf32, #tpu.memory_space<vmem>>, %arg6: memref<1x64x128xbf16, #tpu.memory_space<vmem>>, %arg7: memref<1x64x128xf32, #tpu.memory_space<vmem>>) attributes {dimension_semantics = [#tpu.dimension_semantics<parallel>], iteration_bounds = array<i64: 2>, scalar_prefetch = 0 : i64, scratch_operands = 0 : i64, tpu.core_type = #tpu.core_type<tc>, window_params = [{transform_indices = @transform_0, window_bounds = array<i64: 1, 64, 128>}, {pipeline_mode = #tpu.pipeline_mode<synchronous>, transform_indices = @transform_1, window_bounds = array<i64: 1, 1, 128>}, {pipeline_mode = #tpu.pipeline_mode<synchronous>, transform_indices = @transform_2, window_bounds = array<i64: 1, 1, 128>}, {pipeline_mode = #tpu.pipeline_mode<synchronous>, transform_indices = @transform_3, window_bounds = array<i64: 128, 8>}, {pipeline_mode = #tpu.pipeline_mode<synchronous>, transform_indices = @transform_4, window_bounds = array<i64: 8, 128>}, {transform_indices = @transform_5, window_bounds = array<i64: 1, 64, 128>}, {transform_indices = @transform_6, window_bounds = array<i64: 1, 64, 128>}]} {
    %c0 = arith.constant 0 : index
    %c0_0 = arith.constant 0 : index
    %c0_1 = arith.constant 0 : index
    %0 = vector.load %arg1[%c0, %c0_0, %c0_1] : memref<1x64x128xbf16, #tpu.memory_space<vmem>>, vector<1x64x128xbf16>
    %1 = vector.shape_cast %0 : vector<1x64x128xbf16> to vector<64x128xbf16>
    %2 = arith.extf %1 : vector<64x128xbf16> to vector<64x128xf32>
    %c0_2 = arith.constant 0 : index
    %c0_3 = arith.constant 0 : index
    %c0_4 = arith.constant 0 : index
    %3 = vector.load %arg2[%c0_2, %c0_3, %c0_4] : memref<1x1x128xf32, #tpu.memory_space<vmem>>, vector<1x1x128xf32>
    %4 = vector.shape_cast %3 : vector<1x1x128xf32> to vector<1x128xf32>
    %5 = vector.broadcast %4 : vector<1x128xf32> to vector<64x128xf32>
    %6 = arith.mulf %2, %5 : vector<64x128xf32>
    %c0_5 = arith.constant 0 : index
    %c0_6 = arith.constant 0 : index
    %c0_7 = arith.constant 0 : index
    %7 = vector.load %arg3[%c0_5, %c0_6, %c0_7] : memref<1x1x128xf32, #tpu.memory_space<vmem>>, vector<1x1x128xf32>
    %8 = vector.shape_cast %7 : vector<1x1x128xf32> to vector<1x128xf32>
    %9 = vector.broadcast %8 : vector<1x128xf32> to vector<64x128xf32>
    %10 = arith.addf %6, %9 : vector<64x128xf32>
    %cst = arith.constant dense<0.000000e+00> : vector<128xf32>
    %11 = vector.multi_reduction <add>, %10, %cst [0] : vector<64x128xf32> to vector<128xf32>
    %12 = vector.shape_cast %11 : vector<128xf32> to vector<1x128xf32>
    %cst_8 = arith.constant 6.400000e+01 : f32
    %13 = vector.broadcast %cst_8 : f32 to vector<1x128xf32>
    %14 = arith.divf %12, %13 : vector<1x128xf32>
    %c0_9 = arith.constant 0 : index
    %c0_10 = arith.constant 0 : index
    %15 = vector.load %arg4[%c0_9, %c0_10] : memref<128x8xf32, #tpu.memory_space<vmem>>, vector<128x8xf32>
    %cst_11 = arith.constant dense<0.000000e+00> : vector<1x8xf32>
    %16 = tpu.matmul %14, %15, %cst_11 {dimension_numbers = #tpu.dot_dimension_numbers<[1], [0], [0], [1], [0, 0, 1, 1], [], []>} : vector<1x128xf32>, vector<128x8xf32>, vector<1x8xf32> -> vector<1x8xf32>
    %cst_12 = arith.constant 0.000000e+00 : f32
    %17 = vector.broadcast %cst_12 : f32 to vector<1x8xf32>
    %18 = arith.maximumf %16, %17 : vector<1x8xf32>
    %c0_13 = arith.constant 0 : index
    %c0_14 = arith.constant 0 : index
    %19 = vector.load %arg5[%c0_13, %c0_14] : memref<8x128xf32, #tpu.memory_space<vmem>>, vector<8x128xf32>
    %cst_15 = arith.constant dense<0.000000e+00> : vector<1x128xf32>
    %20 = tpu.matmul %18, %19, %cst_15 {dimension_numbers = #tpu.dot_dimension_numbers<[1], [0], [0], [1], [0, 0, 1, 1], [], []>} : vector<1x8xf32>, vector<8x128xf32>, vector<1x128xf32> -> vector<1x128xf32>
    %21 = arith.negf %20 : vector<1x128xf32>
    %22 = math.exp %21 : vector<1x128xf32>
    %cst_16 = arith.constant 1.000000e+00 : f32
    %23 = vector.broadcast %cst_16 : f32 to vector<1x128xf32>
    %24 = arith.addf %23, %22 : vector<1x128xf32>
    %25 = arith.divf %23, %24 : vector<1x128xf32>
    %26 = vector.broadcast %25 : vector<1x128xf32> to vector<64x128xf32>
    %27 = arith.mulf %10, %26 : vector<64x128xf32>
    %c0_17 = arith.constant 0 : index
    %c0_18 = arith.constant 0 : index
    %c0_19 = arith.constant 0 : index
    %28 = vector.load %arg6[%c0_17, %c0_18, %c0_19] : memref<1x64x128xbf16, #tpu.memory_space<vmem>>, vector<1x64x128xbf16>
    %29 = vector.shape_cast %28 : vector<1x64x128xbf16> to vector<64x128xbf16>
    %30 = arith.extf %29 : vector<64x128xbf16> to vector<64x128xf32>
    %31 = arith.addf %27, %30 : vector<64x128xf32>
    %cst_20 = arith.constant 0.000000e+00 : f32
    %32 = vector.broadcast %cst_20 : f32 to vector<64x128xf32>
    %33 = arith.maximumf %31, %32 : vector<64x128xf32>
    %34 = vector.shape_cast %33 : vector<64x128xf32> to vector<1x64x128xf32>
    %c0_21 = arith.constant 0 : index
    %c0_22 = arith.constant 0 : index
    %c0_23 = arith.constant 0 : index
    %35 = vector.load %arg7[%c0_21, %c0_22, %c0_23] : memref<1x64x128xf32, #tpu.memory_space<vmem>>, vector<1x64x128xf32>
    tpu.vector_store %arg7[%c0_21, %c0_22, %c0_23], %34 {strides = array<i32>} : memref<1x64x128xf32, #tpu.memory_space<vmem>>, vector<1x64x128xf32>,
    return
  }
  func.func @transform_0(%arg0: i32) -> (i32, i32, i32) {
    %c0_i32 = arith.constant 0 : i32
    %c0_i32_0 = arith.constant 0 : i32
    %c0_i32_1 = arith.constant 0 : i32
    return %arg0, %c0_i32, %c0_i32_0 : i32, i32, i32
  }
  func.func @transform_1(%arg0: i32) -> (i32, i32, i32) {
    %c0_i32 = arith.constant 0 : i32
    %c0_i32_0 = arith.constant 0 : i32
    %c0_i32_1 = arith.constant 0 : i32
    %c0_i32_2 = arith.constant 0 : i32
    return %c0_i32, %c0_i32_0, %c0_i32_1 : i32, i32, i32
  }
  func.func @transform_2(%arg0: i32) -> (i32, i32, i32) {
    %c0_i32 = arith.constant 0 : i32
    %c0_i32_0 = arith.constant 0 : i32
    %c0_i32_1 = arith.constant 0 : i32
    %c0_i32_2 = arith.constant 0 : i32
    return %c0_i32, %c0_i32_0, %c0_i32_1 : i32, i32, i32
  }
  func.func @transform_3(%arg0: i32) -> (i32, i32) {
    %c0_i32 = arith.constant 0 : i32
    %c0_i32_0 = arith.constant 0 : i32
    %c0_i32_1 = arith.constant 0 : i32
    return %c0_i32, %c0_i32_0 : i32, i32
  }
  func.func @transform_4(%arg0: i32) -> (i32, i32) {
    %c0_i32 = arith.constant 0 : i32
    %c0_i32_0 = arith.constant 0 : i32
    %c0_i32_1 = arith.constant 0 : i32
    return %c0_i32, %c0_i32_0 : i32, i32
  }
  func.func @transform_5(%arg0: i32) -> (i32, i32, i32) {
    %c0_i32 = arith.constant 0 : i32
    %c0_i32_0 = arith.constant 0 : i32
    %c0_i32_1 = arith.constant 0 : i32
    return %arg0, %c0_i32, %c0_i32_0 : i32, i32, i32
  }
  func.func @transform_6(%arg0: i32) -> (i32, i32, i32) {
    %c0_i32 = arith.constant 0 : i32
    %c0_i32_0 = arith.constant 0 : i32
    %c0_i32_1 = arith.constant 0 : i32
    return %arg0, %c0_i32, %c0_i32_0 : i32, i32, i32
  }
}

</mosaic_0001>

<bundles_post_ra>
// kernel: bottleneck_forward.8
= control target key start
LH: loop header
LB: loop body
LE: loop exit
PB: predicated region body
PF: predicated region fallthrough
CT: control target
= control target key end

     0   :  { %vm406_vm0 = vcmask 257024   ;;  %s1146_s0 = inlined_call_operand.vmem [shape: bf16[512,32], index: 0, kind: input, shape index: {}]   ;;  %s1147_s1 = inlined_call_operand.vmem [shape: f32[1,32], index: 1, kind: input, shape index: {}]   ;;  %s1148_s2 = inlined_call_operand.vmem [shape: f32[1,32], index: 2, kind: input, shape index: {}]   ;;  %s1149_s3 = inlined_call_operand.vmem [shape: bf16[512,32], index: 3, kind: output, shape index: {}]  }
   0x1   :  { %v476_v0 = vld [vmem:[%s1146_s0] sm:$0xff]   ;;  %v603_v5 = vld [vmem:[%s1146_s0 + $0x8] sm:$0xff]   ;;  %v604_v8 = vld [vmem:[%s1146_s0 + $0x10] sm:$0xff]  }
   0x2   :  { %v662_v1 = vld [vmem:[%s1147_s1] ss:$0 sm:$0xff]  ;;  %v477_v2 = vunpack.c.l.bf16 %v476_v0  ;;  %v478_v4 = vunpack.c.h.bf16 %v476_v0  ;;  %v481_v6 = vunpack.c.l.bf16 %v603_v5  ;;  %v482_v7 = vunpack.c.h.bf16 %v603_v5  ;;  %v605_v9 = vld [vmem:[%s1146_s0 + $0x18] sm:$0xff]   ;;  %v607_v39 = vld [vmem:[%s1146_s0 + $0x28] sm:$0xff]  }
   0x3   :  { %v667_v3 = vld [vmem:[%s1148_s2] ss:$0 sm:$0xff]  ;;  %v485_v12 = vunpack.c.l.bf16 %v604_v8  ;;  %v486_v13 = vunpack.c.h.bf16 %v604_v8  ;;  %v489_v16 = vunpack.c.l.bf16 %v605_v9  ;;  %v490_v17 = vunpack.c.h.bf16 %v605_v9  ;;  %v608_v44 = vld [vmem:[%s1146_s0 + $0x30] sm:$0xff]   ;;  %v609_v49 = vld [vmem:[%s1146_s0 + $0x38] sm:$0xff]  }
   0x4   :  { %v146_v10 = vmul.f32 %v662_v1, %v477_v2  ;;  %v147_v11 = vmul.f32 %v662_v1, %v478_v4  ;;  %v148_v14 = vmul.f32 %v662_v1, %v481_v6  ;;  %v149_v15 = vmul.f32 %v662_v1, %v482_v7  ;;  %v606_v34 = vld [vmem:[%s1146_s0 + $0x20] sm:$0xff]  }
   0x5   :  { %v150_v20 = vmul.f32 %v662_v1, %v485_v12  ;;  %v151_v21 = vmul.f32 %v662_v1, %v486_v13  ;;  %v152_v24 = vmul.f32 %v662_v1, %v489_v16  ;;  %v153_v25 = vmul.f32 %v662_v1, %v490_v17  ;;  %v610_v16 = vld [vmem:[%s1146_s0 + $0x40] sm:$0xff]  }
   0x6   :  { %v214_v18 = vadd.f32 %v667_v3, %v146_v10  ;;  %v215_v19 = vadd.f32 %v667_v3, %v147_v11  ;;  %v216_v22 = vadd.f32 %v667_v3, %v148_v14  ;;  %v217_v23 = vadd.f32 %v667_v3, %v149_v15 }
   0x7   :  { %v218_v28 = vadd.f32 %v667_v3, %v150_v20  ;;  %v219_v29 = vadd.f32 %v667_v3, %v151_v21  ;;  %v220_v32 = vadd.f32 %v667_v3, %v152_v24  ;;  %v221_v33 = vadd.f32 %v667_v3, %v153_v25  ;;  %v611_v21 = vld [vmem:[%s1146_s0 + $0x48] sm:$0xff]  }
   0x8   :  { %v278_v26 = vmax.f32 %v214_v18, 0.0  ;;  %v279_v27 = vmax.f32 %v215_v19, 0.0  ;;  %v280_v30 = vmax.f32 %v216_v22, 0.0  ;;  %v281_v31 = vmax.f32 %v217_v23, 0.0 }
   0x9   :  { %v282_v37 = vmax.f32 %v218_v28, 0.0  ;;  %v283_v38 = vmax.f32 %v219_v29, 0.0  ;;  %v284_v42 = vmax.f32 %v220_v32, 0.0  ;;  %v285_v43 = vmax.f32 %v221_v33, 0.0 }
   0xa   :  { %v342_v35 = vpack.c.bf16 %v278_v26, %v278_v26  ;;  %v343_v36 = vpack.c.bf16 %v279_v27, %v279_v27  ;;  %v344_v40 = vpack.c.bf16 %v280_v30, %v280_v30  ;;  %v345_v41 = vpack.c.bf16 %v281_v31, %v281_v31  ;;  %v612_v26 = vld [vmem:[%s1146_s0 + $0x50] sm:$0xff]   ;;  %v613_v31 = vld [vmem:[%s1146_s0 + $0x58] sm:$0xff]  }
   0xb   :  { %v346_v45 = vpack.c.bf16 %v282_v37, %v282_v37  ;;  %v347_v46 = vpack.c.bf16 %v283_v38, %v283_v38  ;;  %v493_v47 = vunpack.c.l.bf16 %v606_v34  ;;  %v494_v48 = vunpack.c.h.bf16 %v606_v34 }
   0xc   :  { %407 = vst.msk [vmem:[%s1149_s3] sm:$0xf] %vm406_vm0, %v342_v35  ;;  %v348_v50 = vpack.c.bf16 %v284_v42, %v284_v42  ;;  %v349_v51 = vpack.c.bf16 %v285_v43, %v285_v43  ;;  %v497_v52 = vunpack.c.l.bf16 %v607_v39  ;;  %v498_v53 = vunpack.c.h.bf16 %v607_v39 }
   0xd   :  { %408 = vst.msk [vmem:[%s1149_s3 + $0x4] sm:$0xf] %vm406_vm0, %v343_v36  ;;  %v154_v54 = vmul.f32 %v662_v1, %v493_v47  ;;  %v155_v55 = vmul.f32 %v662_v1, %v494_v48  ;;  %v501_v56 = vunpack.c.l.bf16 %v608_v44  ;;  %v502_v57 = vunpack.c.h.bf16 %v608_v44 }
   0xe   :  { %409 = vst.msk [vmem:[%s1149_s3 + $0x8] sm:$0xf] %vm406_vm0, %v344_v40  ;;  %v156_v58 = vmul.f32 %v662_v1, %v497_v52  ;;  %v157_v59 = vmul.f32 %v662_v1, %v498_v53  ;;  %v505_v60 = vunpack.c.l.bf16 %v609_v49  ;;  %v506_v61 = vunpack.c.h.bf16 %v609_v49 }
   0xf   :  { %410 = vst.msk [vmem:[%s1149_s3 + $0xc] sm:$0xf] %vm406_vm0, %v345_v41  ;;  %v222_v62 = vadd.f32 %v667_v3, %v154_v54  ;;  %v223_v63 = vadd.f32 %v667_v3, %v155_v55  ;;  %v158_v0 = vmul.f32 %v662_v1, %v501_v56  ;;  %v159_v2 = vmul.f32 %v662_v1, %v502_v57 }
  0x10   :  { %411 = vst.msk [vmem:[%s1149_s3 + $0x10] sm:$0xf] %vm406_vm0, %v346_v45  ;;  %v224_v4 = vadd.f32 %v667_v3, %v156_v58  ;;  %v225_v5 = vadd.f32 %v667_v3, %v157_v59  ;;  %v160_v6 = vmul.f32 %v662_v1, %v505_v60  ;;  %v161_v7 = vmul.f32 %v662_v1, %v506_v61  ;;  %v614_v60 = vld [vmem:[%s1146_s0 + $0x60] sm:$0xff]  }
  0x11   :  { %412 = vst.msk [vmem:[%s1149_s3 + $0x14] sm:$0xf] %vm406_vm0, %v347_v46  ;;  %v286_v8 = vmax.f32 %v222_v62, 0.0  ;;  %v287_v9 = vmax.f32 %v223_v63, 0.0  ;;  %v226_v10 = vadd.f32 %v667_v3, %v158_v0  ;;  %v227_v11 = vadd.f32 %v667_v3, %v159_v2  ;;  %v615_v2 = vld [vmem:[%s1146_s0 + $0x68] sm:$0xff]  }
  0x12   :  { %413 = vst.msk [vmem:[%s1149_s3 + $0x18] sm:$0xf] %vm406_vm0, %v348_v50  ;;  %v288_v12 = vmax.f32 %v224_v4, 0.0  ;;  %v289_v13 = vmax.f32 %v225_v5, 0.0  ;;  %v228_v14 = vadd.f32 %v667_v3, %v160_v6  ;;  %v229_v15 = vadd.f32 %v667_v3, %v161_v7 }
  0x13   :  { %414 = vst.msk [vmem:[%s1149_s3 + $0x1c] sm:$0xf] %vm406_vm0, %v349_v51  ;;  %v350_v17 = vpack.c.bf16 %v286_v8, %v286_v8  ;;  %v351_v18 = vpack.c.bf16 %v287_v9, %v287_v9  ;;  %v290_v19 = vmax.f32 %v226_v10, 0.0  ;;  %v291_v20 = vmax.f32 %v227_v11, 0.0  ;;  %v616_v8 = vld [vmem:[%s1146_s0 + $0x70] sm:$0xff]  }
  0x14   :  { %v352_v22 = vpack.c.bf16 %v288_v12, %v288_v12  ;;  %v353_v23 = vpack.c.bf16 %v289_v13, %v289_v13  ;;  %v292_v24 = vmax.f32 %v228_v14, 0.0  ;;  %v293_v25 = vmax.f32 %v229_v15, 0.0  ;;  %v617_v13 = vld [vmem:[%s1146_s0 + $0x78] sm:$0xff]  }
  0x15   :  { %415 = vst.msk [vmem:[%s1149_s3 + $0x20] sm:$0xf] %vm406_vm0, %v350_v17  ;;  %v354_v27 = vpack.c.bf16 %v290_v19, %v290_v19  ;;  %v355_v28 = vpack.c.bf16 %v291_v20, %v291_v20  ;;  %v509_v29 = vunpack.c.l.bf16 %v610_v16  ;;  %v510_v30 = vunpack.c.h.bf16 %v610_v16 }
  0x16   :  { %416 = vst.msk [vmem:[%s1149_s3 + $0x24] sm:$0xf] %vm406_vm0, %v351_v18  ;;  %v356_v32 = vpack.c.bf16 %v292_v24, %v292_v24  ;;  %v357_v33 = vpack.c.bf16 %v293_v25, %v293_v25  ;;  %v513_v34 = vunpack.c.l.bf16 %v611_v21  ;;  %v514_v35 = vunpack.c.h.bf16 %v611_v21 }
  0x17   :  { %417 = vst.msk [vmem:[%s1149_s3 + $0x28] sm:$0xf] %vm406_vm0, %v352_v22  ;;  %v162_v36 = vmul.f32 %v662_v1, %v509_v29  ;;  %v163_v37 = vmul.f32 %v662_v1, %v510_v30  ;;  %v517_v38 = vunpack.c.l.bf16 %v612_v26  ;;  %v518_v39 = vunpack.c.h.bf16 %v612_v26 }
  0x18   :  { %418 = vst.msk [vmem:[%s1149_s3 + $0x2c] sm:$0xf] %vm406_vm0, %v353_v23  ;;  %v164_v40 = vmul.f32 %v662_v1, %v513_v34  ;;  %v165_v41 = vmul.f32 %v662_v1, %v514_v35  ;;  %v521_v42 = vunpack.c.l.bf16 %v613_v31  ;;  %v522_v43 = vunpack.c.h.bf16 %v613_v31 }
  0x19   :  { %419 = vst.msk [vmem:[%s1149_s3 + $0x30] sm:$0xf] %vm406_vm0, %v354_v27  ;;  %v230_v44 = vadd.f32 %v667_v3, %v162_v36  ;;  %v231_v45 = vadd.f32 %v667_v3, %v163_v37  ;;  %v166_v46 = vmul.f32 %v662_v1, %v517_v38  ;;  %v167_v47 = vmul.f32 %v662_v1, %v518_v39 }
  0x1a   :  { %420 = vst.msk [vmem:[%s1149_s3 + $0x34] sm:$0xf] %vm406_vm0, %v355_v28  ;;  %v232_v48 = vadd.f32 %v667_v3, %v164_v40  ;;  %v233_v49 = vadd.f32 %v667_v3, %v165_v41  ;;  %v168_v50 = vmul.f32 %v662_v1, %v521_v42  ;;  %v169_v51 = vmul.f32 %v662_v1, %v522_v43  ;;  %v618_v42 = vld [vmem:[%s1146_s0 + $0x80] sm:$0xff]  }
  0x1b   :  { %421 = vst.msk [vmem:[%s1149_s3 + $0x38] sm:$0xf] %vm406_vm0, %v356_v32  ;;  %v294_v52 = vmax.f32 %v230_v44, 0.0  ;;  %v295_v53 = vmax.f32 %v231_v45, 0.0  ;;  %v234_v54 = vadd.f32 %v667_v3, %v166_v46  ;;  %v235_v55 = vadd.f32 %v667_v3, %v167_v47  ;;  %v619_v47 = vld [vmem:[%s1146_s0 + $0x88] sm:$0xff]  }
  0x1c   :  { %422 = vst.msk [vmem:[%s1149_s3 + $0x3c] sm:$0xf] %vm406_vm0, %v357_v33  ;;  %v296_v56 = vmax.f32 %v232_v48, 0.0  ;;  %v297_v57 = vmax.f32 %v233_v49, 0.0  ;;  %v236_v58 = vadd.f32 %v667_v3, %v168_v50  ;;  %v237_v59 = vadd.f32 %v667_v3, %v169_v51 }
  0x1d   :  { %v358_v61 = vpack.c.bf16 %v294_v52, %v294_v52  ;;  %v359_v62 = vpack.c.bf16 %v295_v53, %v295_v53  ;;  %v298_v63 = vmax.f32 %v234_v54, 0.0  ;;  %v299_v0 = vmax.f32 %v235_v55, 0.0  ;;  %v620_v52 = vld [vmem:[%s1146_s0 + $0x90] sm:$0xff]  }
  0x1e   :  { %v360_v4 = vpack.c.bf16 %v296_v56, %v296_v56  ;;  %v361_v5 = vpack.c.bf16 %v297_v57, %v297_v57  ;;  %v300_v6 = vmax.f32 %v236_v58, 0.0  ;;  %v301_v7 = vmax.f32 %v237_v59, 0.0  ;;  %v621_v57 = vld [vmem:[%s1146_s0 + $0x98] sm:$0xff]  }
  0x1f   :  { %423 = vst.msk [vmem:[%s1149_s3 + $0x40] sm:$0xf] %vm406_vm0, %v358_v61  ;;  %v362_v9 = vpack.c.bf16 %v298_v63, %v298_v63  ;;  %v363_v10 = vpack.c.bf16 %v299_v0, %v299_v0  ;;  %v525_v11 = vunpack.c.l.bf16 %v614_v60  ;;  %v526_v12 = vunpack.c.h.bf16 %v614_v60 }
  0x20   :  { %424 = vst.msk [vmem:[%s1149_s3 + $0x44] sm:$0xf] %vm406_vm0, %v359_v62  ;;  %v364_v14 = vpack.c.bf16 %v300_v6, %v300_v6  ;;  %v365_v15 = vpack.c.bf16 %v301_v7, %v301_v7  ;;  %v529_v16 = vunpack.c.l.bf16 %v615_v2  ;;  %v530_v17 = vunpack.c.h.bf16 %v615_v2 }
  0x21   :  { %425 = vst.msk [vmem:[%s1149_s3 + $0x48] sm:$0xf] %vm406_vm0, %v360_v4  ;;  %v170_v18 = vmul.f32 %v662_v1, %v525_v11  ;;  %v171_v19 = vmul.f32 %v662_v1, %v526_v12  ;;  %v533_v20 = vunpack.c.l.bf16 %v616_v8  ;;  %v534_v21 = vunpack.c.h.bf16 %v616_v8 }
  0x22   :  { %426 = vst.msk [vmem:[%s1149_s3 + $0x4c] sm:$0xf] %vm406_vm0, %v361_v5  ;;  %v172_v22 = vmul.f32 %v662_v1, %v529_v16  ;;  %v173_v23 = vmul.f32 %v662_v1, %v530_v17  ;;  %v537_v24 = vunpack.c.l.bf16 %v617_v13  ;;  %v538_v25 = vunpack.c.h.bf16 %v617_v13 }
  0x23   :  { %427 = vst.msk [vmem:[%s1149_s3 + $0x50] sm:$0xf] %vm406_vm0, %v362_v9  ;;  %v238_v26 = vadd.f32 %v667_v3, %v170_v18  ;;  %v239_v27 = vadd.f32 %v667_v3, %v171_v19  ;;  %v174_v28 = vmul.f32 %v662_v1, %v533_v20  ;;  %v175_v29 = vmul.f32 %v662_v1, %v534_v21 }
  0x24   :  { %428 = vst.msk [vmem:[%s1149_s3 + $0x54] sm:$0xf] %vm406_vm0, %v363_v10  ;;  %v240_v30 = vadd.f32 %v667_v3, %v172_v22  ;;  %v241_v31 = vadd.f32 %v667_v3, %v173_v23  ;;  %v176_v32 = vmul.f32 %v662_v1, %v537_v24  ;;  %v177_v33 = vmul.f32 %v662_v1, %v538_v25  ;;  %v622_v24 = vld [vmem:[%s1146_s0 + $0xa0] sm:$0xff]  }
  0x25   :  { %429 = vst.msk [vmem:[%s1149_s3 + $0x58] sm:$0xf] %vm406_vm0, %v364_v14  ;;  %v302_v34 = vmax.f32 %v238_v26, 0.0  ;;  %v303_v35 = vmax.f32 %v239_v27, 0.0  ;;  %v242_v36 = vadd.f32 %v667_v3, %v174_v28  ;;  %v243_v37 = vadd.f32 %v667_v3, %v175_v29  ;;  %v623_v29 = vld [vmem:[%s1146_s0 + $0xa8] sm:$0xff]  }
  0x26   :  { %430 = vst.msk [vmem:[%s1149_s3 + $0x5c] sm:$0xf] %vm406_vm0, %v365_v15  ;;  %v304_v38 = vmax.f32 %v240_v30, 0.0  ;;  %v305_v39 = vmax.f32 %v241_v31, 0.0  ;;  %v244_v40 = vadd.f32 %v667_v3, %v176_v32  ;;  %v245_v41 = vadd.f32 %v667_v3, %v177_v33 }
  0x27   :  { %v366_v43 = vpack.c.bf16 %v302_v34, %v302_v34  ;;  %v367_v44 = vpack.c.bf16 %v303_v35, %v303_v35  ;;  %v306_v45 = vmax.f32 %v242_v36, 0.0  ;;  %v307_v46 = vmax.f32 %v243_v37, 0.0  ;;  %v624_v34 = vld [vmem:[%s1146_s0 + $0xb0] sm:$0xff]  }
  0x28   :  { %v368_v48 = vpack.c.bf16 %v304_v38, %v304_v38  ;;  %v369_v49 = vpack.c.bf16 %v305_v39, %v305_v39  ;;  %v308_v50 = vmax.f32 %v244_v40, 0.0  ;;  %v309_v51 = vmax.f32 %v245_v41, 0.0  ;;  %v625_v39 = vld [vmem:[%s1146_s0 + $0xb8] sm:$0xff]  }
  0x29   :  { %431 = vst.msk [vmem:[%s1149_s3 + $0x60] sm:$0xf] %vm406_vm0, %v366_v43  ;;  %v370_v53 = vpack.c.bf16 %v306_v45, %v306_v45  ;;  %v371_v54 = vpack.c.bf16 %v307_v46, %v307_v46  ;;  %v541_v55 = vunpack.c.l.bf16 %v618_v42  ;;  %v542_v56 = vunpack.c.h.bf16 %v618_v42 }
  0x2a   :  { %432 = vst.msk [vmem:[%s1149_s3 + $0x64] sm:$0xf] %vm406_vm0, %v367_v44  ;;  %v372_v58 = vpack.c.bf16 %v308_v50, %v308_v50  ;;  %v373_v59 = vpack.c.bf16 %v309_v51, %v309_v51  ;;  %v545_v60 = vunpack.c.l.bf16 %v619_v47  ;;  %v546_v61 = vunpack.c.h.bf16 %v619_v47 }
  0x2b   :  { %433 = vst.msk [vmem:[%s1149_s3 + $0x68] sm:$0xf] %vm406_vm0, %v368_v48  ;;  %v178_v62 = vmul.f32 %v662_v1, %v541_v55  ;;  %v179_v63 = vmul.f32 %v662_v1, %v542_v56  ;;  %v549_v0 = vunpack.c.l.bf16 %v620_v52  ;;  %v550_v2 = vunpack.c.h.bf16 %v620_v52 }
  0x2c   :  { %434 = vst.msk [vmem:[%s1149_s3 + $0x6c] sm:$0xf] %vm406_vm0, %v369_v49  ;;  %v180_v4 = vmul.f32 %v662_v1, %v545_v60  ;;  %v181_v5 = vmul.f32 %v662_v1, %v546_v61  ;;  %v553_v6 = vunpack.c.l.bf16 %v621_v57  ;;  %v554_v7 = vunpack.c.h.bf16 %v621_v57 }
  0x2d   :  { %435 = vst.msk [vmem:[%s1149_s3 + $0x70] sm:$0xf] %vm406_vm0, %v370_v53  ;;  %v246_v8 = vadd.f32 %v667_v3, %v178_v62  ;;  %v247_v9 = vadd.f32 %v667_v3, %v179_v63  ;;  %v182_v10 = vmul.f32 %v662_v1, %v549_v0  ;;  %v183_v11 = vmul.f32 %v662_v1, %v550_v2 }
  0x2e   :  { %436 = vst.msk [vmem:[%s1149_s3 + $0x74] sm:$0xf] %vm406_vm0, %v371_v54  ;;  %v248_v12 = vadd.f32 %v667_v3, %v180_v4  ;;  %v249_v13 = vadd.f32 %v667_v3, %v181_v5  ;;  %v184_v14 = vmul.f32 %v662_v1, %v553_v6  ;;  %v185_v15 = vmul.f32 %v662_v1, %v554_v7  ;;  %v626_v6 = vld [vmem:[%s1146_s0 + $0xc0] sm:$0xff]  }
  0x2f   :  { %437 = vst.msk [vmem:[%s1149_s3 + $0x78] sm:$0xf] %vm406_vm0, %v372_v58  ;;  %v310_v16 = vmax.f32 %v246_v8, 0.0  ;;  %v311_v17 = vmax.f32 %v247_v9, 0.0  ;;  %v250_v18 = vadd.f32 %v667_v3, %v182_v10  ;;  %v251_v19 = vadd.f32 %v667_v3, %v183_v11  ;;  %v627_v11 = vld [vmem:[%s1146_s0 + $0xc8] sm:$0xff]  }
  0x30   :  { %438 = vst.msk [vmem:[%s1149_s3 + $0x7c] sm:$0xf] %vm406_vm0, %v373_v59  ;;  %v312_v20 = vmax.f32 %v248_v12, 0.0  ;;  %v313_v21 = vmax.f32 %v249_v13, 0.0  ;;  %v252_v22 = vadd.f32 %v667_v3, %v184_v14  ;;  %v253_v23 = vadd.f32 %v667_v3, %v185_v15 }
  0x31   :  { %v374_v25 = vpack.c.bf16 %v310_v16, %v310_v16  ;;  %v375_v26 = vpack.c.bf16 %v311_v17, %v311_v17  ;;  %v314_v27 = vmax.f32 %v250_v18, 0.0  ;;  %v315_v28 = vmax.f32 %v251_v19, 0.0  ;;  %v628_v16 = vld [vmem:[%s1146_s0 + $0xd0] sm:$0xff]  }
  0x32   :  { %v376_v30 = vpack.c.bf16 %v312_v20, %v312_v20  ;;  %v377_v31 = vpack.c.bf16 %v313_v21, %v313_v21  ;;  %v316_v32 = vmax.f32 %v252_v22, 0.0  ;;  %v317_v33 = vmax.f32 %v253_v23, 0.0  ;;  %v629_v21 = vld [vmem:[%s1146_s0 + $0xd8] sm:$0xff]  }
  0x33   :  { %439 = vst.msk [vmem:[%s1149_s3 + $0x80] sm:$0xf] %vm406_vm0, %v374_v25  ;;  %v378_v35 = vpack.c.bf16 %v314_v27, %v314_v27  ;;  %v379_v36 = vpack.c.bf16 %v315_v28, %v315_v28  ;;  %v557_v37 = vunpack.c.l.bf16 %v622_v24  ;;  %v558_v38 = vunpack.c.h.bf16 %v622_v24 }
  0x34   :  { %440 = vst.msk [vmem:[%s1149_s3 + $0x84] sm:$0xf] %vm406_vm0, %v375_v26  ;;  %v380_v40 = vpack.c.bf16 %v316_v32, %v316_v32  ;;  %v381_v41 = vpack.c.bf16 %v317_v33, %v317_v33  ;;  %v561_v42 = vunpack.c.l.bf16 %v623_v29  ;;  %v562_v43 = vunpack.c.h.bf16 %v623_v29 }
  0x35   :  { %441 = vst.msk [vmem:[%s1149_s3 + $0x88] sm:$0xf] %vm406_vm0, %v376_v30  ;;  %v186_v44 = vmul.f32 %v662_v1, %v557_v37  ;;  %v187_v45 = vmul.f32 %v662_v1, %v558_v38  ;;  %v565_v46 = vunpack.c.l.bf16 %v624_v34  ;;  %v566_v47 = vunpack.c.h.bf16 %v624_v34 }
  0x36   :  { %442 = vst.msk [vmem:[%s1149_s3 + $0x8c] sm:$0xf] %vm406_vm0, %v377_v31  ;;  %v188_v48 = vmul.f32 %v662_v1, %v561_v42  ;;  %v189_v49 = vmul.f32 %v662_v1, %v562_v43  ;;  %v569_v50 = vunpack.c.l.bf16 %v625_v39  ;;  %v570_v51 = vunpack.c.h.bf16 %v625_v39 }
  0x37   :  { %443 = vst.msk [vmem:[%s1149_s3 + $0x90] sm:$0xf] %vm406_vm0, %v378_v35  ;;  %v254_v52 = vadd.f32 %v667_v3, %v186_v44  ;;  %v255_v53 = vadd.f32 %v667_v3, %v187_v45  ;;  %v190_v54 = vmul.f32 %v662_v1, %v565_v46  ;;  %v191_v55 = vmul.f32 %v662_v1, %v566_v47 }
  0x38   :  { %444 = vst.msk [vmem:[%s1149_s3 + $0x94] sm:$0xf] %vm406_vm0, %v379_v36  ;;  %v256_v56 = vadd.f32 %v667_v3, %v188_v48  ;;  %v257_v57 = vadd.f32 %v667_v3, %v189_v49  ;;  %v192_v58 = vmul.f32 %v662_v1, %v569_v50  ;;  %v193_v59 = vmul.f32 %v662_v1, %v570_v51  ;;  %v630_v50 = vld [vmem:[%s1146_s0 + $0xe0] sm:$0xff]  }
  0x39   :  { %445 = vst.msk [vmem:[%s1149_s3 + $0x98] sm:$0xf] %vm406_vm0, %v380_v40  ;;  %v318_v60 = vmax.f32 %v254_v52, 0.0  ;;  %v319_v61 = vmax.f32 %v255_v53, 0.0  ;;  %v258_v62 = vadd.f32 %v667_v3, %v190_v54  ;;  %v259_v63 = vadd.f32 %v667_v3, %v191_v55  ;;  %v631_v55 = vld [vmem:[%s1146_s0 + $0xe8] sm:$0xff]  }
  0x3a   :  { %446 = vst.msk [vmem:[%s1149_s3 + $0x9c] sm:$0xf] %vm406_vm0, %v381_v41  ;;  %v320_v0 = vmax.f32 %v256_v56, 0.0  ;;  %v321_v2 = vmax.f32 %v257_v57, 0.0  ;;  %v260_v4 = vadd.f32 %v667_v3, %v192_v58  ;;  %v261_v5 = vadd.f32 %v667_v3, %v193_v59 }
  0x3b   :  { %v382_v7 = vpack.c.bf16 %v318_v60, %v318_v60  ;;  %v383_v8 = vpack.c.bf16 %v319_v61, %v319_v61  ;;  %v322_v9 = vmax.f32 %v258_v62, 0.0  ;;  %v323_v10 = vmax.f32 %v259_v63, 0.0  ;;  %v632_v60 = vld [vmem:[%s1146_s0 + $0xf0] sm:$0xff]  }
  0x3c   :  { %v384_v12 = vpack.c.bf16 %v320_v0, %v320_v0  ;;  %v385_v13 = vpack.c.bf16 %v321_v2, %v321_v2  ;;  %v324_v14 = vmax.f32 %v260_v4, 0.0  ;;  %v325_v15 = vmax.f32 %v261_v5, 0.0  ;;  %v633_v2 = vld [vmem:[%s1146_s0 + $0xf8] sm:$0xff]  }
  0x3d   :  { %447 = vst.msk [vmem:[%s1149_s3 + $0xa0] sm:$0xf] %vm406_vm0, %v382_v7  ;;  %v386_v17 = vpack.c.bf16 %v322_v9, %v322_v9  ;;  %v387_v18 = vpack.c.bf16 %v323_v10, %v323_v10  ;;  %v573_v19 = vunpack.c.l.bf16 %v626_v6  ;;  %v574_v20 = vunpack.c.h.bf16 %v626_v6 }
  0x3e   :  { %448 = vst.msk [vmem:[%s1149_s3 + $0xa4] sm:$0xf] %vm406_vm0, %v383_v8  ;;  %v388_v22 = vpack.c.bf16 %v324_v14, %v324_v14  ;;  %v389_v23 = vpack.c.bf16 %v325_v15, %v325_v15  ;;  %v577_v24 = vunpack.c.l.bf16 %v627_v11  ;;  %v578_v25 = vunpack.c.h.bf16 %v627_v11 }
  0x3f   :  { %449 = vst.msk [vmem:[%s1149_s3 + $0xa8] sm:$0xf] %vm406_vm0, %v384_v12  ;;  %v194_v26 = vmul.f32 %v662_v1, %v573_v19  ;;  %v195_v27 = vmul.f32 %v662_v1, %v574_v20  ;;  %v581_v28 = vunpack.c.l.bf16 %v628_v16  ;;  %v582_v29 = vunpack.c.h.bf16 %v628_v16 }
  0x40   :  { %450 = vst.msk [vmem:[%s1149_s3 + $0xac] sm:$0xf] %vm406_vm0, %v385_v13  ;;  %v196_v30 = vmul.f32 %v662_v1, %v577_v24  ;;  %v197_v31 = vmul.f32 %v662_v1, %v578_v25  ;;  %v585_v32 = vunpack.c.l.bf16 %v629_v21  ;;  %v586_v33 = vunpack.c.h.bf16 %v629_v21 }
  0x41   :  { %451 = vst.msk [vmem:[%s1149_s3 + $0xb0] sm:$0xf] %vm406_vm0, %v386_v17  ;;  %v262_v34 = vadd.f32 %v667_v3, %v194_v26  ;;  %v263_v35 = vadd.f32 %v667_v3, %v195_v27  ;;  %v198_v36 = vmul.f32 %v662_v1, %v581_v28  ;;  %v199_v37 = vmul.f32 %v662_v1, %v582_v29 }
  0x42   :  { %452 = vst.msk [vmem:[%s1149_s3 + $0xb4] sm:$0xf] %vm406_vm0, %v387_v18  ;;  %v264_v38 = vadd.f32 %v667_v3, %v196_v30  ;;  %v265_v39 = vadd.f32 %v667_v3, %v197_v31  ;;  %v200_v40 = vmul.f32 %v662_v1, %v585_v32  ;;  %v201_v41 = vmul.f32 %v662_v1, %v586_v33 }
  0x43   :  { %453 = vst.msk [vmem:[%s1149_s3 + $0xb8] sm:$0xf] %vm406_vm0, %v388_v22  ;;  %v326_v42 = vmax.f32 %v262_v34, 0.0  ;;  %v327_v43 = vmax.f32 %v263_v35, 0.0  ;;  %v266_v44 = vadd.f32 %v667_v3, %v198_v36  ;;  %v267_v45 = vadd.f32 %v667_v3, %v199_v37 }
  0x44   :  { %454 = vst.msk [vmem:[%s1149_s3 + $0xbc] sm:$0xf] %vm406_vm0, %v389_v23  ;;  %v328_v46 = vmax.f32 %v264_v38, 0.0  ;;  %v329_v47 = vmax.f32 %v265_v39, 0.0  ;;  %v268_v48 = vadd.f32 %v667_v3, %v200_v40  ;;  %v269_v49 = vadd.f32 %v667_v3, %v201_v41 }
  0x45   :  { %v390_v51 = vpack.c.bf16 %v326_v42, %v326_v42  ;;  %v391_v52 = vpack.c.bf16 %v327_v43, %v327_v43  ;;  %v330_v53 = vmax.f32 %v266_v44, 0.0  ;;  %v331_v54 = vmax.f32 %v267_v45, 0.0 }
  0x46   :  { %v392_v56 = vpack.c.bf16 %v328_v46, %v328_v46  ;;  %v393_v57 = vpack.c.bf16 %v329_v47, %v329_v47  ;;  %v332_v58 = vmax.f32 %v268_v48, 0.0  ;;  %v333_v59 = vmax.f32 %v269_v49, 0.0 }
  0x47   :  { %455 = vst.msk [vmem:[%s1149_s3 + $0xc0] sm:$0xf] %vm406_vm0, %v390_v51  ;;  %v394_v61 = vpack.c.bf16 %v330_v53, %v330_v53  ;;  %v395_v62 = vpack.c.bf16 %v331_v54, %v331_v54  ;;  %v589_v63 = vunpack.c.l.bf16 %v630_v50  ;;  %v590_v0 = vunpack.c.h.bf16 %v630_v50 }
  0x48   :  { %456 = vst.msk [vmem:[%s1149_s3 + $0xc4] sm:$0xf] %vm406_vm0, %v391_v52  ;;  %v396_v4 = vpack.c.bf16 %v332_v58, %v332_v58  ;;  %v397_v5 = vpack.c.bf16 %v333_v59, %v333_v59  ;;  %v593_v6 = vunpack.c.l.bf16 %v631_v55  ;;  %v594_v7 = vunpack.c.h.bf16 %v631_v55 }
  0x49   :  { %457 = vst.msk [vmem:[%s1149_s3 + $0xc8] sm:$0xf] %vm406_vm0, %v392_v56  ;;  %v202_v8 = vmul.f32 %v662_v1, %v589_v63  ;;  %v203_v9 = vmul.f32 %v662_v1, %v590_v0  ;;  %v597_v10 = vunpack.c.l.bf16 %v632_v60  ;;  %v598_v11 = vunpack.c.h.bf16 %v632_v60 }
  0x4a   :  { %458 = vst.msk [vmem:[%s1149_s3 + $0xcc] sm:$0xf] %vm406_vm0, %v393_v57  ;;  %v204_v12 = vmul.f32 %v662_v1, %v593_v6  ;;  %v205_v13 = vmul.f32 %v662_v1, %v594_v7  ;;  %v601_v14 = vunpack.c.l.bf16 %v633_v2  ;;  %v602_v15 = vunpack.c.h.bf16 %v633_v2 }
  0x4b   :  { %459 = vst.msk [vmem:[%s1149_s3 + $0xd0] sm:$0xf] %vm406_vm0, %v394_v61  ;;  %v270_v16 = vadd.f32 %v667_v3, %v202_v8  ;;  %v271_v17 = vadd.f32 %v667_v3, %v203_v9  ;;  %v206_v18 = vmul.f32 %v662_v1, %v597_v10  ;;  %v207_v19 = vmul.f32 %v662_v1, %v598_v11 }
  0x4c   :  { %460 = vst.msk [vmem:[%s1149_s3 + $0xd4] sm:$0xf] %vm406_vm0, %v395_v62  ;;  %v272_v20 = vadd.f32 %v667_v3, %v204_v12  ;;  %v273_v21 = vadd.f32 %v667_v3, %v205_v13  ;;  %v208_v22 = vmul.f32 %v662_v1, %v601_v14  ;;  %v209_v23 = vmul.f32 %v662_v1, %v602_v15 }
  0x4d   :  { %461 = vst.msk [vmem:[%s1149_s3 + $0xd8] sm:$0xf] %vm406_vm0, %v396_v4  ;;  %v334_v24 = vmax.f32 %v270_v16, 0.0  ;;  %v335_v25 = vmax.f32 %v271_v17, 0.0  ;;  %v274_v26 = vadd.f32 %v667_v3, %v206_v18  ;;  %v275_v27 = vadd.f32 %v667_v3, %v207_v19 }
  0x4e   :  { %462 = vst.msk [vmem:[%s1149_s3 + $0xdc] sm:$0xf] %vm406_vm0, %v397_v5  ;;  %v336_v28 = vmax.f32 %v272_v20, 0.0  ;;  %v337_v29 = vmax.f32 %v273_v21, 0.0  ;;  %v276_v1 = vadd.f32 %v667_v3, %v208_v22  ;;  %v277_v30 = vadd.f32 %v667_v3, %v209_v23 }
  0x4f   :  { %v398_v31 = vpack.c.bf16 %v334_v24, %v334_v24  ;;  %v399_v32 = vpack.c.bf16 %v335_v25, %v335_v25  ;;  %v338_v33 = vmax.f32 %v274_v26, 0.0  ;;  %v339_v34 = vmax.f32 %v275_v27, 0.0 }
  0x50   :  { %v400_v35 = vpack.c.bf16 %v336_v28, %v336_v28  ;;  %v401_v36 = vpack.c.bf16 %v337_v29, %v337_v29  ;;  %v340_v37 = vmax.f32 %v276_v1, 0.0  ;;  %v341_v38 = vmax.f32 %v277_v30, 0.0 }
  0x51   :  { %463 = vst.msk [vmem:[%s1149_s3 + $0xe0] sm:$0xf] %vm406_vm0, %v398_v31  ;;  %v402_v39 = vpack.c.bf16 %v338_v33, %v338_v33  ;;  %v403_v3 = vpack.c.bf16 %v339_v34, %v339_v34 }
  0x52   :  { %464 = vst.msk [vmem:[%s1149_s3 + $0xe4] sm:$0xf] %vm406_vm0, %v399_v32  ;;  %v404_v40 = vpack.c.bf16 %v340_v37, %v340_v37  ;;  %v405_v41 = vpack.c.bf16 %v341_v38, %v341_v38 }
  0x53   :  { %465 = vst.msk [vmem:[%s1149_s3 + $0xe8] sm:$0xf] %vm406_vm0, %v400_v35 }
  0x54   :  { %466 = vst.msk [vmem:[%s1149_s3 + $0xec] sm:$0xf] %vm406_vm0, %v401_v36 }
  0x55   :  { %467 = vst.msk [vmem:[%s1149_s3 + $0xf0] sm:$0xf] %vm406_vm0, %v402_v39 }
  0x56   :  { %468 = vst.msk [vmem:[%s1149_s3 + $0xf4] sm:$0xf] %vm406_vm0, %v403_v3 }
  0x57   :  { %469 = vst.msk [vmem:[%s1149_s3 + $0xf8] sm:$0xf] %vm406_vm0, %v404_v40 }
  0x58   :  { %470 = vst.msk [vmem:[%s1149_s3 + $0xfc] sm:$0xf] %vm406_vm0, %v405_v41 }

// kernel: bottleneck_forward.7
= control target key start
LH: loop header
LB: loop body
LE: loop exit
PB: predicated region body
PF: predicated region fallthrough
CT: control target
= control target key end

     0   :  { %10 = vsyncpa [#allocation3], 0  ;;  %s994_s18 = smov [#allocation2]   ;;  %s995_s20 = smov 128   ;;  %s1843_s0 = inlined_call_operand.hbm [shape: f32[512,64], index: 0, kind: input, shape index: {}]   ;;  %s1844_s1 = inlined_call_operand.vmem [shape: bf16[64,32], index: 1, kind: input, shape index: {}]   ;;  %s1845_s2 = inlined_call_operand.vmem [shape: bf16[512,32], index: 2, kind: output, shape index: {0}]   ;;  %s1846_s3 = inlined_call_operand.vmem [shape: f32[1,1,32], index: 3, kind: output, shape index: {1}]   ;;  %s1847_s4 = inlined_call_operand.vmem [shape: f32[1,1,32], index: 4, kind: output, shape index: {2}]  }
   0x1   :  { %s15_s17 = sshll.u32 %s1843_s0, 4  ;;  %s17_s19 = sshll.u32 %s994_s18, 4  ;;  %s16_s17 = int_to_ptr.hbm [resolvable:$true] %s15_s17  ;;  %s18_s19 = int_to_ptr.vmem [resolvable:$true] %s17_s19 }
   0x2   :  { %s996_s21 = smov 8  }
   0x3   :  { %23 = dma.hbm_to_vmem [thread:$0]  %s16_s17, 8192, %s18_s19, [#allocation3], %s995_s20, %s995_s20, %s996_s21  }
   0x4   :  { %992 = dma.done.wait [#allocation3], 8192  }
   0x5   :  { %993 = vsyncadd [#allocation3], 4294959104  ;;  %v952_v0 = vld [vmem:[%s1844_s1 + $0x18] sm:$0xff]  ;;  %v951_v1 = vld [vmem:[%s1844_s1 + $0x10] sm:$0xff]  ;;  %vm159_vm0 = vcmask 523264   ;;  %vm489_vm1 = vcmask 257024  }
   0x6   :  { %260 = vmatpush.bf16.msra.mxu0 %v952_v0  ;;  %953 = vmatpush.bf16.msra.mxu1 %v952_v0  ;;  %v950_v2 = vld [vmem:[%s1844_s1 + $0x8] sm:$0xff]  ;;  %v949_v3 = vld [vmem:[%s1844_s1] sm:$0xff]  ;;  %v33_v10 = vld [vmem:[#allocation2 + $0x10] sm:$0xff]  ;;  %vm554_vm2 = vcmask 261120   ;;  %vm688_vm3 = vcmask 253952  }
   0x7   :  { %954 = vmatpush.bf16.msra.mxu2 %v952_v0  ;;  %955 = vmatpush.bf16.msra.mxu3 %v952_v0  ;;  %v31_v4 = vld [vmem:[#allocation2] sm:$0xff]  ;;  %v32_v5 = vld [vmem:[#allocation2 + $0x8] sm:$0xff]  ;;  %v34_v11 = vld [vmem:[#allocation2 + $0x18] sm:$0xff] }
   0x8   :  { %v47_v6 = vld [vmem:[#allocation2 + $0x80] sm:$0xff]  ;;  %v48_v7 = vld [vmem:[#allocation2 + $0x88] sm:$0xff]  ;;  %v95_v8 = vpack.c.bf16 %v32_v5, %v31_v4  ;;  %v49_v12 = vld [vmem:[#allocation2 + $0x90] sm:$0xff]  ;;  %v96_v14 = vpack.c.bf16 %v34_v11, %v33_v10 }
   0x9   :  { %v103_v9 = vpack.c.bf16 %v48_v7, %v47_v6  ;;  %v50_v13 = vld [vmem:[#allocation2 + $0x98] sm:$0xff]  ;;  %v63_v16 = vld [vmem:[#allocation2 + $0x100] sm:$0xff]  ;;  %v64_v17 = vld [vmem:[#allocation2 + $0x108] sm:$0xff] }
   0xa   :  { %261 = vmatpush.bf16.msra.mxu0 %v951_v1  ;;  %956 = vmatpush.bf16.msra.mxu1 %v951_v1  ;;  %v104_v15 = vpack.c.bf16 %v50_v13, %v49_v12  ;;  %v111_v18 = vpack.c.bf16 %v64_v17, %v63_v16  ;;  %v35_v19 = vld [vmem:[#allocation2 + $0x20] sm:$0xff]  ;;  %v36_v20 = vld [vmem:[#allocation2 + $0x28] sm:$0xff]  ;;  %v65_v25 = vld [vmem:[#allocation2 + $0x110] sm:$0xff] }
   0xb   :  { %957 = vmatpush.bf16.msra.mxu2 %v951_v1  ;;  %958 = vmatpush.bf16.msra.mxu3 %v951_v1  ;;  %v51_v21 = vld [vmem:[#allocation2 + $0xa0] sm:$0xff]  ;;  %v52_v22 = vld [vmem:[#allocation2 + $0xa8] sm:$0xff]  ;;  %v97_v23 = vpack.c.bf16 %v36_v20, %v35_v19  ;;  %v66_v26 = vld [vmem:[#allocation2 + $0x118] sm:$0xff] }
   0xc   :  { %v105_v24 = vpack.c.bf16 %v52_v22, %v51_v21  ;;  %v112_v27 = vpack.c.bf16 %v66_v26, %v65_v25  ;;  %v37_v28 = vld [vmem:[#allocation2 + $0x30] sm:$0xff]  ;;  %v38_v29 = vld [vmem:[#allocation2 + $0x38] sm:$0xff]  ;;  %v67_v34 = vld [vmem:[#allocation2 + $0x120] sm:$0xff] }
   0xd   :  { %v53_v30 = vld [vmem:[#allocation2 + $0xb0] sm:$0xff]  ;;  %v54_v31 = vld [vmem:[#allocation2 + $0xb8] sm:$0xff]  ;;  %v98_v32 = vpack.c.bf16 %v38_v29, %v37_v28  ;;  %v68_v35 = vld [vmem:[#allocation2 + $0x128] sm:$0xff] }
   0xe   :  { %262 = vmatpush.bf16.msra.mxu0 %v950_v2  ;;  %959 = vmatpush.bf16.msra.mxu1 %v950_v2  ;;  %v106_v33 = vpack.c.bf16 %v54_v31, %v53_v30  ;;  %v79_v36 = vld [vmem:[#allocation2 + $0x180] sm:$0xff]  ;;  %v113_v37 = vpack.c.bf16 %v68_v35, %v67_v34  ;;  %v80_v38 = vld [vmem:[#allocation2 + $0x188] sm:$0xff]  ;;  %v69_v46 = vld [vmem:[#allocation2 + $0x130] sm:$0xff] }
   0xf   :  { %960 = vmatpush.bf16.msra.mxu2 %v950_v2  ;;  %961 = vmatpush.bf16.msra.mxu3 %v950_v2  ;;  %v119_v39 = vpack.c.bf16 %v80_v38, %v79_v36  ;;  %v39_v40 = vld [vmem:[#allocation2 + $0x40] sm:$0xff]  ;;  %v40_v41 = vld [vmem:[#allocation2 + $0x48] sm:$0xff]  ;;  %v70_v47 = vld [vmem:[#allocation2 + $0x138] sm:$0xff] }
  0x10   :  { %v55_v42 = vld [vmem:[#allocation2 + $0xc0] sm:$0xff]  ;;  %v56_v43 = vld [vmem:[#allocation2 + $0xc8] sm:$0xff]  ;;  %v99_v44 = vpack.c.bf16 %v40_v41, %v39_v40  ;;  %v81_v48 = vld [vmem:[#allocation2 + $0x190] sm:$0xff]  ;;  %v114_v49 = vpack.c.bf16 %v70_v47, %v69_v46 }
  0x11   :  { %v107_v45 = vpack.c.bf16 %v56_v43, %v55_v42  ;;  %v82_v50 = vld [vmem:[#allocation2 + $0x198] sm:$0xff]  ;;  %v41_v52 = vld [vmem:[#allocation2 + $0x50] sm:$0xff]  ;;  %v71_v58 = vld [vmem:[#allocation2 + $0x140] sm:$0xff] }
  0x12   :  { %263 = vmatpush.bf16.msra.mxu0 %v949_v3  ;;  %962 = vmatpush.bf16.msra.mxu1 %v949_v3  ;;  %v120_v51 = vpack.c.bf16 %v82_v50, %v81_v48  ;;  %v42_v53 = vld [vmem:[#allocation2 + $0x58] sm:$0xff]  ;;  %v57_v54 = vld [vmem:[#allocation2 + $0xd0] sm:$0xff]  ;;  %v72_v59 = vld [vmem:[#allocation2 + $0x148] sm:$0xff] }
  0x13   :  { %963 = vmatpush.bf16.msra.mxu2 %v949_v3  ;;  %964 = vmatpush.bf16.msra.mxu3 %v949_v3  ;;  %v58_v55 = vld [vmem:[#allocation2 + $0xd8] sm:$0xff]  ;;  %v100_v56 = vpack.c.bf16 %v42_v53, %v41_v52  ;;  %v83_v60 = vld [vmem:[#allocation2 + $0x1a0] sm:$0xff]  ;;  %v115_v61 = vpack.c.bf16 %v72_v59, %v71_v58  ;;  %v84_v62 = vld [vmem:[#allocation2 + $0x1a8] sm:$0xff] }
  0x14   :  { %v108_v57 = vpack.c.bf16 %v58_v55, %v57_v54  ;;  %v121_v63 = vpack.c.bf16 %v84_v62, %v83_v60  ;;  %v43_v0 = vld [vmem:[#allocation2 + $0x60] sm:$0xff]  ;;  %v44_v1 = vld [vmem:[#allocation2 + $0x68] sm:$0xff]  ;;  %v73_v6 = vld [vmem:[#allocation2 + $0x150] sm:$0xff] }
  0x15   :  { %917 = vmatmul.msk.bf16.vlgmr.msra.gmra.mxu0 %vm159_vm0, %v95_v8  ;;  %925 = vmatmul.msk.bf16.vlgmr.msra.gmra.mxu1 %vm159_vm0, %v103_v9  ;;  %v59_v2 = vld [vmem:[#allocation2 + $0xe0] sm:$0xff]  ;;  %v60_v3 = vld [vmem:[#allocation2 + $0xe8] sm:$0xff]  ;;  %v101_v4 = vpack.c.bf16 %v44_v1, %v43_v0  ;;  %v74_v7 = vld [vmem:[#allocation2 + $0x158] sm:$0xff] }
  0x16   :  { %933 = vmatmul.msk.bf16.vlgmr.msra.gmra.mxu2 %vm159_vm0, %v111_v18  ;;  %941 = vmatmul.msk.bf16.vlgmr.msra.gmra.mxu3 %vm159_vm0, %v119_v39  ;;  %v109_v5 = vpack.c.bf16 %v60_v3, %v59_v2  ;;  %v85_v8 = vld [vmem:[#allocation2 + $0x1b0] sm:$0xff]  ;;  %v116_v9 = vpack.c.bf16 %v74_v7, %v73_v6  ;;  %v86_v10 = vld [vmem:[#allocation2 + $0x1b8] sm:$0xff]  ;;  %v75_v18 = vld [vmem:[#allocation2 + $0x160] sm:$0xff] }
  0x17   :  { %v122_v11 = vpack.c.bf16 %v86_v10, %v85_v8  ;;  %v45_v12 = vld [vmem:[#allocation2 + $0x70] sm:$0xff]  ;;  %v46_v13 = vld [vmem:[#allocation2 + $0x78] sm:$0xff]  ;;  %v76_v19 = vld [vmem:[#allocation2 + $0x168] sm:$0xff] }
  0x18   :  { %v102_v16 = vpack.c.bf16 %v46_v13, %v45_v12  ;;  %v87_v20 = vld [vmem:[#allocation2 + $0x1c0] sm:$0xff]  ;;  %v117_v21 = vpack.c.bf16 %v76_v19, %v75_v18  ;;  %v88_v22 = vld [vmem:[#allocation2 + $0x1c8] sm:$0xff]  ;;  %v77_v28 = vld [vmem:[#allocation2 + $0x170] sm:$0xff] }
  0x19   :  { %v78_v29 = vld [vmem:[#allocation2 + $0x178] sm:$0xff]  ;;  %v89_v30 = vld [vmem:[#allocation2 + $0x1d0] sm:$0xff]  ;;  %v91_v53 = vld [vmem:[#allocation2 + $0x1e0] sm:$0xff] }
  0x1a   :  { %v118_v31 = vpack.c.bf16 %v78_v29, %v77_v28  ;;  %v92_v54 = vld [vmem:[#allocation2 + $0x1e8] sm:$0xff] }
  0x25   :  { %918 = vmatmul.msk.bf16.gmra.mxu0 %vm159_vm0, %v96_v14  ;;  %926 = vmatmul.msk.bf16.gmra.mxu1 %vm159_vm0, %v104_v15  ;;  %v61_v14 = vld [vmem:[#allocation2 + $0xf0] sm:$0xff]  ;;  %v62_v15 = vld [vmem:[#allocation2 + $0xf8] sm:$0xff] }
  0x26   :  { %934 = vmatmul.msk.bf16.gmra.mxu2 %vm159_vm0, %v112_v27  ;;  %942 = vmatmul.msk.bf16.gmra.mxu3 %vm159_vm0, %v120_v51  ;;  %v110_v17 = vpack.c.bf16 %v62_v15, %v61_v14  ;;  %v93_v14 = vld [vmem:[#allocation2 + $0x1f0] sm:$0xff]  ;;  %v94_v15 = vld [vmem:[#allocation2 + $0x1f8] sm:$0xff] }
  0x35   :  { %919 = vmatmul.msk.bf16.gmra.mxu0 %vm159_vm0, %v97_v23  ;;  %927 = vmatmul.msk.bf16.gmra.mxu1 %vm159_vm0, %v105_v24  ;;  %v123_v23 = vpack.c.bf16 %v88_v22, %v87_v20 }
  0x36   :  { %935 = vmatmul.msk.bf16.gmra.mxu2 %vm159_vm0, %v113_v37  ;;  %943 = vmatmul.msk.bf16.gmra.mxu3 %vm159_vm0, %v121_v63 }
  0x45   :  { %920 = vmatmul.msk.bf16.gmra.mxu0 %vm159_vm0, %v98_v32  ;;  %928 = vmatmul.msk.bf16.gmra.mxu1 %vm159_vm0, %v106_v33  ;;  %v90_v32 = vld [vmem:[#allocation2 + $0x1d8] sm:$0xff] }
  0x46   :  { %936 = vmatmul.msk.bf16.gmra.mxu2 %vm159_vm0, %v114_v49  ;;  %944 = vmatmul.msk.bf16.gmra.mxu3 %vm159_vm0, %v122_v11  ;;  %v124_v33 = vpack.c.bf16 %v90_v32, %v89_v30 }
  0x55   :  { %921 = vmatmul.msk.bf16.gmra.mxu0 %vm159_vm0, %v99_v44  ;;  %929 = vmatmul.msk.bf16.gmra.mxu1 %vm159_vm0, %v107_v45 }
  0x56   :  { %937 = vmatmul.msk.bf16.gmra.mxu2 %vm159_vm0, %v115_v61  ;;  %945 = vmatmul.msk.bf16.gmra.mxu3 %vm159_vm0, %v123_v23 }
  0x65   :  { %922 = vmatmul.msk.bf16.gmra.mxu0 %vm159_vm0, %v100_v56  ;;  %930 = vmatmul.msk.bf16.gmra.mxu1 %vm159_vm0, %v108_v57  ;;  %v125_v56 = vpack.c.bf16 %v92_v54, %v91_v53 }
  0x66   :  { %938 = vmatmul.msk.bf16.gmra.mxu2 %vm159_vm0, %v116_v9  ;;  %946 = vmatmul.msk.bf16.gmra.mxu3 %vm159_vm0, %v124_v33 }
  0x75   :  { %923 = vmatmul.msk.bf16.gmra.mxu0 %vm159_vm0, %v101_v4  ;;  %931 = vmatmul.msk.bf16.gmra.mxu1 %vm159_vm0, %v109_v5 }
  0x76   :  { %939 = vmatmul.msk.bf16.gmra.mxu2 %vm159_vm0, %v117_v21  ;;  %947 = vmatmul.msk.bf16.gmra.mxu3 %vm159_vm0, %v125_v56 }
  0x85   :  { %924 = vmatmul.msk.bf16.gmra.mxu0 %vm159_vm0, %v102_v16  ;;  %932 = vmatmul.msk.bf16.gmra.mxu1 %vm159_vm0, %v110_v17  ;;  %v126_v17 = vpack.c.bf16 %v94_v15, %v93_v14 }
  0x86   :  { %940 = vmatmul.msk.bf16.gmra.mxu2 %vm159_vm0, %v118_v31 }
  0x87   :  { %948 = vmatmul.msk.bf16.gmra.mxu3 %vm159_vm0, %v126_v17 }
  0x92   :  { %v265_v24 = vpop.f32.mrf.mxu0  ;;  %v1065_v25 = vpop.f32.mrf.mxu1 }
  0x93   :  { %v425_v26 = vpack.c.bf16 %v265_v24, %v265_v24  ;;  %v441_v27 = vpack.c.bf16 %v1065_v25, %v1065_v25  ;;  %v690_v34 = vmul.f32 %v265_v24, %v265_v24  ;;  %v555_v35 = vsel %vm554_vm2, %v265_v24, 0.0 }
  0x95   :  { %490 = vst.msk [vmem:[%s1845_s2] sm:$0xf] %vm489_vm1, %v425_v26  ;;  %v754_v43 = vsel %vm554_vm2, %v690_v34, 0.0 }
  0x96   :  { %506 = vst.msk [vmem:[%s1845_s2 + $0x40] sm:$0xf] %vm489_vm1, %v441_v27 }
  0x99   :  { %v1115_v0 = vpop.f32.mrf.mxu2 }
  0x9a   :  { %v267_v36 = vpop.f32.mrf.mxu0  ;;  %v1080_v37 = vpop.f32.mrf.mxu1  ;;  %v457_v4 = vpack.c.bf16 %v1115_v0, %v1115_v0 }
  0x9b   :  { %v426_v38 = vpack.c.bf16 %v267_v36, %v267_v36  ;;  %v556_v39 = vsel %vm554_vm2, %v267_v36, 0.0  ;;  %v691_v40 = vmul.f32 %v267_v36, %v267_v36  ;;  %v442_v41 = vpack.c.bf16 %v1080_v37, %v1080_v37 }
  0x9c   :  { %v557_v42 = vadd.f32 %v556_v39, %v555_v35  ;;  %522 = vst.msk [vmem:[%s1845_s2 + $0x80] sm:$0xf] %vm489_vm1, %v457_v4 }
  0x9d   :  { %491 = vst.msk [vmem:[%s1845_s2 + $0x4] sm:$0xf] %vm489_vm1, %v426_v38  ;;  %v755_v44 = vsel %vm554_vm2, %v691_v40, 0.0  ;;  %v1217_v38 = vpop.f32.mrf.mxu3 }
  0x9e   :  { %v756_v45 = vadd.f32 %v755_v44, %v754_v43  ;;  %507 = vst.msk [vmem:[%s1845_s2 + $0x44] sm:$0xf] %vm489_vm1, %v442_v41  ;;  %v473_v40 = vpack.c.bf16 %v1217_v38, %v1217_v38 }
  0xa0   :  { %538 = vst.msk [vmem:[%s1845_s2 + $0xc0] sm:$0xf] %vm489_vm1, %v473_v40 }
  0xa1   :  { %v1137_v11 = vpop.f32.mrf.mxu2 }
  0xa2   :  { %v270_v46 = vpop.f32.mrf.mxu0  ;;  %v1095_v47 = vpop.f32.mrf.mxu1  ;;  %v458_v13 = vpack.c.bf16 %v1137_v11, %v1137_v11 }
  0xa3   :  { %v427_v48 = vpack.c.bf16 %v270_v46, %v270_v46  ;;  %v558_v49 = vsel %vm554_vm2, %v270_v46, 0.0  ;;  %v692_v50 = vmul.f32 %v270_v46, %v270_v46  ;;  %v443_v51 = vpack.c.bf16 %v1095_v47, %v1095_v47 }
  0xa4   :  { %v559_v52 = vadd.f32 %v558_v49, %v557_v42  ;;  %523 = vst.msk [vmem:[%s1845_s2 + $0x84] sm:$0xf] %vm489_vm1, %v458_v13 }
  0xa5   :  { %492 = vst.msk [vmem:[%s1845_s2 + $0x8] sm:$0xf] %vm489_vm1, %v427_v48  ;;  %v757_v55 = vsel %vm554_vm2, %v692_v50, 0.0  ;;  %v1249_v46 = vpop.f32.mrf.mxu3 }
  0xa6   :  { %v758_v57 = vadd.f32 %v757_v55, %v756_v45  ;;  %508 = vst.msk [vmem:[%s1845_s2 + $0x48] sm:$0xf] %vm489_vm1, %v443_v51  ;;  %v474_v49 = vpack.c.bf16 %v1249_v46, %v1249_v46 }
  0xa8   :  { %539 = vst.msk [vmem:[%s1845_s2 + $0xc4] sm:$0xf] %vm489_vm1, %v474_v49 }
  0xa9   :  { %v1167_v23 = vpop.f32.mrf.mxu2 }
  0xaa   :  { %v272_v58 = vpop.f32.mrf.mxu0  ;;  %v1110_v59 = vpop.f32.mrf.mxu1  ;;  %v459_v24 = vpack.c.bf16 %v1167_v23, %v1167_v23 }
  0xab   :  { %v428_v60 = vpack.c.bf16 %v272_v58, %v272_v58  ;;  %v560_v61 = vsel %vm554_vm2, %v272_v58, 0.0  ;;  %v693_v62 = vmul.f32 %v272_v58, %v272_v58  ;;  %v444_v63 = vpack.c.bf16 %v1110_v59, %v1110_v59 }
  0xac   :  { %v561_v1 = vadd.f32 %v560_v61, %v559_v52  ;;  %524 = vst.msk [vmem:[%s1845_s2 + $0x88] sm:$0xf] %vm489_vm1, %v459_v24 }
  0xad   :  { %493 = vst.msk [vmem:[%s1845_s2 + $0xc] sm:$0xf] %vm489_vm1, %v428_v60  ;;  %v759_v2 = vsel %vm554_vm2, %v693_v62, 0.0  ;;  %v1281_v55 = vpop.f32.mrf.mxu3 }
  0xae   :  { %v760_v3 = vadd.f32 %v759_v2, %v758_v57  ;;  %509 = vst.msk [vmem:[%s1845_s2 + $0x4c] sm:$0xf] %vm489_vm1, %v444_v63  ;;  %v475_v57 = vpack.c.bf16 %v1281_v55, %v1281_v55 }
  0xb0   :  { %540 = vst.msk [vmem:[%s1845_s2 + $0xc8] sm:$0xf] %vm489_vm1, %v475_v57 }
  0xb1   :  { %v1191_v30 = vpop.f32.mrf.mxu2 }
  0xb2   :  { %v275_v5 = vpop.f32.mrf.mxu0  ;;  %v1132_v6 = vpop.f32.mrf.mxu1  ;;  %v460_v31 = vpack.c.bf16 %v1191_v30, %v1191_v30 }
  0xb3   :  { %v429_v7 = vpack.c.bf16 %v275_v5, %v275_v5  ;;  %v562_v8 = vsel %vm554_vm2, %v275_v5, 0.0  ;;  %v694_v9 = vmul.f32 %v275_v5, %v275_v5  ;;  %v445_v10 = vpack.c.bf16 %v1132_v6, %v1132_v6 }
  0xb4   :  { %v1139_v12 = vadd.f32 %v562_v8, %v561_v1  ;;  %525 = vst.msk [vmem:[%s1845_s2 + $0x8c] sm:$0xf] %vm489_vm1, %v460_v31 }
  0xb5   :  { %494 = vst.msk [vmem:[%s1845_s2 + $0x10] sm:$0xf] %vm489_vm1, %v429_v7  ;;  %v761_v16 = vsel %vm554_vm2, %v694_v9, 0.0  ;;  %v1313_v1 = vpop.f32.mrf.mxu3 }
  0xb6   :  { %v1148_v18 = vadd.f32 %v761_v16, %v760_v3  ;;  %510 = vst.msk [vmem:[%s1845_s2 + $0x50] sm:$0xf] %vm489_vm1, %v445_v10  ;;  %v476_v3 = vpack.c.bf16 %v1313_v1, %v1313_v1 }
  0xb8   :  { %541 = vst.msk [vmem:[%s1845_s2 + $0xcc] sm:$0xf] %vm489_vm1, %v476_v3 }
  0xb9   :  { %v1215_v36 = vpop.f32.mrf.mxu2 }
  0xba   :  { %v1159_v19 = vpop.f32.mrf.mxu0  ;;  %v1161_v20 = vpop.f32.mrf.mxu1  ;;  %v461_v39 = vpack.c.bf16 %v1215_v36, %v1215_v36 }
  0xbb   :  { %v430_v21 = vpack.c.bf16 %v1159_v19, %v1159_v19  ;;  %v446_v22 = vpack.c.bf16 %v1161_v20, %v1161_v20  ;;  %v695_v15 = vmul.f32 %v1159_v19, %v1159_v19 }
  0xbc   :  { %526 = vst.msk [vmem:[%s1845_s2 + $0x90] sm:$0xf] %vm489_vm1, %v461_v39 }
  0xbd   :  { %495 = vst.msk [vmem:[%s1845_s2 + $0x14] sm:$0xf] %vm489_vm1, %v430_v21  ;;  %v1341_v10 = vpop.f32.mrf.mxu3 }
  0xbe   :  { %511 = vst.msk [vmem:[%s1845_s2 + $0x54] sm:$0xf] %vm489_vm1, %v446_v22  ;;  %v477_v31 = vpack.c.bf16 %v1341_v10, %v1341_v10 }
  0xc0   :  { %542 = vst.msk [vmem:[%s1845_s2 + $0xd0] sm:$0xf] %vm489_vm1, %v477_v31 }
  0xc1   :  { %v1247_v45 = vpop.f32.mrf.mxu2 }
  0xc2   :  { %v1183_v26 = vpop.f32.mrf.mxu0  ;;  %v1185_v27 = vpop.f32.mrf.mxu1  ;;  %v462_v48 = vpack.c.bf16 %v1247_v45, %v1247_v45 }
  0xc3   :  { %v431_v28 = vpack.c.bf16 %v1183_v26, %v1183_v26  ;;  %v447_v29 = vpack.c.bf16 %v1185_v27, %v1185_v27 }
  0xc4   :  { %527 = vst.msk [vmem:[%s1845_s2 + $0x94] sm:$0xf] %vm489_vm1, %v462_v48 }
  0xc5   :  { %496 = vst.msk [vmem:[%s1845_s2 + $0x18] sm:$0xf] %vm489_vm1, %v431_v28  ;;  %v1359_v22 = vpop.f32.mrf.mxu3  ;;  %v564_v28 = vsel %vm554_vm2, %v1159_v19, 0.0  ;;  %v763_v19 = vsel %vm554_vm2, %v695_v15, 0.0 }
  0xc6   :  { %512 = vst.msk [vmem:[%s1845_s2 + $0x58] sm:$0xf] %vm489_vm1, %v447_v29  ;;  %v696_v29 = vmul.f32 %v1183_v26, %v1183_v26  ;;  %v565_v40 = vadd.f32 %v564_v28, %v1139_v12  ;;  %v764_v12 = vadd.f32 %v763_v19, %v1148_v18 }
  0xc9   :  { %v1279_v54 = vpop.f32.mrf.mxu2 }
  0xca   :  { %v1207_v32 = vpop.f32.mrf.mxu0  ;;  %v1209_v33 = vpop.f32.mrf.mxu1  ;;  %v463_v56 = vpack.c.bf16 %v1279_v54, %v1279_v54 }
  0xcb   :  { %v432_v34 = vpack.c.bf16 %v1207_v32, %v1207_v32  ;;  %v448_v35 = vpack.c.bf16 %v1209_v33, %v1209_v33 }
  0xcc   :  { %528 = vst.msk [vmem:[%s1845_s2 + $0x98] sm:$0xf] %vm489_vm1, %v463_v56 }
  0xcd   :  { %497 = vst.msk [vmem:[%s1845_s2 + $0x1c] sm:$0xf] %vm489_vm1, %v432_v34  ;;  %v697_v34 = vmul.f32 %v1207_v32, %v1207_v32 }
  0xce   :  { %513 = vst.msk [vmem:[%s1845_s2 + $0x5c] sm:$0xf] %vm489_vm1, %v448_v35  ;;  %v566_v35 = vsel %vm554_vm2, %v1183_v26, 0.0  ;;  %v765_v26 = vsel %vm554_vm2, %v696_v29, 0.0 }
  0xcf   :  { %v567_v49 = vadd.f32 %v566_v35, %v565_v40  ;;  %v766_v3 = vadd.f32 %v765_v26, %v764_v12 }
  0xd1   :  { %v1311_v63 = vpop.f32.mrf.mxu2 }
  0xd2   :  { %v1239_v41 = vpop.f32.mrf.mxu0  ;;  %v1241_v42 = vpop.f32.mrf.mxu1  ;;  %v464_v2 = vpack.c.bf16 %v1311_v63, %v1311_v63 }
  0xd3   :  { %v433_v43 = vpack.c.bf16 %v1239_v41, %v1239_v41  ;;  %v449_v44 = vpack.c.bf16 %v1241_v42, %v1241_v42  ;;  %v698_v48 = vmul.f32 %v1239_v41, %v1239_v41 }
  0xd4   :  { %529 = vst.msk [vmem:[%s1845_s2 + $0x9c] sm:$0xf] %vm489_vm1, %v464_v2  ;;  %v1420_v2 = vpop.f32.mrf.mxu3 }
  0xd5   :  { %498 = vst.msk [vmem:[%s1845_s2 + $0x20] sm:$0xf] %vm489_vm1, %v433_v43  ;;  %v478_v43 = vpack.c.bf16 %v1359_v22, %v1359_v22 }
  0xd6   :  { %514 = vst.msk [vmem:[%s1845_s2 + $0x60] sm:$0xf] %vm489_vm1, %v449_v44  ;;  %v568_v44 = vsel %vm554_vm2, %v1207_v32, 0.0  ;;  %v570_v32 = vsel %vm554_vm2, %v1239_v41, 0.0 }
  0xd7   :  { %543 = vst.msk [vmem:[%s1845_s2 + $0xd4] sm:$0xf] %vm489_vm1, %v478_v43 }
  0xd9   :  { %v1339_v9 = vpop.f32.mrf.mxu2 }
  0xda   :  { %v1271_v50 = vpop.f32.mrf.mxu0  ;;  %v1273_v51 = vpop.f32.mrf.mxu1  ;;  %v465_v24 = vpack.c.bf16 %v1339_v9, %v1339_v9 }
  0xdb   :  { %v434_v52 = vpack.c.bf16 %v1271_v50, %v1271_v50  ;;  %v450_v53 = vpack.c.bf16 %v1273_v51, %v1273_v51  ;;  %v699_v57 = vmul.f32 %v1271_v50, %v1271_v50  ;;  %v572_v15 = vsel %vm554_vm2, %v1271_v50, 0.0 }
  0xdc   :  { %530 = vst.msk [vmem:[%s1845_s2 + $0xa0] sm:$0xf] %vm489_vm1, %v465_v24 }
  0xdd   :  { %499 = vst.msk [vmem:[%s1845_s2 + $0x24] sm:$0xf] %vm489_vm1, %v434_v52  ;;  %v767_v52 = vsel %vm554_vm2, %v697_v34, 0.0  ;;  %v771_v28 = vsel %vm554_vm2, %v699_v57, 0.0 }
  0xde   :  { %515 = vst.msk [vmem:[%s1845_s2 + $0x64] sm:$0xf] %vm489_vm1, %v450_v53 }
  0xe1   :  { %v1357_v21 = vpop.f32.mrf.mxu2 }
  0xe2   :  { %v1303_v58 = vpop.f32.mrf.mxu0  ;;  %v1305_v60 = vpop.f32.mrf.mxu1  ;;  %v466_v39 = vpack.c.bf16 %v1357_v21, %v1357_v21 }
  0xe3   :  { %v435_v61 = vpack.c.bf16 %v1303_v58, %v1303_v58  ;;  %v451_v62 = vpack.c.bf16 %v1305_v60, %v1305_v60  ;;  %v700_v41 = vmul.f32 %v1303_v58, %v1303_v58  ;;  %v574_v50 = vsel %vm554_vm2, %v1303_v58, 0.0 }
  0xe4   :  { %531 = vst.msk [vmem:[%s1845_s2 + $0xa4] sm:$0xf] %vm489_vm1, %v466_v39 }
  0xe5   :  { %500 = vst.msk [vmem:[%s1845_s2 + $0x28] sm:$0xf] %vm489_vm1, %v435_v61  ;;  %v773_v34 = vsel %vm554_vm2, %v700_v41, 0.0 }
  0xe6   :  { %516 = vst.msk [vmem:[%s1845_s2 + $0x68] sm:$0xf] %vm489_vm1, %v451_v62 }
  0xe9   :  { %v1418_v62 = vpop.f32.mrf.mxu2 }
  0xea   :  { %v292_v4 = vpop.f32.mrf.mxu0  ;;  %v1335_v5 = vpop.f32.mrf.mxu1 }
  0xeb   :  { %v436_v7 = vpack.c.bf16 %v292_v4, %v292_v4  ;;  %v452_v8 = vpack.c.bf16 %v1335_v5, %v1335_v5  ;;  %v701_v24 = vmul.f32 %v292_v4, %v292_v4  ;;  %v576_v19 = vsel %vm554_vm2, %v292_v4, 0.0 }
  0xed   :  { %501 = vst.msk [vmem:[%s1845_s2 + $0x2c] sm:$0xf] %vm489_vm1, %v436_v7  ;;  %v569_v7 = vadd.f32 %v568_v44, %v567_v49  ;;  %v775_v43 = vsel %vm554_vm2, %v701_v24, 0.0 }
  0xee   :  { %517 = vst.msk [vmem:[%s1845_s2 + $0x6c] sm:$0xf] %vm489_vm1, %v452_v8  ;;  %v769_v8 = vsel %vm554_vm2, %v698_v48, 0.0 }
  0xf2   :  { %v295_v13 = vpop.f32.mrf.mxu0  ;;  %v1351_v14 = vpop.f32.mrf.mxu1 }
  0xf3   :  { %v437_v16 = vpack.c.bf16 %v295_v13, %v295_v13  ;;  %v453_v17 = vpack.c.bf16 %v1351_v14, %v1351_v14  ;;  %v702_v35 = vmul.f32 %v295_v13, %v295_v13  ;;  %v578_v48 = vsel %vm554_vm2, %v295_v13, 0.0 }
  0xf5   :  { %502 = vst.msk [vmem:[%s1845_s2 + $0x30] sm:$0xf] %vm489_vm1, %v437_v16  ;;  %v768_v16 = vadd.f32 %v767_v52, %v766_v3  ;;  %v1446_v52 = vpop.f32.mrf.mxu2 }
  0xf6   :  { %518 = vst.msk [vmem:[%s1845_s2 + $0x70] sm:$0xf] %vm489_vm1, %v453_v17  ;;  %v571_v17 = vadd.f32 %v570_v32, %v569_v7  ;;  %v1448_v32 = vpop.f32.mrf.mxu3  ;;  %v479_v7 = vpack.c.bf16 %v1420_v2, %v1420_v2 }
  0xf7   :  { %v770_v29 = vadd.f32 %v769_v8, %v768_v16  ;;  %v468_v16 = vpack.c.bf16 %v1446_v52, %v1446_v52 }
  0xf8   :  { %v573_v31 = vadd.f32 %v572_v15, %v571_v17  ;;  %544 = vst.msk [vmem:[%s1845_s2 + $0xd8] sm:$0xf] %vm489_vm1, %v479_v7  ;;  %v588_v7 = vsel %vm554_vm2, %v1080_v37, 0.0 }
  0xf9   :  { %v772_v39 = vadd.f32 %v771_v28, %v770_v29  ;;  %v480_v28 = vpack.c.bf16 %v1448_v32, %v1448_v32  ;;  %533 = vst.msk [vmem:[%s1845_s2 + $0xac] sm:$0xf] %vm489_vm1, %v468_v16  ;;  %v706_v29 = vmul.f32 %v1065_v25, %v1065_v25  ;;  %v709_v16 = vmul.f32 %v1110_v59, %v1110_v59 }
  0xfa   :  { %v297_v53 = vpop.f32.mrf.mxu0  ;;  %v1406_v56 = vpop.f32.mrf.mxu1  ;;  %v575_v40 = vadd.f32 %v574_v50, %v573_v31 }
  0xfb   :  { %v438_v61 = vpack.c.bf16 %v297_v53, %v297_v53  ;;  %v454_v18 = vpack.c.bf16 %v1406_v56, %v1406_v56  ;;  %v703_v12 = vmul.f32 %v297_v53, %v297_v53  ;;  %v774_v4 = vadd.f32 %v773_v34, %v772_v39  ;;  %545 = vst.msk [vmem:[%s1845_s2 + $0xdc] sm:$0xf] %vm489_vm1, %v480_v28 }
  0xfc   :  { %v577_v57 = vadd.f32 %v576_v19, %v575_v40  ;;  %v580_v3 = vsel %vm554_vm2, %v297_v53, 0.0 }
  0xfd   :  { %503 = vst.msk [vmem:[%s1845_s2 + $0x34] sm:$0xf] %vm489_vm1, %v438_v61  ;;  %v467_v61 = vpack.c.bf16 %v1418_v62, %v1418_v62  ;;  %v776_v8 = vadd.f32 %v775_v43, %v774_v4  ;;  %v779_v41 = vsel %vm554_vm2, %v703_v12, 0.0  ;;  %v586_v4 = vsel %vm554_vm2, %v1065_v25, 0.0 }
  0xfe   :  { %519 = vst.msk [vmem:[%s1845_s2 + $0x74] sm:$0xf] %vm489_vm1, %v454_v18  ;;  %v777_v18 = vsel %vm554_vm2, %v702_v35, 0.0  ;;  %v579_v15 = vadd.f32 %v578_v48, %v577_v57  ;;  %v1494_v48 = vpop.f32.mrf.mxu2  ;;  %v1496_v12 = vpop.f32.mrf.mxu3  ;;  %v707_v57 = vmul.f32 %v1080_v37, %v1080_v37  ;;  %v785_v25 = vsel %vm554_vm2, %v706_v29, 0.0 }
  0xff   :  { %532 = vst.msk [vmem:[%s1845_s2 + $0xa8] sm:$0xf] %vm489_vm1, %v467_v61  ;;  %v778_v17 = vadd.f32 %v777_v18, %v776_v8  ;;  %v708_v18 = vmul.f32 %v1095_v47, %v1095_v47  ;;  %v710_v37 = vmul.f32 %v1132_v6, %v1132_v6  ;;  %v469_v29 = vpack.c.bf16 %v1494_v48, %v1494_v48 }
 0x100   :  { %v581_v24 = vadd.f32 %v580_v3, %v579_v15 }
 0x101   :  { %v780_v31 = vadd.f32 %v779_v41, %v778_v17  ;;  %v787_v41 = vsel %vm554_vm2, %v707_v57, 0.0  ;;  %v789_v17 = vsel %vm554_vm2, %v708_v18, 0.0  ;;  %534 = vst.msk [vmem:[%s1845_s2 + $0xb0] sm:$0xf] %vm489_vm1, %v469_v29  ;;  %v596_v57 = vsel %vm554_vm2, %v1161_v20, 0.0 }
 0x102   :  { %v300_v26 = vpop.f32.mrf.mxu0  ;;  %v1441_v44 = vpop.f32.mrf.mxu1 }
 0x103   :  { %v439_v49 = vpack.c.bf16 %v300_v26, %v300_v26  ;;  %v455_v58 = vpack.c.bf16 %v1441_v44, %v1441_v44  ;;  %v704_v13 = vmul.f32 %v300_v26, %v300_v26  ;;  %v582_v53 = vsel %vm554_vm2, %v300_v26, 0.0 }
 0x104   :  { %v583_v34 = vadd.f32 %v582_v53, %v581_v24  ;;  %v590_v53 = vsel %vm554_vm2, %v1095_v47, 0.0 }
 0x105   :  { %504 = vst.msk [vmem:[%s1845_s2 + $0x38] sm:$0xf] %vm489_vm1, %v439_v49  ;;  %v781_v50 = vsel %vm554_vm2, %v704_v13, 0.0 }
 0x106   :  { %520 = vst.msk [vmem:[%s1845_s2 + $0x78] sm:$0xf] %vm489_vm1, %v455_v58  ;;  %v782_v49 = vadd.f32 %v781_v50, %v780_v31  ;;  %v592_v50 = vsel %vm554_vm2, %v1110_v59, 0.0  ;;  %v481_v31 = vpack.c.bf16 %v1496_v12, %v1496_v12  ;;  %v1530_v47 = vpop.f32.mrf.mxu2  ;;  %v594_v59 = vsel %vm554_vm2, %v1132_v6, 0.0 }
 0x108   :  { %546 = vst.msk [vmem:[%s1845_s2 + $0xe0] sm:$0xf] %vm489_vm1, %v481_v31 }
 0x10a   :  { %v302_v19 = vpop.f32.mrf.mxu0  ;;  %v1485_v35 = vpop.f32.mrf.mxu1 }
 0x10b   :  { %v440_v39 = vpack.c.bf16 %v302_v19, %v302_v19  ;;  %v584_v40 = vsel %vm554_vm2, %v302_v19, 0.0  ;;  %v705_v43 = vmul.f32 %v302_v19, %v302_v19  ;;  %v456_v26 = vpack.c.bf16 %v1485_v35, %v1485_v35 }
 0x10c   :  { %v585_v58 = vadd.f32 %v584_v40, %v583_v34  ;;  %v1532_v34 = vpop.f32.mrf.mxu3  ;;  %v791_v40 = vsel %vm554_vm2, %v709_v16, 0.0 }
 0x10d   :  { %505 = vst.msk [vmem:[%s1845_s2 + $0x3c] sm:$0xf] %vm489_vm1, %v440_v39  ;;  %v783_v61 = vsel %vm554_vm2, %v705_v43, 0.0  ;;  %v711_v43 = vmul.f32 %v1161_v20, %v1161_v20  ;;  %v482_v6 = vpack.c.bf16 %v1532_v34, %v1532_v34  ;;  %v598_v20 = vsel %vm554_vm2, %v1185_v27, 0.0 }
 0x10e   :  { %v587_v3 = vadd.f32 %v586_v4, %v585_v58  ;;  %v784_v13 = vadd.f32 %v783_v61, %v782_v49  ;;  %521 = vst.msk [vmem:[%s1845_s2 + $0x7c] sm:$0xf] %vm489_vm1, %v456_v26  ;;  %v470_v26 = vpack.c.bf16 %v1530_v47, %v1530_v47  ;;  %v793_v4 = vsel %vm554_vm2, %v710_v37, 0.0  ;;  %v1574_v16 = vpop.f32.mrf.mxu2 }
 0x10f   :  { %v712_v61 = vmul.f32 %v1185_v27, %v1185_v27  ;;  %547 = vst.msk [vmem:[%s1845_s2 + $0xe4] sm:$0xf] %vm489_vm1, %v482_v6  ;;  %v715_v37 = vmul.f32 %v1273_v51, %v1273_v51 }
 0x110   :  { %v589_v8 = vadd.f32 %v588_v7, %v587_v3  ;;  %v786_v15 = vadd.f32 %v785_v25, %v784_v13  ;;  %535 = vst.msk [vmem:[%s1845_s2 + $0xb4] sm:$0xf] %vm489_vm1, %v470_v26  ;;  %v795_v13 = vsel %vm554_vm2, %v711_v43, 0.0  ;;  %v713_v25 = vmul.f32 %v1209_v33, %v1209_v33 }
 0x111   :  { %v803_v43 = vsel %vm554_vm2, %v715_v37, 0.0  ;;  %v717_v26 = vmul.f32 %v1335_v5, %v1335_v5  ;;  %v721_v37 = vmul.f32 %v1485_v35, %v1485_v35 }
 0x112   :  { %v591_v24 = vadd.f32 %v590_v53, %v589_v8  ;;  %v788_v28 = vadd.f32 %v787_v41, %v786_v15  ;;  %v797_v15 = vsel %vm554_vm2, %v712_v61, 0.0  ;;  %v600_v41 = vsel %vm554_vm2, %v1209_v33, 0.0 }
 0x113   :  { %v714_v53 = vmul.f32 %v1241_v42, %v1241_v42  ;;  %v799_v27 = vsel %vm554_vm2, %v713_v25, 0.0  ;;  %v716_v33 = vmul.f32 %v1305_v60, %v1305_v60  ;;  %v719_v25 = vmul.f32 %v1406_v56, %v1406_v56 }
 0x114   :  { %v593_v19 = vadd.f32 %v592_v50, %v591_v24  ;;  %v790_v39 = vadd.f32 %v789_v17, %v788_v28  ;;  %v1576_v17 = vpop.f32.mrf.mxu3  ;;  %v602_v50 = vsel %vm554_vm2, %v1241_v42, 0.0  ;;  %v606_v42 = vsel %vm554_vm2, %v1305_v60, 0.0 }
 0x115   :  { %v483_v61 = vpack.c.bf16 %v1576_v17, %v1576_v17 }
 0x116   :  { %v595_v49 = vadd.f32 %v594_v59, %v593_v19  ;;  %v792_v58 = vadd.f32 %v791_v40, %v790_v39  ;;  %v801_v19 = vsel %vm554_vm2, %v714_v53, 0.0  ;;  %v604_v39 = vsel %vm554_vm2, %v1273_v51, 0.0  ;;  %v1602_v60 = vpop.f32.mrf.mxu2 }
 0x117   :  { %v718_v51 = vmul.f32 %v1351_v14, %v1351_v14  ;;  %548 = vst.msk [vmem:[%s1845_s2 + $0xe8] sm:$0xf] %vm489_vm1, %v483_v61  ;;  %v612_v53 = vsel %vm554_vm2, %v1406_v56, 0.0  ;;  %v614_v56 = vsel %vm554_vm2, %v1441_v44, 0.0 }
 0x118   :  { %v597_v18 = vadd.f32 %v596_v57, %v595_v49  ;;  %v794_v3 = vadd.f32 %v793_v4, %v792_v58  ;;  %v805_v49 = vsel %vm554_vm2, %v716_v33, 0.0  ;;  %v608_v4 = vsel %vm554_vm2, %v1335_v5, 0.0 }
 0x119   :  { %v471_v57 = vpack.c.bf16 %v1574_v16, %v1574_v16  ;;  %v610_v5 = vsel %vm554_vm2, %v1351_v14, 0.0 }
 0x11a   :  { %v796_v7 = vadd.f32 %v795_v13, %v794_v3  ;;  %v599_v8 = vadd.f32 %v598_v20, %v597_v18  ;;  %v807_v20 = vsel %vm554_vm2, %v717_v26, 0.0  ;;  %v815_v26 = vsel %vm554_vm2, %v721_v37, 0.0 }
 0x11b   :  { %536 = vst.msk [vmem:[%s1845_s2 + $0xb8] sm:$0xf] %vm489_vm1, %v471_v57 }
 0x11c   :  { %v601_v24 = vadd.f32 %v600_v41, %v599_v8  ;;  %v798_v28 = vadd.f32 %v797_v15, %v796_v7  ;;  %v1604_v18 = vpop.f32.mrf.mxu3  ;;  %v472_v7 = vpack.c.bf16 %v1602_v60, %v1602_v60  ;;  %v809_v41 = vsel %vm554_vm2, %v718_v51, 0.0 }
 0x11d   :  { %v484_v14 = vpack.c.bf16 %v1604_v18, %v1604_v18 }
 0x11e   :  { %v603_v29 = vadd.f32 %v602_v50, %v601_v24  ;;  %v800_v31 = vadd.f32 %v799_v27, %v798_v28  ;;  %v720_v24 = vmul.f32 %v1441_v44, %v1441_v44  ;;  %537 = vst.msk [vmem:[%s1845_s2 + $0xbc] sm:$0xf] %vm489_vm1, %v472_v7  ;;  %v811_v50 = vsel %vm554_vm2, %v719_v25, 0.0 }
 0x11f   :  { %549 = vst.msk [vmem:[%s1845_s2 + $0xec] sm:$0xf] %vm489_vm1, %v484_v14  ;;  %v618_v44 = vsel %vm554_vm2, %v1115_v0, 0.0  ;;  %v726_v25 = vmul.f32 %v1215_v36, %v1215_v36 }
 0x120   :  { %v605_v40 = vadd.f32 %v604_v39, %v603_v29  ;;  %v802_v59 = vadd.f32 %v801_v19, %v800_v31  ;;  %v722_v31 = vmul.f32 %v1115_v0, %v1115_v0  ;;  %v813_v19 = vsel %vm554_vm2, %v720_v24, 0.0 }
 0x121   :  { %v616_v39 = vsel %vm554_vm2, %v1485_v35, 0.0  ;;  %v724_v35 = vmul.f32 %v1167_v23, %v1167_v23  ;;  %v622_v0 = vsel %vm554_vm2, %v1167_v23, 0.0 }
 0x122   :  { %v607_v58 = vadd.f32 %v606_v42, %v605_v40  ;;  %v804_v6 = vadd.f32 %v803_v43, %v802_v59  ;;  %v723_v42 = vmul.f32 %v1137_v11, %v1137_v11 }
 0x124   :  { %v609_v3 = vadd.f32 %v608_v4, %v607_v58  ;;  %v806_v13 = vadd.f32 %v805_v49, %v804_v6  ;;  %v1646_v40 = vpop.f32.mrf.mxu3  ;;  %v817_v6 = vsel %vm554_vm2, %v722_v31, 0.0  ;;  %v620_v4 = vsel %vm554_vm2, %v1137_v11, 0.0 }
 0x125   :  { %v819_v61 = vsel %vm554_vm2, %v723_v42, 0.0  ;;  %v624_v11 = vsel %vm554_vm2, %v1191_v30, 0.0  ;;  %v485_v7 = vpack.c.bf16 %v1646_v40, %v1646_v40  ;;  %v729_v31 = vmul.f32 %v1311_v63, %v1311_v63 }
 0x126   :  { %v611_v8 = vadd.f32 %v610_v5, %v609_v3  ;;  %v808_v15 = vadd.f32 %v807_v20, %v806_v13  ;;  %v725_v3 = vmul.f32 %v1191_v30, %v1191_v30  ;;  %v821_v5 = vsel %vm554_vm2, %v724_v35, 0.0 }
 0x127   :  { %v727_v30 = vmul.f32 %v1247_v45, %v1247_v45  ;;  %550 = vst.msk [vmem:[%s1845_s2 + $0xf0] sm:$0xf] %vm489_vm1, %v485_v7 }
 0x128   :  { %v810_v28 = vadd.f32 %v809_v41, %v808_v15  ;;  %v613_v27 = vadd.f32 %v612_v53, %v611_v8  ;;  %v823_v41 = vsel %vm554_vm2, %v725_v3, 0.0  ;;  %v626_v53 = vsel %vm554_vm2, %v1215_v36, 0.0 }
 0x129   :  { %v628_v36 = vsel %vm554_vm2, %v1247_v45, 0.0  ;;  %v632_v45 = vsel %vm554_vm2, %v1311_v63, 0.0  ;;  %v636_v63 = vsel %vm554_vm2, %v1357_v21, 0.0  ;;  %v733_v3 = vmul.f32 %v1446_v52, %v1446_v52 }
 0x12a   :  { %v812_v33 = vadd.f32 %v811_v50, %v810_v28  ;;  %v615_v29 = vadd.f32 %v614_v56, %v613_v27  ;;  %v825_v27 = vsel %vm554_vm2, %v726_v25, 0.0  ;;  %v728_v50 = vmul.f32 %v1279_v54, %v1279_v54 }
 0x12c   :  { %v814_v59 = vadd.f32 %v813_v19, %v812_v33  ;;  %v617_v43 = vadd.f32 %v616_v39, %v615_v29  ;;  %v1670_v8 = vpop.f32.mrf.mxu3  ;;  %v827_v33 = vsel %vm554_vm2, %v727_v30, 0.0  ;;  %v630_v29 = vsel %vm554_vm2, %v1279_v54, 0.0 }
 0x12d   :  { %v486_v14 = vpack.c.bf16 %v1670_v8, %v1670_v8  ;;  %v634_v54 = vsel %vm554_vm2, %v1339_v9, 0.0 }
 0x12e   :  { %v619_v49 = vadd.f32 %v618_v44, %v617_v43  ;;  %v816_v58 = vadd.f32 %v815_v26, %v814_v59  ;;  %v829_v59 = vsel %vm554_vm2, %v728_v50, 0.0  ;;  %v730_v43 = vmul.f32 %v1339_v9, %v1339_v9 }
 0x12f   :  { %551 = vst.msk [vmem:[%s1845_s2 + $0xf4] sm:$0xf] %vm489_vm1, %v486_v14  ;;  %v638_v9 = vsel %vm554_vm2, %v1418_v62, 0.0  ;;  %v839_v14 = vsel %vm554_vm2, %v733_v3, 0.0 }
 0x130   :  { %v621_v51 = vadd.f32 %v620_v4, %v619_v49  ;;  %v818_v57 = vadd.f32 %v817_v6, %v816_v58  ;;  %v831_v49 = vsel %vm554_vm2, %v729_v31, 0.0  ;;  %v731_v58 = vmul.f32 %v1357_v21, %v1357_v21 }
 0x131   :  { %v833_v35 = vsel %vm554_vm2, %v730_v43, 0.0  ;;  %v640_v21 = vsel %vm554_vm2, %v1446_v52, 0.0  ;;  %v735_v52 = vmul.f32 %v1530_v47, %v1530_v47  ;;  %v738_v31 = vmul.f32 %v1217_v38, %v1217_v38 }
 0x132   :  { %v623_v13 = vadd.f32 %v622_v0, %v621_v51  ;;  %v820_v20 = vadd.f32 %v819_v61, %v818_v57  ;;  %v732_v51 = vmul.f32 %v1418_v62, %v1418_v62  ;;  %v835_v0 = vsel %vm554_vm2, %v731_v58, 0.0 }
 0x133   :  { %v843_v50 = vsel %vm554_vm2, %v735_v52, 0.0 }
 0x134   :  { %v625_v15 = vadd.f32 %v624_v11, %v623_v13  ;;  %v822_v23 = vadd.f32 %v821_v5, %v820_v20  ;;  %v1702_v44 = vpop.f32.mrf.mxu3  ;;  %v837_v5 = vsel %vm554_vm2, %v732_v51, 0.0  ;;  %v734_v11 = vmul.f32 %v1494_v48, %v1494_v48 }
 0x135   :  { %v487_v25 = vpack.c.bf16 %v1702_v44, %v1702_v44 }
 0x136   :  { %v627_v24 = vadd.f32 %v626_v53, %v625_v15  ;;  %v824_v28 = vadd.f32 %v823_v41, %v822_v23  ;;  %v642_v41 = vsel %vm554_vm2, %v1494_v48, 0.0  ;;  %v644_v48 = vsel %vm554_vm2, %v1530_v47, 0.0 }
 0x137   :  { %552 = vst.msk [vmem:[%s1845_s2 + $0xf8] sm:$0xf] %vm489_vm1, %v487_v25 }
 0x138   :  { %v629_v56 = vadd.f32 %v628_v36, %v627_v24  ;;  %v826_v37 = vadd.f32 %v825_v27, %v824_v28  ;;  %v841_v24 = vsel %vm554_vm2, %v734_v11, 0.0  ;;  %v736_v28 = vmul.f32 %v1574_v16, %v1574_v16 }
 0x139   :  { %v744_v11 = vmul.f32 %v1420_v2, %v1420_v2 }
 0x13a   :  { %v828_v19 = vadd.f32 %v827_v33, %v826_v37  ;;  %v631_v39 = vadd.f32 %v630_v29, %v629_v56  ;;  %v646_v56 = vsel %vm554_vm2, %v1574_v16, 0.0  ;;  %v737_v37 = vmul.f32 %v1602_v60, %v1602_v60 }
 0x13b   :  { %v845_v47 = vsel %vm554_vm2, %v736_v28, 0.0  ;;  %v739_v16 = vmul.f32 %v1249_v46, %v1249_v46  ;;  %v861_v52 = vsel %vm554_vm2, %v744_v11, 0.0  ;;  %v747_v28 = vmul.f32 %v1532_v34, %v1532_v34 }
 0x13c   :  { %v633_v42 = vadd.f32 %v632_v45, %v631_v39  ;;  %v830_v26 = vadd.f32 %v829_v59, %v828_v19  ;;  %v1726_v7 = vpop.f32.mrf.mxu3  ;;  %v648_v19 = vsel %vm554_vm2, %v1602_v60, 0.0  ;;  %v650_v45 = vsel %vm554_vm2, %v1217_v38, 0.0 }
 0x13d   :  { %v488_v23 = vpack.c.bf16 %v1726_v7, %v1726_v7  ;;  %v847_v43 = vsel %vm554_vm2, %v737_v37, 0.0  ;;  %v740_v60 = vmul.f32 %v1281_v55, %v1281_v55  ;;  %v654_v38 = vsel %vm554_vm2, %v1281_v55, 0.0 }
 0x13e   :  { %v635_v6 = vadd.f32 %v634_v54, %v633_v42  ;;  %v832_v4 = vadd.f32 %v831_v49, %v830_v26  ;;  %v849_v49 = vsel %vm554_vm2, %v738_v31, 0.0  ;;  %v652_v54 = vsel %vm554_vm2, %v1249_v46, 0.0 }
 0x13f   :  { %553 = vst.msk [vmem:[%s1845_s2 + $0xfc] sm:$0xf] %vm489_vm1, %v488_v23  ;;  %v656_v46 = vsel %vm554_vm2, %v1313_v1, 0.0  ;;  %v658_v55 = vsel %vm554_vm2, %v1341_v10, 0.0  ;;  %v745_v23 = vmul.f32 %v1448_v32, %v1448_v32  ;;  %v749_v31 = vmul.f32 %v1604_v18, %v1604_v18 }
 0x140   :  { %v637_v57 = vadd.f32 %v636_v63, %v635_v6  ;;  %v834_v61 = vadd.f32 %v833_v35, %v832_v4  ;;  %v851_v4 = vsel %vm554_vm2, %v739_v16, 0.0  ;;  %v741_v35 = vmul.f32 %v1313_v1, %v1313_v1 }
 0x141   :  { %v660_v1 = vsel %vm554_vm2, %v1359_v22, 0.0 }
 0x142   :  { %v639_v13 = vadd.f32 %v638_v9, %v637_v57  ;;  %v836_v20 = vadd.f32 %v835_v0, %v834_v61  ;;  %v853_v57 = vsel %vm554_vm2, %v740_v60, 0.0  ;;  %v742_v61 = vmul.f32 %v1341_v10, %v1341_v10 }
 0x143   :  { %v855_v3 = vsel %vm554_vm2, %v741_v35, 0.0  ;;  %v662_v10 = vsel %vm554_vm2, %v1420_v2, 0.0  ;;  %v666_v2 = vsel %vm554_vm2, %v1496_v12, 0.0  ;;  %v752_v60 = vmul.f32 %v1702_v44, %v1702_v44 }
 0x144   :  { %v641_v15 = vadd.f32 %v640_v21, %v639_v13  ;;  %v838_v62 = vadd.f32 %v837_v5, %v836_v20  ;;  %v743_v13 = vmul.f32 %v1359_v22, %v1359_v22  ;;  %v857_v21 = vsel %vm554_vm2, %v742_v61, 0.0 }
 0x145   :  { %v664_v22 = vsel %vm554_vm2, %v1448_v32, 0.0  ;;  %v668_v32 = vsel %vm554_vm2, %v1532_v34, 0.0  ;;  %v672_v34 = vsel %vm554_vm2, %v1604_v18, 0.0  ;;  %v676_v18 = vsel %vm554_vm2, %v1670_v8, 0.0 }
 0x146   :  { %v840_v53 = vadd.f32 %v839_v14, %v838_v62  ;;  %v643_v30 = vadd.f32 %v642_v41, %v641_v15  ;;  %v859_v62 = vsel %vm554_vm2, %v743_v13, 0.0 }
 0x148   :  { %v842_v27 = vadd.f32 %v841_v24, %v840_v53  ;;  %v645_v36 = vadd.f32 %v644_v48, %v643_v30  ;;  %v746_v53 = vmul.f32 %v1496_v12, %v1496_v12  ;;  %v863_v48 = vsel %vm554_vm2, %v745_v23, 0.0 }
 0x149   :  { %v670_v12 = vsel %vm554_vm2, %v1576_v17, 0.0 }
 0x14a   :  { %v844_v33 = vadd.f32 %v843_v50, %v842_v27  ;;  %v647_v29 = vadd.f32 %v646_v56, %v645_v36  ;;  %v865_v50 = vsel %vm554_vm2, %v746_v53, 0.0  ;;  %v748_v56 = vmul.f32 %v1576_v17, %v1576_v17 }
 0x14b   :  { %v674_v17 = vsel %vm554_vm2, %v1646_v40, 0.0 }
 0x14c   :  { %v846_v39 = vadd.f32 %v845_v47, %v844_v33  ;;  %v649_v59 = vadd.f32 %v648_v19, %v647_v29  ;;  %v867_v29 = vsel %vm554_vm2, %v747_v28, 0.0 }
 0x14e   :  { %v651_v42 = vadd.f32 %v650_v45, %v649_v59  ;;  %v848_v26 = vadd.f32 %v847_v43, %v846_v39  ;;  %v869_v39 = vsel %vm554_vm2, %v748_v56, 0.0  ;;  %v750_v59 = vmul.f32 %v1646_v40, %v1646_v40 }
 0x14f   :  { %v871_v43 = vsel %vm554_vm2, %v749_v31, 0.0  ;;  %v678_v40 = vsel %vm554_vm2, %v1702_v44, 0.0 }
 0x150   :  { %v653_v58 = vadd.f32 %v652_v54, %v651_v42  ;;  %v850_v6 = vadd.f32 %v849_v49, %v848_v26  ;;  %v751_v42 = vmul.f32 %v1670_v8, %v1670_v8  ;;  %v873_v54 = vsel %vm554_vm2, %v750_v59, 0.0 }
 0x151   :  { %v680_v8 = vsel %vm554_vm2, %v1726_v7, 0.0 }
 0x152   :  { %v655_v63 = vadd.f32 %v654_v38, %v653_v58  ;;  %v852_v51 = vadd.f32 %v851_v4, %v850_v6  ;;  %v875_v4 = vsel %vm554_vm2, %v751_v42, 0.0  ;;  %v753_v38 = vmul.f32 %v1726_v7, %v1726_v7 }
 0x154   :  { %v657_v0 = vadd.f32 %v656_v46, %v655_v63  ;;  %v854_v9 = vadd.f32 %v853_v57, %v852_v51  ;;  %v877_v51 = vsel %vm554_vm2, %v752_v60, 0.0  ;;  %v879_v61 = vsel %vm554_vm2, %v753_v38, 0.0 }
 0x156   :  { %v659_v20 = vadd.f32 %v658_v55, %v657_v0  ;;  %v856_v5 = vadd.f32 %v855_v3, %v854_v9 }
 0x158   :  { %v661_v25 = vadd.f32 %v660_v1, %v659_v20  ;;  %v858_v15 = vadd.f32 %v857_v21, %v856_v5 }
 0x15a   :  { %v860_v14 = vadd.f32 %v859_v62, %v858_v15  ;;  %v663_v41 = vadd.f32 %v662_v10, %v661_v25 }
 0x15c   :  { %v665_v30 = vadd.f32 %v664_v22, %v663_v41  ;;  %v862_v24 = vadd.f32 %v861_v52, %v860_v14 }
 0x15e   :  { %v667_v27 = vadd.f32 %v666_v2, %v665_v30  ;;  %v864_v36 = vadd.f32 %v863_v48, %v862_v24 }
 0x160   :  { %v669_v37 = vadd.f32 %v668_v32, %v667_v27  ;;  %v866_v33 = vadd.f32 %v865_v50, %v864_v36 }
 0x162   :  { %v671_v47 = vadd.f32 %v670_v12, %v669_v37  ;;  %v868_v19 = vadd.f32 %v867_v29, %v866_v33 }
 0x164   :  { %v673_v45 = vadd.f32 %v672_v34, %v671_v47  ;;  %v870_v16 = vadd.f32 %v869_v39, %v868_v19 }
 0x166   :  { %v872_v26 = vadd.f32 %v871_v43, %v870_v16  ;;  %v675_v49 = vadd.f32 %v674_v17, %v673_v45 }
 0x168   :  { %v874_v58 = vadd.f32 %v873_v54, %v872_v26  ;;  %v677_v6 = vadd.f32 %v676_v18, %v675_v49 }
 0x16a   :  { %v876_v35 = vadd.f32 %v875_v4, %v874_v58  ;;  %v679_v63 = vadd.f32 %v678_v40, %v677_v6 }
 0x16c   :  { %v878_v57 = vadd.f32 %v877_v51, %v876_v35  ;;  %v681_v46 = vadd.f32 %v680_v8, %v679_v63 }
 0x16e   :  { %v682_v0 = vrot.slane %v681_v46, 4  ;;  %v880_v9 = vadd.f32 %v879_v61, %v878_v57 }
 0x170   :  { %v683_v3 = vadd.f32 %v682_v0, %v681_v46  ;;  %v881_v55 = vrot.slane %v880_v9, 4 }
 0x172   :  { %v684_v13 = vrot.slane %v683_v3, 2  ;;  %v882_v44 = vadd.f32 %v881_v55, %v880_v9 }
 0x174   :  { %v685_v20 = vadd.f32 %v684_v13, %v683_v3  ;;  %v883_v5 = vrot.slane %v882_v44, 2 }
 0x176   :  { %v686_v21 = vrot.slane %v685_v20, 1  ;;  %v884_v1 = vadd.f32 %v883_v5, %v882_v44 }
 0x178   :  { %v687_v11 = vadd.f32 %v686_v21, %v685_v20  ;;  %v885_v25 = vrot.slane %v884_v1, 1 }
 0x17a   :  { %689 = vst.msk [vmem:[%s1846_s3] sm:$0x1] %vm688_vm3, %v687_v11  ;;  %v886_v7 = vadd.f32 %v885_v25, %v884_v1 }
 0x17c   :  { %887 = vst.msk [vmem:[%s1847_s4] sm:$0x1] %vm688_vm3, %v886_v7 }
 0x17d   :  { %900 = vsyncpa [#allocation3], 1 }

// kernel: bottleneck_forward.11
= control target key start
LH: loop header
LB: loop body
LE: loop exit
PB: predicated region body
PF: predicated region fallthrough
CT: control target
= control target key end

     0   :  { %vm71_vm0 = vcmask 523264   ;;  %s465_s1 = inlined_call_operand.vmem [shape: bf16[64,128], index: 1, kind: input, shape index: {}]   ;;  %s466_s0 = inlined_call_operand.vmem [shape: f32[128,64], index: 0, kind: input, shape index: {}]   ;;  %s467_s2 = inlined_call_operand.vmem [shape: bf16[128,128], index: 2, kind: output, shape index: {0}]   ;;  %s468_s3 = inlined_call_operand.vmem [shape: f32[1,1,128], index: 3, kind: output, shape index: {1}]   ;;  %s469_s4 = inlined_call_operand.vmem [shape: f32[1,1,128], index: 4, kind: output, shape index: {2}]  }
   0x1   :  { %v276_v0 = vld [vmem:[%s465_s1 + $0x18] sm:$0xff]  ;;  %v275_v1 = vld [vmem:[%s465_s1 + $0x10] sm:$0xff]  ;;  %v274_v2 = vld [vmem:[%s465_s1 + $0x8] sm:$0xff] }
   0x2   :  { %100 = vmatpush.bf16.msra.mxu0 %v276_v0  ;;  %324 = vmatpush.bf16.msra.mxu1 %v276_v0  ;;  %v273_v3 = vld [vmem:[%s465_s1] sm:$0xff]  ;;  %v16_v5 = vld [vmem:[%s466_s0 + $0x8] sm:$0xff]  ;;  %v17_v16 = vld [vmem:[%s466_s0 + $0x10] sm:$0xff] }
   0x3   :  { %325 = vmatpush.bf16.msra.mxu2 %v276_v0  ;;  %326 = vmatpush.bf16.msra.mxu3 %v276_v0  ;;  %v15_v4 = vld [vmem:[%s466_s0] sm:$0xff]  ;;  %v20_v7 = vld [vmem:[%s466_s0 + $0x28] sm:$0xff]  ;;  %v18_v17 = vld [vmem:[%s466_s0 + $0x18] sm:$0xff] }
   0x4   :  { %v19_v6 = vld [vmem:[%s466_s0 + $0x20] sm:$0xff]  ;;  %v24_v9 = vld [vmem:[%s466_s0 + $0x48] sm:$0xff]  ;;  %v31_v12 = vpack.c.bf16 %v16_v5, %v15_v4  ;;  %v21_v18 = vld [vmem:[%s466_s0 + $0x30] sm:$0xff]  ;;  %v32_v24 = vpack.c.bf16 %v18_v17, %v17_v16 }
   0x5   :  { %v23_v8 = vld [vmem:[%s466_s0 + $0x40] sm:$0xff]  ;;  %v28_v11 = vld [vmem:[%s466_s0 + $0x68] sm:$0xff]  ;;  %v33_v13 = vpack.c.bf16 %v20_v7, %v19_v6  ;;  %v22_v19 = vld [vmem:[%s466_s0 + $0x38] sm:$0xff] }
   0x6   :  { %101 = vmatpush.bf16.msra.mxu0 %v275_v1  ;;  %327 = vmatpush.bf16.msra.mxu1 %v275_v1  ;;  %v27_v10 = vld [vmem:[%s466_s0 + $0x60] sm:$0xff]  ;;  %v35_v14 = vpack.c.bf16 %v24_v9, %v23_v8  ;;  %v25_v20 = vld [vmem:[%s466_s0 + $0x50] sm:$0xff]  ;;  %v26_v21 = vld [vmem:[%s466_s0 + $0x58] sm:$0xff]  ;;  %v34_v25 = vpack.c.bf16 %v22_v19, %v21_v18 }
   0x7   :  { %328 = vmatpush.bf16.msra.mxu2 %v275_v1  ;;  %329 = vmatpush.bf16.msra.mxu3 %v275_v1  ;;  %v37_v15 = vpack.c.bf16 %v28_v11, %v27_v10  ;;  %v29_v22 = vld [vmem:[%s466_s0 + $0x70] sm:$0xff]  ;;  %v30_v23 = vld [vmem:[%s466_s0 + $0x78] sm:$0xff]  ;;  %v36_v26 = vpack.c.bf16 %v26_v21, %v25_v20 }
   0x8   :  { %v38_v27 = vpack.c.bf16 %v30_v23, %v29_v22 }
   0xa   :  { %102 = vmatpush.bf16.msra.mxu0 %v274_v2  ;;  %330 = vmatpush.bf16.msra.mxu1 %v274_v2 }
   0xb   :  { %331 = vmatpush.bf16.msra.mxu2 %v274_v2  ;;  %332 = vmatpush.bf16.msra.mxu3 %v274_v2 }
   0xe   :  { %103 = vmatpush.bf16.msra.mxu0 %v273_v3  ;;  %333 = vmatpush.bf16.msra.mxu1 %v273_v3 }
   0xf   :  { %334 = vmatpush.bf16.msra.mxu2 %v273_v3  ;;  %335 = vmatpush.bf16.msra.mxu3 %v273_v3 }
  0x11   :  { %265 = vmatmul.msk.bf16.vlgmr.msra.gmra.mxu0 %vm71_vm0, %v31_v12  ;;  %267 = vmatmul.msk.bf16.vlgmr.msra.gmra.mxu1 %vm71_vm0, %v33_v13 }
  0x12   :  { %269 = vmatmul.msk.bf16.vlgmr.msra.gmra.mxu2 %vm71_vm0, %v35_v14  ;;  %271 = vmatmul.msk.bf16.vlgmr.msra.gmra.mxu3 %vm71_vm0, %v37_v15 }
  0x21   :  { %266 = vmatmul.msk.bf16.gmra.mxu0 %vm71_vm0, %v32_v24  ;;  %268 = vmatmul.msk.bf16.gmra.mxu1 %vm71_vm0, %v34_v25 }
  0x22   :  { %270 = vmatmul.msk.bf16.gmra.mxu2 %vm71_vm0, %v36_v26  ;;  %272 = vmatmul.msk.bf16.gmra.mxu3 %vm71_vm0, %v38_v27 }
  0x8e   :  { %v105_v28 = vpop.f32.mrf.mxu0  ;;  %v115_v29 = vpop.f32.mrf.mxu1 }
  0x8f   :  { %v199_v43 = vmul.f32 %v105_v28, %v105_v28  ;;  %v203_v57 = vmul.f32 %v115_v29, %v115_v29 }
  0x95   :  { %v125_v30 = vpop.f32.mrf.mxu2  ;;  %v429_v31 = vpop.f32.mrf.mxu3 }
  0x96   :  { %v107_v32 = vpop.f32.mrf.mxu0  ;;  %v117_v33 = vpop.f32.mrf.mxu1  ;;  %v207_v9 = vmul.f32 %v125_v30, %v125_v30  ;;  %v211_v21 = vmul.f32 %v429_v31, %v429_v31 }
  0x97   :  { %v280_v34 = vpack.c.bf16 %v107_v32, %v105_v28  ;;  %v290_v35 = vpack.c.bf16 %v117_v33, %v115_v29  ;;  %v200_v42 = vmul.f32 %v107_v32, %v107_v32  ;;  %v177_v45 = vadd.f32 %v107_v32, %v105_v28 }
  0x98   :  { %v204_v60 = vmul.f32 %v117_v33, %v117_v33 }
  0x99   :  { %281 = vst [vmem:[%s467_s2] sm:$0xff] %v280_v34   ;;  %v215_v46 = vadd.f32 %v200_v42, %v199_v43 }
  0x9a   :  { %318 = vst [vmem:[%s467_s2 + $0x10] sm:$0xff] %v290_v35  }
  0x9d   :  { %v127_v36 = vpop.f32.mrf.mxu2  ;;  %v137_v37 = vpop.f32.mrf.mxu3 }
  0x9e   :  { %v110_v38 = vpop.f32.mrf.mxu0  ;;  %v120_v39 = vpop.f32.mrf.mxu1  ;;  %v300_v40 = vpack.c.bf16 %v127_v36, %v125_v30  ;;  %v310_v41 = vpack.c.bf16 %v137_v37, %v429_v31  ;;  %v208_v12 = vmul.f32 %v127_v36, %v127_v36  ;;  %v212_v24 = vmul.f32 %v137_v37, %v137_v37 }
  0x9f   :  { %v201_v44 = vmul.f32 %v110_v38, %v110_v38  ;;  %v178_v47 = vadd.f32 %v177_v45, %v110_v38  ;;  %v205_v63 = vmul.f32 %v120_v39, %v120_v39 }
  0xa0   :  { %320 = vst [vmem:[%s467_s2 + $0x20] sm:$0xff] %v300_v40  }
  0xa1   :  { %322 = vst [vmem:[%s467_s2 + $0x30] sm:$0xff] %v310_v41   ;;  %v216_v50 = vadd.f32 %v215_v46, %v201_v44 }
  0xa5   :  { %v130_v48 = vpop.f32.mrf.mxu2  ;;  %v140_v49 = vpop.f32.mrf.mxu3 }
  0xa6   :  { %v112_v51 = vpop.f32.mrf.mxu0  ;;  %v122_v52 = vpop.f32.mrf.mxu1  ;;  %v209_v16 = vmul.f32 %v130_v48, %v130_v48  ;;  %v213_v28 = vmul.f32 %v140_v49, %v140_v49 }
  0xa7   :  { %v285_v53 = vpack.c.bf16 %v112_v51, %v110_v38  ;;  %v179_v54 = vadd.f32 %v178_v47, %v112_v51  ;;  %v202_v55 = vmul.f32 %v112_v51, %v112_v51  ;;  %v295_v56 = vpack.c.bf16 %v122_v52, %v120_v39 }
  0xa8   :  { %v206_v7 = vmul.f32 %v122_v52, %v122_v52 }
  0xa9   :  { %317 = vst [vmem:[%s467_s2 + $0x8] sm:$0xff] %v285_v53   ;;  %v180_v58 = vadd.f32 %v179_v54, %v115_v29  ;;  %v217_v59 = vadd.f32 %v216_v50, %v202_v55 }
  0xaa   :  { %319 = vst [vmem:[%s467_s2 + $0x18] sm:$0xff] %v295_v56  }
  0xab   :  { %v218_v61 = vadd.f32 %v217_v59, %v203_v57  ;;  %v181_v62 = vadd.f32 %v180_v58, %v117_v33 }
  0xad   :  { %v182_v0 = vadd.f32 %v181_v62, %v120_v39  ;;  %v219_v1 = vadd.f32 %v218_v61, %v204_v60  ;;  %v132_v2 = vpop.f32.mrf.mxu2  ;;  %v142_v3 = vpop.f32.mrf.mxu3 }
  0xae   :  { %v305_v4 = vpack.c.bf16 %v132_v2, %v130_v48  ;;  %v315_v5 = vpack.c.bf16 %v142_v3, %v140_v49  ;;  %v210_v20 = vmul.f32 %v132_v2, %v132_v2  ;;  %v214_v33 = vmul.f32 %v142_v3, %v142_v3 }
  0xaf   :  { %v183_v6 = vadd.f32 %v182_v0, %v122_v52  ;;  %v220_v8 = vadd.f32 %v219_v1, %v205_v63 }
  0xb0   :  { %321 = vst [vmem:[%s467_s2 + $0x28] sm:$0xff] %v305_v4  }
  0xb1   :  { %v184_v10 = vadd.f32 %v183_v6, %v125_v30  ;;  %v221_v11 = vadd.f32 %v220_v8, %v206_v7  ;;  %323 = vst [vmem:[%s467_s2 + $0x38] sm:$0xff] %v315_v5  }
  0xb3   :  { %v222_v13 = vadd.f32 %v221_v11, %v207_v9  ;;  %v185_v14 = vadd.f32 %v184_v10, %v127_v36 }
  0xb5   :  { %v186_v15 = vadd.f32 %v185_v14, %v130_v48  ;;  %v223_v17 = vadd.f32 %v222_v13, %v208_v12 }
  0xb7   :  { %v224_v18 = vadd.f32 %v223_v17, %v209_v16  ;;  %v187_v19 = vadd.f32 %v186_v15, %v132_v2 }
  0xb9   :  { %v188_v22 = vadd.f32 %v187_v19, %v429_v31  ;;  %v225_v23 = vadd.f32 %v224_v18, %v210_v20 }
  0xbb   :  { %v226_v25 = vadd.f32 %v225_v23, %v211_v21  ;;  %v189_v26 = vadd.f32 %v188_v22, %v137_v37 }
  0xbd   :  { %v190_v27 = vadd.f32 %v189_v26, %v140_v49  ;;  %v227_v29 = vadd.f32 %v226_v25, %v212_v24 }
  0xbf   :  { %v228_v30 = vadd.f32 %v227_v29, %v213_v28  ;;  %v191_v32 = vadd.f32 %v190_v27, %v142_v3 }
  0xc1   :  { %v192_v34 = vrot.slane %v191_v32, 4  ;;  %v229_v35 = vadd.f32 %v228_v30, %v214_v33 }
  0xc3   :  { %v193_v36 = vadd.f32 %v192_v34, %v191_v32  ;;  %v230_v38 = vrot.slane %v229_v35, 4 }
  0xc5   :  { %v194_v39 = vrot.slane %v193_v36, 2  ;;  %v231_v40 = vadd.f32 %v230_v38, %v229_v35 }
  0xc7   :  { %v195_v41 = vadd.f32 %v194_v39, %v193_v36  ;;  %v232_v42 = vrot.slane %v231_v40, 2 }
  0xc9   :  { %v196_v43 = vrot.slane %v195_v41, 1  ;;  %v233_v31 = vadd.f32 %v232_v42, %v231_v40 }
  0xcb   :  { %v197_v44 = vadd.f32 %v196_v43, %v195_v41  ;;  %v234_v45 = vrot.slane %v233_v31, 1 }
  0xcd   :  { %198 = vst [vmem:[%s468_s3] sm:$0x1] %v197_v44  ;;  %v235_v37 = vadd.f32 %v234_v45, %v233_v31 }
  0xcf   :  { %236 = vst [vmem:[%s469_s4] sm:$0x1] %v235_v37 }

// kernel: bottleneck_forward.10
= control target key start
LH: loop header
LB: loop body
LE: loop exit
PB: predicated region body
PF: predicated region fallthrough
CT: control target
= control target key end

     0   :  { %vm133_vm0 = vcmask 261120   ;;  %s568_s3 = inlined_call_operand.vmem [shape: bf16[32,128], index: 3, kind: input, shape index: {}]   ;;  %s569_s0 = inlined_call_operand.vmem [shape: bf16[128,32], index: 0, kind: input, shape index: {}]   ;;  %s570_s1 = inlined_call_operand.vmem [shape: f32[1,32], index: 1, kind: input, shape index: {}]   ;;  %s571_s2 = inlined_call_operand.vmem [shape: f32[1,32], index: 2, kind: input, shape index: {}]   ;;  %s572_s4 = inlined_call_operand.vmem [shape: bf16[128,128], index: 4, kind: output, shape index: {0}]   ;;  %s573_s5 = inlined_call_operand.vmem [shape: f32[1,1,128], index: 5, kind: output, shape index: {1}]   ;;  %s574_s6 = inlined_call_operand.vmem [shape: f32[1,1,128], index: 6, kind: output, shape index: {2}]  }
   0x1   :  { %v328_v0 = vld [vmem:[%s568_s3 + $0x8] sm:$0xff]  ;;  %v327_v1 = vld [vmem:[%s568_s3] sm:$0xff]  ;;  %v402_v7 = vld [vmem:[%s569_s0 + $0x10] sm:$0xff]  }
   0x2   :  { %v330_v2 = vld [vmem:[%s569_s0] sm:$0xff]   ;;  %164 = vmatpush.bf16.msra.mxu0 %v328_v0  ;;  %415 = vmatpush.bf16.msra.mxu1 %v328_v0  ;;  %v339_v11 = vunpack.c.l.bf16 %v402_v7  ;;  %v340_v12 = vunpack.c.h.bf16 %v402_v7  ;;  %v406_v13 = vld [vmem:[%s569_s0 + $0x30] sm:$0xff]   ;;  %v401_v14 = vld [vmem:[%s569_s0 + $0x8] sm:$0xff]  }
   0x3   :  { %v331_v3 = vunpack.c.l.bf16 %v330_v2  ;;  %v332_v4 = vunpack.c.h.bf16 %v330_v2  ;;  %v470_v5 = vld [vmem:[%s570_s1] ss:$0 sm:$0xff]  ;;  %416 = vmatpush.bf16.msra.mxu2 %v328_v0  ;;  %417 = vmatpush.bf16.msra.mxu3 %v328_v0  ;;  %v355_v17 = vunpack.c.l.bf16 %v406_v13  ;;  %v356_v18 = vunpack.c.h.bf16 %v406_v13  ;;  %v403_v35 = vld [vmem:[%s569_s0 + $0x18] sm:$0xff]   ;;  %v405_v40 = vld [vmem:[%s569_s0 + $0x28] sm:$0xff]  }
   0x4   :  { %v475_v6 = vld [vmem:[%s571_s2] ss:$0 sm:$0xff]  ;;  %v61_v21 = vmul.f32 %v470_v5, %v339_v11  ;;  %v62_v22 = vmul.f32 %v470_v5, %v340_v12  ;;  %v335_v26 = vunpack.c.l.bf16 %v401_v14  ;;  %v336_v39 = vunpack.c.h.bf16 %v401_v14  ;;  %v407_v49 = vld [vmem:[%s569_s0 + $0x38] sm:$0xff]  }
   0x5   :  { %v404_v8 = vld [vmem:[%s569_s0 + $0x20] sm:$0xff]   ;;  %v57_v9 = vmul.f32 %v470_v5, %v331_v3  ;;  %v58_v10 = vmul.f32 %v470_v5, %v332_v4  ;;  %v69_v25 = vmul.f32 %v470_v5, %v355_v17  ;;  %v70_v33 = vmul.f32 %v470_v5, %v356_v18 }
   0x6   :  { %v347_v15 = vunpack.c.l.bf16 %v404_v8  ;;  %v348_v16 = vunpack.c.h.bf16 %v404_v8  ;;  %165 = vmatpush.bf16.msra.mxu0 %v327_v1  ;;  %418 = vmatpush.bf16.msra.mxu1 %v327_v1  ;;  %v81_v29 = vadd.f32 %v475_v6, %v61_v21  ;;  %v82_v30 = vadd.f32 %v475_v6, %v62_v22 }
   0x7   :  { %v77_v19 = vadd.f32 %v475_v6, %v57_v9  ;;  %v78_v20 = vadd.f32 %v475_v6, %v58_v10  ;;  %419 = vmatpush.bf16.msra.mxu2 %v327_v1  ;;  %420 = vmatpush.bf16.msra.mxu3 %v327_v1  ;;  %v89_v34 = vadd.f32 %v475_v6, %v69_v25  ;;  %v343_v48 = vunpack.c.l.bf16 %v403_v35 }
   0x8   :  { %v65_v23 = vmul.f32 %v470_v5, %v347_v15  ;;  %v66_v24 = vmul.f32 %v470_v5, %v348_v16  ;;  %v97_v37 = vmax.f32 %v81_v29, 0.0  ;;  %v98_v38 = vmax.f32 %v82_v30, 0.0 }
   0x9   :  { %v93_v27 = vmax.f32 %v77_v19, 0.0  ;;  %v94_v28 = vmax.f32 %v78_v20, 0.0  ;;  %v90_v43 = vadd.f32 %v475_v6, %v70_v33  ;;  %v105_v44 = vmax.f32 %v89_v34, 0.0 }
   0xa   :  { %v85_v31 = vadd.f32 %v475_v6, %v65_v23  ;;  %v86_v32 = vadd.f32 %v475_v6, %v66_v24  ;;  %v111_v45 = vpack.c.bf16 %v98_v38, %v97_v37  ;;  %v59_v46 = vmul.f32 %v470_v5, %v335_v26 }
   0xb   :  { %v109_v36 = vpack.c.bf16 %v94_v28, %v93_v27  ;;  %v60_v47 = vmul.f32 %v470_v5, %v336_v39  ;;  %v106_v51 = vmax.f32 %v90_v43, 0.0  ;;  %v344_v52 = vunpack.c.h.bf16 %v403_v35 }
   0xc   :  { %v101_v41 = vmax.f32 %v85_v31, 0.0  ;;  %v102_v42 = vmax.f32 %v86_v32, 0.0  ;;  %v351_v53 = vunpack.c.l.bf16 %v405_v40  ;;  %321 = vmatmul.msk.bf16.vlgmr.msra.gmra.mxu1 %vm133_vm0, %v111_v45  ;;  %v63_v54 = vmul.f32 %v470_v5, %v343_v48 }
   0xd   :  { %319 = vmatmul.msk.bf16.vlgmr.msra.gmra.mxu0 %vm133_vm0, %v109_v36  ;;  %v352_v55 = vunpack.c.h.bf16 %v405_v40  ;;  %v115_v56 = vpack.c.bf16 %v106_v51, %v105_v44  ;;  %v64_v57 = vmul.f32 %v470_v5, %v344_v52  ;;  %v359_v59 = vunpack.c.l.bf16 %v407_v49 }
   0xe   :  { %v113_v50 = vpack.c.bf16 %v102_v42, %v101_v41  ;;  %v67_v58 = vmul.f32 %v470_v5, %v351_v53  ;;  %v79_v60 = vadd.f32 %v475_v6, %v59_v46  ;;  %v80_v61 = vadd.f32 %v475_v6, %v60_v47 }
   0xf   :  { %v68_v62 = vmul.f32 %v470_v5, %v352_v55  ;;  %325 = vmatmul.msk.bf16.vlgmr.msra.gmra.mxu3 %vm133_vm0, %v115_v56  ;;  %v360_v63 = vunpack.c.h.bf16 %v407_v49  ;;  %v71_v0 = vmul.f32 %v470_v5, %v359_v59  ;;  %v83_v1 = vadd.f32 %v475_v6, %v63_v54 }
  0x10   :  { %323 = vmatmul.msk.bf16.vlgmr.msra.gmra.mxu2 %vm133_vm0, %v113_v50  ;;  %v84_v2 = vadd.f32 %v475_v6, %v64_v57  ;;  %v87_v3 = vadd.f32 %v475_v6, %v67_v58  ;;  %v95_v8 = vmax.f32 %v79_v60, 0.0  ;;  %v96_v9 = vmax.f32 %v80_v61, 0.0 }
  0x11   :  { %v88_v4 = vadd.f32 %v475_v6, %v68_v62  ;;  %v72_v7 = vmul.f32 %v470_v5, %v360_v63  ;;  %v91_v10 = vadd.f32 %v475_v6, %v71_v0  ;;  %v99_v12 = vmax.f32 %v83_v1, 0.0 }
  0x12   :  { %v100_v13 = vmax.f32 %v84_v2, 0.0  ;;  %v103_v14 = vmax.f32 %v87_v3, 0.0  ;;  %v110_v16 = vpack.c.bf16 %v96_v9, %v95_v8 }
  0x13   :  { %v92_v11 = vadd.f32 %v475_v6, %v72_v7  ;;  %v104_v15 = vmax.f32 %v88_v4, 0.0  ;;  %v107_v17 = vmax.f32 %v91_v10, 0.0 }
  0x14   :  { %v112_v19 = vpack.c.bf16 %v100_v13, %v99_v12 }
  0x15   :  { %v108_v18 = vmax.f32 %v92_v11, 0.0  ;;  %v114_v20 = vpack.c.bf16 %v104_v15, %v103_v14 }
  0x17   :  { %v116_v21 = vpack.c.bf16 %v108_v18, %v107_v17 }
  0x1c   :  { %322 = vmatmul.msk.bf16.gmra.mxu1 %vm133_vm0, %v112_v19 }
  0x1d   :  { %320 = vmatmul.msk.bf16.gmra.mxu0 %vm133_vm0, %v110_v16 }
  0x1f   :  { %326 = vmatmul.msk.bf16.gmra.mxu3 %vm133_vm0, %v116_v21 }
  0x20   :  { %324 = vmatmul.msk.bf16.gmra.mxu2 %vm133_vm0, %v114_v20 }
  0x89   :  { %v177_v6 = vpop.f32.mrf.mxu1 }
  0x8a   :  { %v167_v5 = vpop.f32.mrf.mxu0  ;;  %v265_v47 = vmul.f32 %v177_v6, %v177_v6 }
  0x8b   :  { %v261_v35 = vmul.f32 %v167_v5, %v167_v5 }
  0x91   :  { %v179_v25 = vpop.f32.mrf.mxu1 }
  0x92   :  { %v169_v22 = vpop.f32.mrf.mxu0  ;;  %v374_v26 = vpack.c.bf16 %v179_v25, %v177_v6  ;;  %v197_v27 = vpop.f32.mrf.mxu3  ;;  %v266_v52 = vmul.f32 %v179_v25, %v179_v25 }
  0x93   :  { %v364_v23 = vpack.c.bf16 %v169_v22, %v167_v5  ;;  %v187_v24 = vpop.f32.mrf.mxu2  ;;  %v262_v32 = vmul.f32 %v169_v22, %v169_v22  ;;  %v239_v36 = vadd.f32 %v169_v22, %v167_v5  ;;  %v273_v15 = vmul.f32 %v197_v27, %v197_v27 }
  0x94   :  { %409 = vst [vmem:[%s572_s4 + $0x10] sm:$0xff] %v374_v26   ;;  %v269_v63 = vmul.f32 %v187_v24, %v187_v24 }
  0x95   :  { %365 = vst [vmem:[%s572_s4] sm:$0xff] %v364_v23   ;;  %v277_v38 = vadd.f32 %v262_v32, %v261_v35 }
  0x99   :  { %v182_v30 = vpop.f32.mrf.mxu1 }
  0x9a   :  { %v172_v28 = vpop.f32.mrf.mxu0  ;;  %v199_v33 = vpop.f32.mrf.mxu3  ;;  %v267_v55 = vmul.f32 %v182_v30, %v182_v30 }
  0x9b   :  { %v189_v29 = vpop.f32.mrf.mxu2  ;;  %v394_v34 = vpack.c.bf16 %v199_v33, %v197_v27  ;;  %v263_v37 = vmul.f32 %v172_v28, %v172_v28  ;;  %v240_v39 = vadd.f32 %v239_v36, %v172_v28  ;;  %v274_v18 = vmul.f32 %v199_v33, %v199_v33 }
  0x9c   :  { %v384_v31 = vpack.c.bf16 %v189_v29, %v187_v24  ;;  %v270_v4 = vmul.f32 %v189_v29, %v189_v29 }
  0x9d   :  { %413 = vst [vmem:[%s572_s4 + $0x30] sm:$0xff] %v394_v34   ;;  %v278_v41 = vadd.f32 %v277_v38, %v263_v37 }
  0x9e   :  { %411 = vst [vmem:[%s572_s4 + $0x20] sm:$0xff] %v384_v31  }
  0xa1   :  { %v184_v46 = vpop.f32.mrf.mxu1 }
  0xa2   :  { %v174_v40 = vpop.f32.mrf.mxu0  ;;  %v379_v50 = vpack.c.bf16 %v184_v46, %v182_v30  ;;  %v202_v51 = vpop.f32.mrf.mxu3  ;;  %v268_v59 = vmul.f32 %v184_v46, %v184_v46 }
  0xa3   :  { %v369_v42 = vpack.c.bf16 %v174_v40, %v172_v28  ;;  %v241_v43 = vadd.f32 %v240_v39, %v174_v40  ;;  %v264_v44 = vmul.f32 %v174_v40, %v174_v40  ;;  %v192_v45 = vpop.f32.mrf.mxu2  ;;  %v275_v5 = vmul.f32 %v202_v51, %v202_v51 }
  0xa4   :  { %410 = vst [vmem:[%s572_s4 + $0x18] sm:$0xff] %v379_v50   ;;  %v271_v10 = vmul.f32 %v192_v45, %v192_v45 }
  0xa5   :  { %408 = vst [vmem:[%s572_s4 + $0x8] sm:$0xff] %v369_v42   ;;  %v242_v48 = vadd.f32 %v241_v43, %v177_v6  ;;  %v279_v49 = vadd.f32 %v278_v41, %v264_v44 }
  0xa7   :  { %v280_v53 = vadd.f32 %v279_v49, %v265_v47  ;;  %v243_v54 = vadd.f32 %v242_v48, %v179_v25 }
  0xa9   :  { %v244_v56 = vadd.f32 %v243_v54, %v182_v30  ;;  %v281_v57 = vadd.f32 %v280_v53, %v266_v52 }
  0xaa   :  { %v204_v2 = vpop.f32.mrf.mxu3 }
  0xab   :  { %v245_v58 = vadd.f32 %v244_v56, %v184_v46  ;;  %v282_v60 = vadd.f32 %v281_v57, %v267_v55  ;;  %v194_v61 = vpop.f32.mrf.mxu2  ;;  %v399_v3 = vpack.c.bf16 %v204_v2, %v202_v51 }
  0xac   :  { %v389_v62 = vpack.c.bf16 %v194_v61, %v192_v45  ;;  %v272_v14 = vmul.f32 %v194_v61, %v194_v61 }
  0xad   :  { %v246_v0 = vadd.f32 %v245_v58, %v187_v24  ;;  %v283_v1 = vadd.f32 %v282_v60, %v268_v59  ;;  %414 = vst [vmem:[%s572_s4 + $0x38] sm:$0xff] %v399_v3   ;;  %v276_v24 = vmul.f32 %v204_v2, %v204_v2 }
  0xae   :  { %412 = vst [vmem:[%s572_s4 + $0x28] sm:$0xff] %v389_v62  }
  0xaf   :  { %v284_v7 = vadd.f32 %v283_v1, %v269_v63  ;;  %v247_v8 = vadd.f32 %v246_v0, %v189_v29 }
  0xb1   :  { %v248_v9 = vadd.f32 %v247_v8, %v192_v45  ;;  %v285_v11 = vadd.f32 %v284_v7, %v270_v4 }
  0xb3   :  { %v286_v12 = vadd.f32 %v285_v11, %v271_v10  ;;  %v249_v13 = vadd.f32 %v248_v9, %v194_v61 }
  0xb5   :  { %v250_v16 = vadd.f32 %v249_v13, %v197_v27  ;;  %v287_v17 = vadd.f32 %v286_v12, %v272_v14 }
  0xb7   :  { %v288_v19 = vadd.f32 %v287_v17, %v273_v15  ;;  %v251_v20 = vadd.f32 %v250_v16, %v199_v33 }
  0xb9   :  { %v252_v21 = vadd.f32 %v251_v20, %v202_v51  ;;  %v289_v6 = vadd.f32 %v288_v19, %v274_v18 }
  0xbb   :  { %v290_v22 = vadd.f32 %v289_v6, %v275_v5  ;;  %v253_v23 = vadd.f32 %v252_v21, %v204_v2 }
  0xbd   :  { %v254_v25 = vrot.slane %v253_v23, 4  ;;  %v291_v26 = vadd.f32 %v290_v22, %v276_v24 }
  0xbf   :  { %v255_v28 = vadd.f32 %v254_v25, %v253_v23  ;;  %v292_v29 = vrot.slane %v291_v26, 4 }
  0xc1   :  { %v256_v30 = vrot.slane %v255_v28, 2  ;;  %v293_v31 = vadd.f32 %v292_v29, %v291_v26 }
  0xc3   :  { %v257_v32 = vadd.f32 %v256_v30, %v255_v28  ;;  %v294_v34 = vrot.slane %v293_v31, 2 }
  0xc5   :  { %v258_v35 = vrot.slane %v257_v32, 1  ;;  %v295_v27 = vadd.f32 %v294_v34, %v293_v31 }
  0xc7   :  { %v259_v36 = vadd.f32 %v258_v35, %v257_v32  ;;  %v296_v37 = vrot.slane %v295_v27, 1 }
  0xc9   :  { %260 = vst [vmem:[%s573_s5] sm:$0x1] %v259_v36  ;;  %v297_v33 = vadd.f32 %v296_v37, %v295_v27 }
  0xcb   :  { %298 = vst [vmem:[%s574_s6] sm:$0x1] %v297_v33 }

// kernel: bottleneck_forward.9
= control target key start
LH: loop header
LB: loop body
LE: loop exit
PB: predicated region body
PF: predicated region fallthrough
CT: control target
= control target key end

     0   :  { %s2128_s24 = smov 0   ;;  %s2521_s0 = inlined_call_operand.vmem [shape: bf16[2,9,9,32], index: 0, kind: input, shape index: {}]   ;;  %s2522_s1 = inlined_call_operand.vmem [shape: bf16[2,9,9,32], index: 1, kind: input, shape index: {}]   ;;  %s2523_s2 = inlined_call_operand.vmem [shape: bf16[2,9,9,32], index: 2, kind: input, shape index: {}]   ;;  %s2524_s3 = inlined_call_operand.vmem [shape: bf16[2,9,9,32], index: 3, kind: input, shape index: {}]   ;;  %s2525_s4 = inlined_call_operand.vmem [shape: bf16[9,32,32], index: 4, kind: input, shape index: {}]   ;;  %s2526_s5 = inlined_call_operand.vmem [shape: bf16[2,64,32], index: 5, kind: output, shape index: {0}]   ;;  %s2527_s6 = inlined_call_operand.vmem [shape: f32[2,1,32], index: 6, kind: output, shape index: {1}]   ;;  %s2528_s7 = inlined_call_operand.vmem [shape: f32[2,1,32], index: 7, kind: output, shape index: {2}]  }
   0x1 LB: > { %s1741_s25 = sadd.s32 4294967295, %s2086_s24   ;;  %p1745_p0 = scmp.ge.s32.totalorder %s2086_s24, 1  ;;  %s2086_s24 = sphi %s2128_s24, %s18_s24  }
   0x2   : > { %p272_p1 = scmp.lt.s32.totalorder %s2086_s24, 3 }
   0x4   : > { %p273_p2 = pnand %p1745_p0, %p272_p1 }
   0x5   : > { %p325_p3 = scmp.lt.s32.totalorder (!%p273_p2), %s1741_s25, 1 }
   0x6   : > { %276 = sbr.rel (%p273_p2) target bundleno = 312 (0x138), region = 40 }
   0xb   : > { %v2034_v0 = vld [vmem:[%s2525_s4 + $0x18] sm:$0xff]  ;;  %v2033_v1 = vld [vmem:[%s2525_s4 + $0x10] sm:$0xff]  ;;  %s2532_s25 = smov (!%p325_p3, %s1741_s25), 1  ;;  %v2036_v2 = vld [vmem:[%s2525_s4 + $0x28] sm:$0xff]  ;;  %vm414_vm0 = vcmask 261120   ;;  %vm1536_vm4 = vcmask 257024  }
   0xc   : > { %2065 = vmatpush.bf16.msra.mxu1 %v2034_v0  ;;  %2066 = vmatpush.bf16.msra.mxu2 %v2034_v0  ;;  %s2145_s30 = smul.u32 72, %s2532_s25  ;;  %v2042_v3 = vld [vmem:[%s2525_s4 + $0x38] sm:$0xff]  ;;  %v2028_v4 = vld [vmem:[%s2525_s4 + $0x8] sm:$0xff]  ;;  %v2035_v6 = vld [vmem:[%s2525_s4 + $0x20] sm:$0xff]  ;;  %vm545_vm1 = vsmask.f32 3328  ;;  %s352_s17 = scalar_lea.vmem %s2527_s6, %s2532_s25 }
   0xd   : > { %2067 = vmatpush.bf16.msra.mxu3 %v2034_v0  ;;  %433 = vmatpush.bf16.msra.mxu0 %v2034_v0  ;;  %v2048_v5 = vld [vmem:[%s2525_s4 + $0x48] sm:$0xff]  ;;  %v2041_v10 = vld [vmem:[%s2525_s4 + $0x30] sm:$0xff]  ;;  %v2027_v11 = vld [vmem:[%s2525_s4] sm:$0xff]  ;;  %vm546_vm2 = vsmask.f32 7440  ;;  %vm1597_vm5 = vcmask 253952  }
   0xe   : > { %s2163_s18 = scalar_lea.vmem %s2522_s1, %s2145_s30  ;;  %s2172_s23 = scalar_lea.vmem %s2521_s0, %s2145_s30  ;;  %v2047_v16 = vld [vmem:[%s2525_s4 + $0x40] sm:$0xff]  ;;  %v2056_v17 = vld [vmem:[%s2525_s4 + $0x68] sm:$0xff]  ;;  %v2062_v22 = vld [vmem:[%s2525_s4 + $0x78] sm:$0xff] }
   0xf   : > { %v1762_v7 = vld [vmem:[%s2163_s18 + $0x10] sm:$0xf]  ;;  %v2030_v8 = vld [vmem:[%s2163_s18 + $0x14] sm:$0xf0]  ;;  %v1766_v9 = vld [vmem:[%s2163_s18 + $0x20] sm:$0xf]  ;;  %s2216_s21 = scalar_lea.vmem %s2523_s2, %s2145_s30  ;;  %s2228_s27 = scalar_lea.vmem %s2524_s3, %s2145_s30 }
  0x10   : > { %2068 = vmatpush.bf16.msra.mxu1 %v2033_v1  ;;  %2069 = vmatpush.bf16.msra.mxu2 %v2033_v1  ;;  %v1763_v12 = vor.u32 %v2030_v8, %v1762_v7  ;;  %v2031_v13 = vld [vmem:[%s2163_s18 + $0x24] sm:$0xf0]  ;;  %v1770_v14 = vld [vmem:[%s2163_s18 + $0x30] sm:$0xf]  ;;  %v2032_v15 = vld [vmem:[%s2163_s18 + $0x34] sm:$0xf0] }
  0x11   : > { %2070 = vmatpush.bf16.msra.mxu3 %v2033_v1  ;;  %434 = vmatpush.bf16.msra.mxu0 %v2033_v1  ;;  %v1767_v18 = vor.u32 %v2031_v13, %v1766_v9  ;;  %v1771_v19 = vor.u32 %v2032_v15, %v1770_v14  ;;  %v1758_v20 = vld [vmem:[%s2163_s18] sm:$0xf]  ;;  %v2029_v21 = vld [vmem:[%s2163_s18 + $0x4] sm:$0xf0]  ;;  %v530_v25 = vld [vmem:[%s2172_s23 + $0x4] sm:$0x1] }
  0x12   : > { %v1759_v23 = vor.u32 %v2029_v21, %v1758_v20  ;;  %v529_v24 = vld [vmem:[%s2172_s23] sm:$0xf]  ;;  %v2050_v26 = vld [vmem:[%s2525_s4 + $0x58] sm:$0xff]  ;;  %v531_v27 = vld [vmem:[%s2172_s23 + $0x8] sm:$0xf]  ;;  %v558_v31 = vshll.u32 %v530_v25, 16 }
  0x13   : > { %1781 = vmatmul.msk.bf16.vlgmr.msra.gmra.mxu1 %vm414_vm0, %v1763_v12  ;;  %1782 = vmatmul.msk.bf16.vlgmr.msra.gmra.mxu2 %vm414_vm0, %v1767_v18  ;;  %v532_v28 = vld [vmem:[%s2172_s23 + $0xc] sm:$0x1]  ;;  %v549_v29 = vshrl.u32 %v529_v24, 16  ;;  %v552_v30 = vshll.u32 %v529_v24, 16  ;;  %v563_v32 = vshrl.u32 %v531_v27, 16  ;;  %v566_v33 = vshll.u32 %v531_v27, 16  ;;  %vm2218_vm3 = vmor %vm545_vm1, %vm546_vm2 }
  0x14   : > { %707 = vmatpush.bf16.msrb.mxu2 %v2036_v2  ;;  %506 = vmatpush.bf16.msrb.mxu1 %v2028_v4  ;;  %v572_v34 = vshll.u32 %v532_v28, 16  ;;  %v2064_v35 = vld [vmem:[%s2525_s4 + $0x88] sm:$0xff]  ;;  %v560_v41 = vrot.slane %v558_v31, 5  ;;  %v533_v42 = vld [vmem:[%s2172_s23 + $0x10] sm:$0xf]  ;;  %v2055_v15 = vld [vmem:[%s2525_s4 + $0x60] sm:$0xff] }
  0x15   : > { %801 = vmatpush.bf16.msrb.mxu3 %v2042_v3  ;;  %895 = vmatpush.bf16.msrb.mxu0 %v2048_v5  ;;  %v551_v36 = vrot.slane %v549_v29, 4  ;;  %v554_v37 = vrot.slane %v552_v30, 5  ;;  %v565_v38 = vrot.slane %v563_v32, 4  ;;  %v568_v39 = vrot.slane %v566_v33, 5  ;;  %v535_v46 = vld [vmem:[%s2172_s23 + $0x18] sm:$0xf] }
  0x16   : > { %1783 = vmatmul.msk.bf16.vlgmr.msra.gmra.mxu3 %vm414_vm0, %v1771_v19  ;;  %1780 = vmatmul.msk.bf16.vlgmr.msra.gmra.mxu0 %vm414_vm0, %v1759_v23  ;;  %v574_v45 = vrot.slane %v572_v34, 5  ;;  %v577_v48 = vshrl.u32 %v533_v42, 16  ;;  %v580_v49 = vshll.u32 %v533_v42, 16  ;;  %v1786_v50 = vld [vmem:[%s2172_s23] sm:$0xf]  ;;  %v591_v52 = vshrl.u32 %v535_v46, 16 }
  0x17   : > { %v555_v40 = vor.u32 %v554_v37, %v551_v36  ;;  %v569_v44 = vor.u32 %v568_v39, %v565_v38  ;;  %v594_v53 = vshll.u32 %v535_v46, 16  ;;  %v2023_v54 = vld [vmem:[%s2172_s23 + $0x4] sm:$0xf0]  ;;  %v1834_v56 = vld [vmem:[%s2216_s21] sm:$0xf]  ;;  %v2061_v19 = vld [vmem:[%s2525_s4 + $0x70] sm:$0xff] }
  0x18   : > { %708 = vmatpush.bf16.msrb.mxu2 %v2035_v6  ;;  %507 = vmatpush.bf16.msrb.mxu1 %v2027_v11  ;;  %v579_v57 = vrot.slane %v577_v48, 4  ;;  %v582_v58 = vrot.slane %v580_v49, 5  ;;  %v2037_v61 = vld [vmem:[%s2216_s21 + $0x4] sm:$0xf0]  ;;  %v534_v62 = vld [vmem:[%s2172_s23 + $0x14] sm:$0x1]  ;;  %v1787_v5 = vor.u32 %v2023_v54, %v1786_v50 }
  0x19   : > { %802 = vmatpush.bf16.msrb.mxu3 %v2041_v10  ;;  %896 = vmatpush.bf16.msrb.mxu0 %v2047_v16  ;;  %v556_v47 = vrot.slane %v555_v40, 4  ;;  %v570_v51 = vrot.slane %v569_v44, 4  ;;  %v593_v63 = vrot.slane %v591_v52, 4  ;;  %v596_v0 = vrot.slane %v594_v53, 5  ;;  %v1866_v2 = vld [vmem:[%s2228_s27] sm:$0xf] }
  0x1a   : > { %v2043_v3 = vld [vmem:[%s2228_s27 + $0x4] sm:$0xf0]  ;;  %v536_v4 = vld [vmem:[%s2172_s23 + $0x1c] sm:$0x1]  ;;  %v1835_v7 = vor.u32 %v2037_v61, %v1834_v56  ;;  %v586_v8 = vshll.u32 %v534_v62, 16  ;;  %v583_v10 = vor.u32 %v582_v58, %v579_v57  ;;  %v2049_v20 = vld [vmem:[%s2525_s4 + $0x50] sm:$0xff] }
  0x1b   : > { %v561_v55 = vsel %vm2218_vm3, %v556_v47, %v560_v41  ;;  %v575_v59 = vsel %vm2218_vm3, %v570_v51, %v574_v45  ;;  %v1867_v9 = vor.u32 %v2043_v3, %v1866_v2  ;;  %v597_v11 = vor.u32 %v596_v0, %v593_v63  ;;  %v537_v14 = vld [vmem:[%s2172_s23 + $0x20] sm:$0xf]  ;;  %v1790_v29 = vld [vmem:[%s2172_s23 + $0x10] sm:$0xf]  ;;  %v2024_v30 = vld [vmem:[%s2172_s23 + $0x14] sm:$0xf0] }
  0x1c   : > { %1196 = vmatpush.bf16.msra.mxu2 %v2056_v17  ;;  %1101 = vmatpush.bf16.msra.mxu1 %v2050_v26  ;;  %v665_v60 = vunpack.c.l.b16 %v561_v55  ;;  %v666_v1 = vunpack.c.l.b16 %v575_v59  ;;  %v600_v12 = vshll.u32 %v536_v4, 16  ;;  %v588_v13 = vrot.slane %v586_v8, 5  ;;  %v2063_v21 = vld [vmem:[%s2525_s4 + $0x80] sm:$0xff]  ;;  %v1838_v33 = vld [vmem:[%s2216_s21 + $0x10] sm:$0xf] }
  0x1d   : > { %1291 = vmatpush.bf16.msra.mxu3 %v2062_v22  ;;  %1497 = vmatpush.bf16.msra.mxu0 %v2064_v35  ;;  %v584_v16 = vrot.slane %v583_v10, 4  ;;  %v598_v17 = vrot.slane %v597_v11, 4  ;;  %v539_v22 = vld [vmem:[%s2172_s23 + $0x28] sm:$0xf]  ;;  %v605_v23 = vshrl.u32 %v537_v14, 16  ;;  %v608_v24 = vshll.u32 %v537_v14, 16 }
  0x1e   : > { %v673_v6 = vpack.c.b16 %v666_v1, %v665_v60  ;;  %v602_v18 = vrot.slane %v600_v12, 5  ;;  %v619_v27 = vshrl.u32 %v539_v22, 16  ;;  %v622_v28 = vshll.u32 %v539_v22, 16  ;;  %v2038_v34 = vld [vmem:[%s2216_s21 + $0x14] sm:$0xf0] }
  0x1f   : > { %v589_v25 = vsel %vm2218_vm3, %v584_v16, %v588_v13  ;;  %v1870_v35 = vld [vmem:[%s2228_s27 + $0x10] sm:$0xf]  ;;  %v2044_v36 = vld [vmem:[%s2228_s27 + $0x14] sm:$0xf0]  ;;  %v607_v37 = vrot.slane %v605_v23, 4  ;;  %v610_v38 = vrot.slane %v608_v24, 5  ;;  %v1791_v44 = vor.u32 %v2024_v30, %v1790_v29 }
  0x20   : > { %1197 = vmatpush.bf16.msra.mxu2 %v2055_v15  ;;  %1102 = vmatpush.bf16.msra.mxu1 %v2049_v20  ;;  %v603_v26 = vsel %vm2218_vm3, %v598_v17, %v602_v18  ;;  %v667_v31 = vunpack.c.l.b16 %v589_v25  ;;  %v621_v39 = vrot.slane %v619_v27, 4  ;;  %v624_v40 = vrot.slane %v622_v28, 5  ;;  %v538_v41 = vld [vmem:[%s2172_s23 + $0x24] sm:$0x1]  ;;  %v540_v42 = vld [vmem:[%s2172_s23 + $0x2c] sm:$0x1] }
  0x21   : > { %1292 = vmatpush.bf16.msra.mxu3 %v2061_v19  ;;  %1498 = vmatpush.bf16.msra.mxu0 %v2063_v21  ;;  %v668_v32 = vunpack.c.l.b16 %v603_v26  ;;  %v1839_v46 = vor.u32 %v2038_v34, %v1838_v33  ;;  %v1871_v47 = vor.u32 %v2044_v36, %v1870_v35  ;;  %v611_v48 = vor.u32 %v610_v38, %v607_v37  ;;  %v541_v52 = vld [vmem:[%s2172_s23 + $0x30] sm:$0xf]  ;;  %v543_v53 = vld [vmem:[%s2172_s23 + $0x38] sm:$0xf]  ;;  %v542_v4 = vld [vmem:[%s2172_s23 + $0x34] sm:$0x1] }
  0x22   : > { %v614_v49 = vshll.u32 %v538_v41, 16  ;;  %v625_v50 = vor.u32 %v624_v40, %v621_v39  ;;  %v628_v51 = vshll.u32 %v540_v42, 16  ;;  %v633_v58 = vshrl.u32 %v541_v52, 16  ;;  %v1842_v10 = vld [vmem:[%s2216_s21 + $0x20] sm:$0xf] }
  0x23   : > { %1808 = vmatmul.msk.bf16.vlgmr.msrb.gmra.mxu1 %vm414_vm0, %v1787_v5  ;;  %1824 = vmatmul.msk.bf16.vlgmr.msrb.gmra.mxu2 %vm414_vm0, %v673_v6  ;;  %v674_v45 = vpack.c.b16 %v668_v32, %v667_v31  ;;  %v612_v54 = vrot.slane %v611_v48, 4  ;;  %v636_v59 = vshll.u32 %v541_v52, 16  ;;  %v647_v60 = vshrl.u32 %v543_v53, 16  ;;  %v544_v5 = vld [vmem:[%s2172_s23 + $0x3c] sm:$0x1] }
  0x24   : > { %v616_v55 = vrot.slane %v614_v49, 5  ;;  %v626_v56 = vrot.slane %v625_v50, 4  ;;  %v630_v57 = vrot.slane %v628_v51, 5  ;;  %v650_v61 = vshll.u32 %v543_v53, 16  ;;  %v1794_v6 = vld [vmem:[%s2172_s23 + $0x20] sm:$0xf] }
  0x25   : > { %v635_v0 = vrot.slane %v633_v58, 4  ;;  %v638_v1 = vrot.slane %v636_v59, 5  ;;  %v649_v2 = vrot.slane %v647_v60, 4  ;;  %v2039_v11 = vld [vmem:[%s2216_s21 + $0x24] sm:$0xf0]  ;;  %v642_v15 = vshll.u32 %v542_v4, 16 }
  0x26   : > { %1856 = vmatmul.msk.bf16.vlgmr.msrb.gmra.mxu3 %vm414_vm0, %v1835_v7  ;;  %1888 = vmatmul.msk.bf16.vlgmr.msrb.gmra.mxu0 %vm414_vm0, %v1867_v9  ;;  %v617_v62 = vsel %vm2218_vm3, %v612_v54, %v616_v55  ;;  %v631_v63 = vsel %vm2218_vm3, %v626_v56, %v630_v57  ;;  %v652_v3 = vrot.slane %v650_v61, 5  ;;  %v2025_v7 = vld [vmem:[%s2172_s23 + $0x24] sm:$0xf0]  ;;  %v1874_v12 = vld [vmem:[%s2228_s27 + $0x20] sm:$0xf]  ;;  %v656_v17 = vshll.u32 %v544_v5, 16 }
  0x27   : > { %v669_v8 = vunpack.c.l.b16 %v617_v62  ;;  %v670_v9 = vunpack.c.l.b16 %v631_v63  ;;  %v2045_v13 = vld [vmem:[%s2228_s27 + $0x24] sm:$0xf0]  ;;  %v639_v14 = vor.u32 %v638_v1, %v635_v0  ;;  %v1795_v18 = vor.u32 %v2025_v7, %v1794_v6  ;;  %v926_v26 = vld [vmem:[%s2216_s21] sm:$0xf]  ;;  %v1990_v29 = vld [vmem:[%s2172_s23 + $0x10] sm:$0xf] }
  0x28   : > { %v653_v16 = vor.u32 %v652_v3, %v649_v2  ;;  %v1843_v20 = vor.u32 %v2039_v11, %v1842_v10  ;;  %v1875_v21 = vor.u32 %v2045_v13, %v1874_v12  ;;  %v644_v23 = vrot.slane %v642_v15, 5  ;;  %v928_v27 = vld [vmem:[%s2216_s21 + $0x8] sm:$0xf]  ;;  %v1798_v40 = vld [vmem:[%s2172_s23 + $0x30] sm:$0xf] }
  0x29   : > { %v675_v19 = vpack.c.b16 %v670_v9, %v669_v8  ;;  %v640_v22 = vrot.slane %v639_v14, 4  ;;  %v658_v25 = vrot.slane %v656_v17, 5  ;;  %v1988_v28 = vld [vmem:[%s2172_s23 + $0x8] sm:$0xf]  ;;  %v943_v32 = vshrl.u32 %v926_v26, 16 }
  0x2a   : > { %v654_v24 = vrot.slane %v653_v16, 4  ;;  %v946_v33 = vshll.u32 %v926_v26, 16  ;;  %v957_v34 = vshrl.u32 %v928_v27, 16  ;;  %v960_v35 = vshll.u32 %v928_v27, 16  ;;  %v2026_v41 = vld [vmem:[%s2172_s23 + $0x34] sm:$0xf0] }
  0x2b   : > { %v645_v30 = vsel %vm2218_vm3, %v640_v22, %v644_v23  ;;  %v1339_v36 = vshrl.u32 %v1988_v28, 16  ;;  %v1342_v37 = vshll.u32 %v1988_v28, 16  ;;  %v1353_v38 = vshrl.u32 %v1990_v29, 16  ;;  %v929_v52 = vld [vmem:[%s2216_s21 + $0xc] sm:$0x1] }
  0x2c   : > { %v659_v31 = vsel %vm2218_vm3, %v654_v24, %v658_v25  ;;  %v1356_v39 = vshll.u32 %v1990_v29, 16  ;;  %v671_v42 = vunpack.c.l.b16 %v645_v30  ;;  %v945_v48 = vrot.slane %v943_v32, 4  ;;  %v1989_v57 = vld [vmem:[%s2172_s23 + $0xc] sm:$0x1]  ;;  %v1991_v58 = vld [vmem:[%s2172_s23 + $0x14] sm:$0x1] }
  0x2d   : > { %v948_v49 = vrot.slane %v946_v33, 5  ;;  %v959_v50 = vrot.slane %v957_v34, 4  ;;  %v962_v51 = vrot.slane %v960_v35, 5  ;;  %v1341_v53 = vrot.slane %v1339_v36, 4  ;;  %v1878_v62 = vld [vmem:[%s2228_s27 + $0x30] sm:$0xf] }
  0x2e   : > { %v1344_v54 = vrot.slane %v1342_v37, 5  ;;  %v1355_v55 = vrot.slane %v1353_v38, 4  ;;  %v1358_v56 = vrot.slane %v1356_v39, 5  ;;  %v1799_v59 = vor.u32 %v2026_v41, %v1798_v40  ;;  %v2046_v63 = vld [vmem:[%s2228_s27 + $0x34] sm:$0xf0] }
  0x2f   : > { %v949_v0 = vor.u32 %v948_v49, %v945_v48  ;;  %v963_v2 = vor.u32 %v962_v51, %v959_v50  ;;  %v966_v3 = vshll.u32 %v929_v52, 16  ;;  %v1348_v5 = vshll.u32 %v1989_v57, 16  ;;  %v930_v9 = vld [vmem:[%s2216_s21 + $0x10] sm:$0xf]  ;;  %v932_v10 = vld [vmem:[%s2216_s21 + $0x18] sm:$0xf] }
  0x30   : > { %v1345_v4 = vor.u32 %v1344_v54, %v1341_v53  ;;  %v1359_v6 = vor.u32 %v1358_v56, %v1355_v55  ;;  %v1362_v7 = vshll.u32 %v1991_v58, 16  ;;  %v1879_v8 = vor.u32 %v2046_v63, %v1878_v62  ;;  %v1992_v23 = vld [vmem:[%s2172_s23 + $0x18] sm:$0xf]  ;;  %v1994_v24 = vld [vmem:[%s2172_s23 + $0x20] sm:$0xf] }
  0x31   : > { %v950_v11 = vrot.slane %v949_v0, 4  ;;  %v964_v13 = vrot.slane %v963_v2, 4  ;;  %v968_v14 = vrot.slane %v966_v3, 5  ;;  %v1350_v16 = vrot.slane %v1348_v5, 5  ;;  %v931_v29 = vld [vmem:[%s2216_s21 + $0x14] sm:$0x1] }
  0x32   : > { %v1346_v15 = vrot.slane %v1345_v4, 4  ;;  %v1360_v17 = vrot.slane %v1359_v6, 4  ;;  %v988_v22 = vshll.u32 %v932_v10, 16  ;;  %v933_v34 = vld [vmem:[%s2216_s21 + $0x1c] sm:$0x1]  ;;  %v1367_v35 = vshrl.u32 %v1992_v23, 16 }
  0x33   : > { %1809 = vmatmul.msk.bf16.gmra.mxu1 %vm414_vm0, %v1791_v44  ;;  %1825 = vmatmul.msk.bf16.gmra.mxu2 %vm414_vm0, %v674_v45  ;;  %v672_v44 = vunpack.c.l.b16 %v659_v31  ;;  %v1846_v45 = vld [vmem:[%s2216_s21 + $0x30] sm:$0xf]  ;;  %v969_v26 = vsel %vm2218_vm3, %v964_v13, %v968_v14  ;;  %v1370_v36 = vshll.u32 %v1992_v23, 16  ;;  %v1381_v37 = vshrl.u32 %v1994_v24, 16  ;;  %v1922_v41 = vld [vmem:[%s2172_s23 + $0x8] sm:$0xf] }
  0x34   : > { %v1351_v27 = vsel %vm2218_vm3, %v1346_v15, %v1350_v16  ;;  %v990_v33 = vrot.slane %v988_v22, 5  ;;  %v1384_v38 = vshll.u32 %v1994_v24, 16  ;;  %v1060_v40 = vunpack.c.l.b16 %v969_v26  ;;  %v1993_v57 = vld [vmem:[%s2172_s23 + $0x1c] sm:$0x1]  ;;  %v1995_v58 = vld [vmem:[%s2172_s23 + $0x24] sm:$0x1] }
  0x35   : > { %v676_v60 = vpack.c.b16 %v672_v44, %v671_v42  ;;  %v2051_v42 = vld [vmem:[%s2172_s23 + $0xc] sm:$0xf0]  ;;  %v1455_v44 = vunpack.c.l.b16 %v1351_v27  ;;  %v980_v49 = vshll.u32 %v931_v29, 16  ;;  %v994_v51 = vshll.u32 %v933_v34, 16  ;;  %v934_v6 = vld [vmem:[%s2216_s21 + $0x20] sm:$0xf] }
  0x36   : > { %1857 = vmatmul.msk.bf16.gmra.mxu3 %vm414_vm0, %v1839_v46  ;;  %1889 = vmatmul.msk.bf16.gmra.mxu0 %vm414_vm0, %v1871_v47  ;;  %v2040_v46 = vld [vmem:[%s2216_s21 + $0x34] sm:$0xf0]  ;;  %v927_v47 = vld [vmem:[%s2216_s21 + $0x4] sm:$0x1]  ;;  %v1369_v52 = vrot.slane %v1367_v35, 4  ;;  %v1372_v53 = vrot.slane %v1370_v36, 5 }
  0x37   : > { %v1847_v61 = vor.u32 %v2040_v46, %v1846_v45  ;;  %v952_v1 = vshll.u32 %v927_v47, 16  ;;  %v1962_v46 = vld [vmem:[%s2163_s18 + $0x8] sm:$0xf]  ;;  %v2057_v47 = vld [vmem:[%s2163_s18 + $0xc] sm:$0xf0]  ;;  %v1383_v54 = vrot.slane %v1381_v37, 4 }
  0x38   : > { %v1386_v55 = vrot.slane %v1384_v38, 5  ;;  %v982_v63 = vrot.slane %v980_v49, 5  ;;  %v1373_v2 = vor.u32 %v1372_v53, %v1369_v52  ;;  %v1376_v3 = vshll.u32 %v1993_v57, 16  ;;  %v1998_v15 = vld [vmem:[%s2172_s23 + $0x30] sm:$0xf] }
  0x39   : > { %v954_v12 = vrot.slane %v952_v1, 5  ;;  %v996_v1 = vrot.slane %v994_v51, 5  ;;  %v1390_v5 = vshll.u32 %v1995_v58, 16  ;;  %v999_v16 = vshrl.u32 %v934_v6, 16  ;;  %v2052_v29 = vld [vmem:[%s2172_s23 + $0x1c] sm:$0xf0] }
  0x3a   : > { %v1387_v4 = vor.u32 %v1386_v55, %v1383_v54  ;;  %v1409_v22 = vshrl.u32 %v1998_v15, 16  ;;  %v1412_v23 = vshll.u32 %v1998_v15, 16  ;;  %v935_v35 = vld [vmem:[%s2216_s21 + $0x24] sm:$0x1]  ;;  %v937_v36 = vld [vmem:[%s2216_s21 + $0x2c] sm:$0x1] }
  0x3b   : > { %v955_v25 = vsel %vm2218_vm3, %v950_v11, %v954_v12  ;;  %v1374_v11 = vrot.slane %v1373_v2, 4  ;;  %v1378_v12 = vrot.slane %v1376_v3, 5  ;;  %v1392_v14 = vrot.slane %v1390_v5, 5  ;;  %v938_v3 = vld [vmem:[%s2216_s21 + $0x30] sm:$0xf] }
  0x3c   : > { %v1059_v39 = vunpack.c.l.b16 %v955_v25  ;;  %v1388_v13 = vrot.slane %v1387_v4, 4  ;;  %v1008_v49 = vshll.u32 %v935_v35, 16  ;;  %v1022_v51 = vshll.u32 %v937_v36, 16  ;;  %v940_v4 = vld [vmem:[%s2216_s21 + $0x38] sm:$0xf] }
  0x3d   : > { %v1379_v26 = vsel %vm2218_vm3, %v1374_v11, %v1378_v12  ;;  %v1041_v11 = vshrl.u32 %v940_v4, 16  ;;  %v1044_v12 = vshll.u32 %v940_v4, 16  ;;  %v1974_v4 = vld [vmem:[%s2163_s18 + $0x38] sm:$0xf] }
  0x3e   : > { %v1067_v56 = vpack.c.b16 %v1060_v40, %v1059_v39  ;;  %v1393_v27 = vsel %vm2218_vm3, %v1388_v13, %v1392_v14  ;;  %v2058_v39 = vld [vmem:[%s2163_s18 + $0x1c] sm:$0xf0]  ;;  %v1457_v40 = vunpack.c.l.b16 %v1379_v26 }
  0x43   : > { %1810 = vmatmul.msk.bf16.gmra.mxu1 %vm414_vm0, %v1795_v18  ;;  %1826 = vmatmul.msk.bf16.gmra.mxu2 %vm414_vm0, %v675_v19  ;;  %v1364_v18 = vrot.slane %v1362_v7, 5  ;;  %v971_v19 = vshrl.u32 %v930_v9, 16  ;;  %v936_v7 = vld [vmem:[%s2216_s21 + $0x28] sm:$0xf] }
  0x45   : > { %v1365_v28 = vsel %vm2218_vm3, %v1360_v17, %v1364_v18  ;;  %v973_v30 = vrot.slane %v971_v19, 4  ;;  %v1002_v17 = vshll.u32 %v934_v6, 16  ;;  %v1013_v18 = vshrl.u32 %v936_v7, 16 }
  0x46   : > { %1858 = vmatmul.msk.bf16.gmra.mxu3 %vm414_vm0, %v1843_v20  ;;  %1890 = vmatmul.msk.bf16.gmra.mxu0 %vm414_vm0, %v1875_v21  ;;  %v974_v20 = vshll.u32 %v930_v9, 16  ;;  %v985_v21 = vshrl.u32 %v932_v10, 16  ;;  %v1456_v45 = vunpack.c.l.b16 %v1365_v28  ;;  %v1996_v10 = vld [vmem:[%s2172_s23 + $0x28] sm:$0xf]  ;;  %v1016_v19 = vshll.u32 %v936_v7, 16 }
  0x47   : > { %v1926_v28 = vld [vmem:[%s2172_s23 + $0x18] sm:$0xf] }
  0x48   : > { %v976_v31 = vrot.slane %v974_v20, 5  ;;  %v987_v32 = vrot.slane %v985_v21, 4  ;;  %v1395_v20 = vshrl.u32 %v1996_v10, 16  ;;  %v1398_v21 = vshll.u32 %v1996_v10, 16  ;;  %v2000_v7 = vld [vmem:[%s2172_s23 + $0x38] sm:$0xf] }
  0x49   : > { %v1018_v34 = vrot.slane %v1016_v19, 5  ;;  %v1927_v52 = vor.u32 %v2052_v29, %v1926_v28  ;;  %v1030_v10 = vshll.u32 %v938_v3, 16  ;;  %v1423_v15 = vshrl.u32 %v2000_v7, 16 }
  0x4a   : > { %v977_v48 = vor.u32 %v976_v31, %v973_v30  ;;  %v991_v50 = vor.u32 %v990_v33, %v987_v32  ;;  %v1966_v30 = vld [vmem:[%s2163_s18 + $0x18] sm:$0xf]  ;;  %v1001_v31 = vrot.slane %v999_v16, 4  ;;  %v1004_v32 = vrot.slane %v1002_v17, 5 }
  0x4b   : > { %v1015_v33 = vrot.slane %v1013_v18, 4  ;;  %v1397_v37 = vrot.slane %v1395_v20, 4  ;;  %v1400_v38 = vrot.slane %v1398_v21, 5  ;;  %v1967_v53 = vor.u32 %v2058_v39, %v1966_v30  ;;  %v1930_v21 = vld [vmem:[%s2172_s23 + $0x28] sm:$0xf] }
  0x4c   : > { %v978_v62 = vrot.slane %v977_v48, 4  ;;  %v992_v0 = vrot.slane %v991_v50, 4  ;;  %v1005_v48 = vor.u32 %v1004_v32, %v1001_v31  ;;  %v1426_v16 = vshll.u32 %v2000_v7, 16  ;;  %v939_v31 = vld [vmem:[%s2216_s21 + $0x34] sm:$0x1] }
  0x4d   : > { %v1019_v50 = vor.u32 %v1018_v34, %v1015_v33  ;;  %v1401_v54 = vor.u32 %v1400_v38, %v1397_v37  ;;  %v1032_v26 = vrot.slane %v1030_v10, 5  ;;  %v1046_v28 = vrot.slane %v1044_v12, 5  ;;  %v941_v32 = vld [vmem:[%s2216_s21 + $0x3c] sm:$0x1]  ;;  %s355_s21 = scalar_lea.vmem %s2528_s7, %s2532_s25 }
  0x4e   : > { %v997_v9 = vsel %vm2218_vm3, %v992_v0, %v996_v1  ;;  %v1425_v33 = vrot.slane %v1423_v15, 4  ;;  %v1428_v34 = vrot.slane %v1426_v16, 5 }
  0x4f   : > { %v1062_v25 = vunpack.c.l.b16 %v997_v9  ;;  %v1027_v9 = vshrl.u32 %v938_v3, 16  ;;  %v2054_v3 = vld [vmem:[%s2172_s23 + $0x3c] sm:$0xf0] }
  0x53   : > { %1811 = vmatmul.msk.bf16.gmra.mxu1 %vm414_vm0, %v1799_v59  ;;  %1827 = vmatmul.msk.bf16.gmra.mxu2 %vm414_vm0, %v676_v60  ;;  %v1923_v59 = vor.u32 %v2051_v42, %v1922_v41  ;;  %v1963_v60 = vor.u32 %v2057_v47, %v1962_v46  ;;  %v1458_v41 = vunpack.c.l.b16 %v1393_v27  ;;  %v1997_v42 = vld [vmem:[%s2172_s23 + $0x2c] sm:$0x1]  ;;  %v1999_v47 = vld [vmem:[%s2172_s23 + $0x34] sm:$0x1]  ;;  %v1043_v27 = vrot.slane %v1041_v11, 4 }
  0x54   : > { %v1404_v55 = vshll.u32 %v1997_v42, 16  ;;  %v1418_v58 = vshll.u32 %v1999_v47, 16 }
  0x56   : > { %1859 = vmatmul.msk.bf16.gmra.mxu3 %vm414_vm0, %v1847_v61  ;;  %1891 = vmatmul.msk.bf16.gmra.mxu0 %vm414_vm0, %v1879_v8  ;;  %v1463_v61 = vpack.c.b16 %v1456_v45, %v1455_v44  ;;  %v983_v8 = vsel %vm2218_vm3, %v978_v62, %v982_v63  ;;  %v1411_v44 = vrot.slane %v1409_v22, 4  ;;  %v1414_v45 = vrot.slane %v1412_v23, 5  ;;  %v2053_v22 = vld [vmem:[%s2172_s23 + $0x2c] sm:$0xf0]  ;;  %v1970_v23 = vld [vmem:[%s2163_s18 + $0x28] sm:$0xf] }
  0x57   : > { %v1061_v24 = vunpack.c.l.b16 %v983_v8  ;;  %v1024_v62 = vrot.slane %v1022_v51, 5  ;;  %v1402_v63 = vrot.slane %v1401_v54, 4  ;;  %v1406_v0 = vrot.slane %v1404_v55, 5  ;;  %v2002_v8 = vld [vmem:[%s2172_s23 + $0x40] sm:$0xf] }
  0x58   : > { %v1415_v57 = vor.u32 %v1414_v45, %v1411_v44  ;;  %v1420_v2 = vrot.slane %v1418_v58, 5  ;;  %v1437_v17 = vshrl.u32 %v2002_v8, 16  ;;  %v1440_v18 = vshll.u32 %v2002_v8, 16 }
  0x59   : > { %v1068_v46 = vpack.c.b16 %v1062_v25, %v1061_v24  ;;  %v1407_v13 = vsel %vm2218_vm3, %v1402_v63, %v1406_v0  ;;  %v2059_v24 = vld [vmem:[%s2163_s18 + $0x2c] sm:$0xf0]  ;;  %v1029_v25 = vrot.slane %v1027_v9, 4  ;;  %v1931_v38 = vor.u32 %v2053_v22, %v1930_v21 }
  0x5a   : > { %v1416_v1 = vrot.slane %v1415_v57, 4  ;;  %v1459_v29 = vunpack.c.l.b16 %v1407_v13  ;;  %v1439_v35 = vrot.slane %v1437_v17, 4  ;;  %v1442_v36 = vrot.slane %v1440_v18, 5 }
  0x5b   : > { %v1971_v39 = vor.u32 %v2059_v24, %v1970_v23  ;;  %v1033_v42 = vor.u32 %v1032_v26, %v1029_v25  ;;  %v1036_v44 = vshll.u32 %v939_v31, 16  ;;  %v1047_v45 = vor.u32 %v1046_v28, %v1043_v27 }
  0x5c   : > { %v1421_v14 = vsel %vm2218_vm3, %v1416_v1, %v1420_v2  ;;  %v1934_v2 = vld [vmem:[%s2172_s23 + $0x38] sm:$0xf] }
  0x5d   : > { %v1460_v30 = vunpack.c.l.b16 %v1421_v14  ;;  %v1048_v54 = vrot.slane %v1047_v45, 4  ;;  %v1935_v10 = vor.u32 %v2054_v3, %v1934_v2 }
  0x5f   : > { %v1465_v47 = vpack.c.b16 %v1460_v30, %v1459_v29 }
  0x63   : > { %1904 = vmatmul.msk.bf16.vlgmr.msra.gmra.mxu1 %vm414_vm0, %v1067_v56  ;;  %1944 = vmatmul.msk.bf16.vlgmr.msra.gmra.mxu2 %vm414_vm0, %v1923_v59  ;;  %v1464_v56 = vpack.c.b16 %v1458_v41, %v1457_v40  ;;  %v1006_v59 = vrot.slane %v1005_v48, 4  ;;  %v2001_v40 = vld [vmem:[%s2172_s23 + $0x3c] sm:$0x1]  ;;  %v2003_v41 = vld [vmem:[%s2172_s23 + $0x44] sm:$0x1]  ;;  %v1429_v48 = vor.u32 %v1428_v34, %v1425_v33 }
  0x64   : > { %v1446_v51 = vshll.u32 %v2003_v41, 16 }
  0x66   : > { %1984 = vmatmul.msk.bf16.vlgmr.msra.gmra.mxu3 %vm414_vm0, %v1963_v60  ;;  %2016 = vmatmul.msk.bf16.vlgmr.msra.gmra.mxu0 %vm414_vm0, %v1463_v61  ;;  %v1010_v60 = vrot.slane %v1008_v49, 5  ;;  %v1020_v61 = vrot.slane %v1019_v50, 4  ;;  %v1432_v49 = vshll.u32 %v2001_v40, 16  ;;  %v1443_v50 = vor.u32 %v1442_v36, %v1439_v35 }
  0x68   : > { %v1011_v5 = vsel %vm2218_vm3, %v1006_v59, %v1010_v60  ;;  %v1025_v6 = vsel %vm2218_vm3, %v1020_v61, %v1024_v62  ;;  %v1434_v57 = vrot.slane %v1432_v49, 5  ;;  %v1444_v58 = vrot.slane %v1443_v50, 4 }
  0x69   : > { %v1063_v19 = vunpack.c.l.b16 %v1011_v5  ;;  %v1064_v20 = vunpack.c.l.b16 %v1025_v6  ;;  %v1448_v59 = vrot.slane %v1446_v51, 5  ;;  %v2060_v5 = vld [vmem:[%s2163_s18 + $0x3c] sm:$0xf0]  ;;  %s2022_s18 = sshll.u32 %s2532_s25, 5 }
  0x6a   : > { %v1975_v11 = vor.u32 %v2060_v5, %v1974_v4  ;;  %s2453_s14 = scalar_lea.vmem %s2526_s5, %s2022_s18 }
  0x6b   : > { %v1069_v37 = vpack.c.b16 %v1064_v20, %v1063_v19  ;;  %v1449_v63 = vsel %vm2218_vm3, %v1444_v58, %v1448_v59 }
  0x6c   : > { %v1462_v7 = vunpack.c.l.b16 %v1449_v63 }
  0x73   : > { %1905 = vmatmul.msk.bf16.gmra.mxu1 %vm414_vm0, %v1068_v46  ;;  %1945 = vmatmul.msk.bf16.gmra.mxu2 %vm414_vm0, %v1927_v52  ;;  %v1050_v46 = vshll.u32 %v941_v32, 16  ;;  %v1034_v52 = vrot.slane %v1033_v42, 4 }
  0x75   : > { %v1052_v55 = vrot.slane %v1050_v46, 5 }
  0x76   : > { %1985 = vmatmul.msk.bf16.gmra.mxu3 %vm414_vm0, %v1967_v53  ;;  %2017 = vmatmul.msk.bf16.gmra.mxu0 %vm414_vm0, %v1464_v56  ;;  %v1038_v53 = vrot.slane %v1036_v44, 5  ;;  %v1430_v56 = vrot.slane %v1429_v48, 4 }
  0x77   : > { %v1053_v61 = vsel %vm2218_vm3, %v1048_v54, %v1052_v55 }
  0x78   : > { %v1039_v60 = vsel %vm2218_vm3, %v1034_v52, %v1038_v53  ;;  %v1435_v62 = vsel %vm2218_vm3, %v1430_v56, %v1434_v57  ;;  %v1066_v1 = vunpack.c.l.b16 %v1053_v61 }
  0x79   : > { %v1065_v0 = vunpack.c.l.b16 %v1039_v60  ;;  %v1461_v6 = vunpack.c.l.b16 %v1435_v62 }
  0x7b   : > { %v1070_v8 = vpack.c.b16 %v1066_v1, %v1065_v0  ;;  %v1466_v12 = vpack.c.b16 %v1462_v7, %v1461_v6 }
  0x83   : > { %1906 = vmatmul.msk.bf16.gmra.mxu1 %vm414_vm0, %v1069_v37  ;;  %1946 = vmatmul.msk.bf16.gmra.mxu2 %vm414_vm0, %v1931_v38 }
  0x86   : > { %1986 = vmatmul.msk.bf16.gmra.mxu3 %vm414_vm0, %v1971_v39  ;;  %2018 = vmatmul.msk.bf16.gmra.mxu0 %vm414_vm0, %v1465_v47 }
  0x90   : > { %v441_v9 = vpop.f32.mrf.mxu1 }
  0x93   : > { %v436_v13 = vpop.f32.mrf.mxu0  ;;  %1907 = vmatmul.msk.bf16.gmra.mxu1 %vm414_vm0, %v1070_v8  ;;  %1947 = vmatmul.msk.bf16.gmra.mxu2 %vm414_vm0, %v1935_v10 }
  0x96   : > { %1987 = vmatmul.msk.bf16.gmra.mxu3 %vm414_vm0, %v1975_v11  ;;  %2019 = vmatmul.msk.bf16.gmra.mxu0 %vm414_vm0, %v1466_v12  ;;  %v2403_v43 = vpop.f32.mrf.mxu2 }
  0x98   : > { %v2407_v15 = vpop.f32.mrf.mxu1 }
  0x99   : > { %v2405_v14 = vpop.f32.mrf.mxu3 }
  0x9b   : > { %v438_v16 = vpop.f32.mrf.mxu0 }
  0x9e   : > { %v2409_v17 = vpop.f32.mrf.mxu2 }
  0xa0   : > { %v509_v19 = vpop.f32.mrf.mxu1 }
  0xa1   : > { %v2411_v18 = vpop.f32.mrf.mxu3  ;;  %v510_v49 = vadd.f32 %v509_v19, %v436_v13 }
  0xa3   : > { %v898_v20 = vpop.f32.mrf.mxu0 }
  0xa6   : > { %v710_v21 = vpop.f32.mrf.mxu2 }
  0xa7   : > { %v730_v51 = vadd.f32 %v710_v21, %v510_v49 }
  0xa8   : > { %v511_v23 = vpop.f32.mrf.mxu1 }
  0xa9   : > { %v804_v22 = vpop.f32.mrf.mxu3  ;;  %v512_v56 = vadd.f32 %v511_v23, %v438_v16 }
  0xaa   : > { %v824_v54 = vadd.f32 %v804_v22, %v730_v51 }
  0xab   : > { %v900_v24 = vpop.f32.mrf.mxu0 }
  0xac   : > { %v918_v59 = vadd.f32 %v898_v20, %v824_v54 }
  0xae   : > { %v712_v25 = vpop.f32.mrf.mxu2 }
  0xaf   : > { %v731_v58 = vadd.f32 %v712_v25, %v512_v56 }
  0xb0   : > { %v514_v27 = vpop.f32.mrf.mxu1 }
  0xb1   : > { %v806_v26 = vpop.f32.mrf.mxu3  ;;  %v515_v2 = vadd.f32 %v514_v27, %v441_v9 }
  0xb2   : > { %v825_v63 = vadd.f32 %v806_v26, %v731_v58 }
  0xb3   : > { %v903_v28 = vpop.f32.mrf.mxu0 }
  0xb4   : > { %v919_v7 = vadd.f32 %v900_v24, %v825_v63 }
  0xb6   : > { %v715_v29 = vpop.f32.mrf.mxu2 }
  0xb7   : > { %v732_v5 = vadd.f32 %v715_v29, %v515_v2 }
  0xb8   : > { %v516_v31 = vpop.f32.mrf.mxu1 }
  0xb9   : > { %v809_v30 = vpop.f32.mrf.mxu3  ;;  %v517_v19 = vadd.f32 %v516_v31, %v2407_v15 }
  0xba   : > { %v826_v13 = vadd.f32 %v809_v30, %v732_v5 }
  0xbb   : > { %v2413_v32 = vpop.f32.mrf.mxu0 }
  0xbc   : > { %v920_v25 = vadd.f32 %v903_v28, %v826_v13 }
  0xbe   : > { %v717_v33 = vpop.f32.mrf.mxu2 }
  0xbf   : > { %v733_v22 = vadd.f32 %v717_v33, %v517_v19 }
  0xc0   : > { %v2417_v35 = vpop.f32.mrf.mxu1 }
  0xc1   : > { %v2415_v34 = vpop.f32.mrf.mxu3  ;;  %v520_v58 = vadd.f32 %v2417_v35, %v2403_v43 }
  0xc2   : > { %v827_v56 = vadd.f32 %v2415_v34, %v733_v22 }
  0xc3   : > { %v2419_v36 = vpop.f32.mrf.mxu0 }
  0xc4   : > { %v921_v34 = vadd.f32 %v2413_v32, %v827_v56 }
  0xc6   : > { %v2421_v37 = vpop.f32.mrf.mxu2 }
  0xc8   : > { %v2425_v39 = vpop.f32.mrf.mxu1 }
  0xc9   : > { %v2423_v38 = vpop.f32.mrf.mxu3  ;;  %v522_v32 = vadd.f32 %v2425_v39, %v2409_v17 }
  0xcb   : > { %v2427_v40 = vpop.f32.mrf.mxu0 }
  0xce   : > { %v2429_v41 = vpop.f32.mrf.mxu2 }
  0xd0   : > { %v2433_v44 = vpop.f32.mrf.mxu1 }
  0xd1   : > { %v2431_v42 = vpop.f32.mrf.mxu3 }
  0xd3   : > { %v2435_v45 = vpop.f32.mrf.mxu0 }
  0xd6   : > { %v2437_v46 = vpop.f32.mrf.mxu2 }
  0xd8   : > { %v2441_v48 = vpop.f32.mrf.mxu1 }
  0xd9   : > { %v2439_v47 = vpop.f32.mrf.mxu3 }
  0xdb   : > { %v2443_v50 = vpop.f32.mrf.mxu0 }
  0xde   : > { %v2445_v52 = vpop.f32.mrf.mxu2 }
  0xe0   : > { %v1104_v55 = vpop.f32.mrf.mxu1 }
  0xe1   : > { %v2447_v53 = vpop.f32.mrf.mxu3  ;;  %v1124_v60 = vadd.f32 %v1104_v55, %v918_v59 }
  0xe3   : > { %v1500_v57 = vpop.f32.mrf.mxu0 }
  0xe6   : > { %v1199_v61 = vpop.f32.mrf.mxu2 }
  0xe7   : > { %v1219_v0 = vadd.f32 %v1199_v61, %v1124_v60  ;;  %v734_v61 = vadd.f32 %v2421_v37, %v520_v58 }
  0xe8   : > { %v1106_v1 = vpop.f32.mrf.mxu1 }
  0xe9   : > { %v1294_v62 = vpop.f32.mrf.mxu3  ;;  %v1125_v10 = vadd.f32 %v1106_v1, %v919_v7 }
  0xea   : > { %v1314_v3 = vadd.f32 %v1294_v62, %v1219_v0 }
  0xeb   : > { %v1502_v4 = vpop.f32.mrf.mxu0 }
  0xec   : > { %v1520_v6 = vadd.f32 %v1500_v57, %v1314_v3 }
  0xee   : > { %v1528_v8 = vpack.c.bf16 %v1520_v6, %v1520_v6  ;;  %v1201_v11 = vpop.f32.mrf.mxu2  ;;  %v1567_v23 = vmul.f32 %v1520_v6, %v1520_v6  ;;  %v1545_v26 = vsel %vm414_vm0, %v1520_v6, 0.0  ;;  %v828_v6 = vadd.f32 %v2423_v38, %v734_v61 }
  0xef   : > { %v1220_v9 = vadd.f32 %v1201_v11, %v1125_v10  ;;  %v735_v10 = vadd.f32 %v2429_v41, %v522_v32 }
  0xf0   : > { %1537 = vst.msk [vmem:[%s2453_s14] sm:$0xf] %vm1536_vm4, %v1528_v8  ;;  %v1109_v16 = vpop.f32.mrf.mxu1  ;;  %v1575_v15 = vsel %vm414_vm0, %v1567_v23, 0.0 }
  0xf1   : > { %v1296_v12 = vpop.f32.mrf.mxu3  ;;  %v1126_v30 = vadd.f32 %v1109_v16, %v920_v25  ;;  %v829_v23 = vadd.f32 %v2431_v42, %v735_v10 }
  0xf2   : > { %v1315_v20 = vadd.f32 %v1296_v12, %v1220_v9  ;;  %v922_v12 = vadd.f32 %v2419_v36, %v828_v6  ;;  %v525_v36 = vadd.f32 %v2433_v44, %v2405_v14 }
  0xf3   : > { %v1505_v21 = vpop.f32.mrf.mxu0 }
  0xf4   : > { %v1521_v24 = vadd.f32 %v1502_v4, %v1315_v20 }
  0xf6   : > { %v1529_v27 = vpack.c.bf16 %v1521_v24, %v1521_v24  ;;  %v1546_v29 = vsel %vm414_vm0, %v1521_v24, 0.0  ;;  %v1568_v49 = vmul.f32 %v1521_v24, %v1521_v24  ;;  %v1204_v54 = vpop.f32.mrf.mxu2 }
  0xf7   : > { %v1547_v51 = vadd.f32 %v1546_v29, %v1545_v26  ;;  %v1221_v33 = vadd.f32 %v1204_v54, %v1126_v30  ;;  %v736_v26 = vadd.f32 %v2437_v46, %v525_v36  ;;  %v923_v29 = vadd.f32 %v2427_v40, %v829_v23 }
  0xf8   : > { %1538 = vst.msk [vmem:[%s2453_s14 + $0x4] sm:$0xf] %vm1536_vm4, %v1529_v27  ;;  %v1576_v31 = vsel %vm414_vm0, %v1568_v49, 0.0  ;;  %v1111_v28 = vpop.f32.mrf.mxu1  ;;  %v527_v40 = vadd.f32 %v2441_v48, %v2411_v18 }
  0xf9   : > { %v1299_v55 = vpop.f32.mrf.mxu3  ;;  %v1577_v57 = vadd.f32 %v1576_v31, %v1575_v15  ;;  %v1127_v2 = vadd.f32 %v1111_v28, %v921_v34  ;;  %v830_v31 = vadd.f32 %v2439_v47, %v736_v26 }
  0xfa   : > { %v1316_v59 = vadd.f32 %v1299_v55, %v1221_v33 }
  0xfb   : > { %v1507_v60 = vpop.f32.mrf.mxu0 }
  0xfc   : > { %v1522_v62 = vadd.f32 %v1505_v21, %v1316_v59  ;;  %v924_v59 = vadd.f32 %v2435_v45, %v830_v31 }
  0xfe   : > { %v1530_v63 = vpack.c.bf16 %v1522_v62, %v1522_v62  ;;  %v1548_v0 = vsel %vm414_vm0, %v1522_v62, 0.0  ;;  %v1569_v1 = vmul.f32 %v1522_v62, %v1522_v62  ;;  %v1206_v4 = vpop.f32.mrf.mxu2 }
  0xff   : > { %v1549_v3 = vadd.f32 %v1548_v0, %v1547_v51  ;;  %v1222_v35 = vadd.f32 %v1206_v4, %v1127_v2 }
 0x100   : > { %1539 = vst.msk [vmem:[%s2453_s14 + $0x8] sm:$0xf] %vm1536_vm4, %v1530_v63  ;;  %v1578_v43 = vsel %vm414_vm0, %v1569_v1, 0.0  ;;  %v1114_v7 = vpop.f32.mrf.mxu1 }
 0x101   : > { %v1301_v5 = vpop.f32.mrf.mxu3  ;;  %v1579_v37 = vadd.f32 %v1578_v43, %v1577_v57  ;;  %v1128_v19 = vadd.f32 %v1114_v7, %v922_v12  ;;  %v737_v57 = vadd.f32 %v2445_v52, %v527_v40 }
 0x102   : > { %v1317_v8 = vadd.f32 %v1301_v5, %v1222_v35 }
 0x103   : > { %v1510_v13 = vpop.f32.mrf.mxu0  ;;  %v831_v1 = vadd.f32 %v2447_v53, %v737_v57 }
 0x104   : > { %v1523_v11 = vadd.f32 %v1507_v60, %v1317_v8 }
 0x105   : > { %v925_v5 = vadd.f32 %v2443_v50, %v831_v1 }
 0x106   : > { %v1531_v9 = vpack.c.bf16 %v1523_v11, %v1523_v11  ;;  %v1550_v38 = vsel %vm414_vm0, %v1523_v11, 0.0  ;;  %v1570_v16 = vmul.f32 %v1523_v11, %v1523_v11  ;;  %v1209_v21 = vpop.f32.mrf.mxu2 }
 0x107   : > { %v1551_v20 = vadd.f32 %v1550_v38, %v1549_v3  ;;  %v1223_v39 = vadd.f32 %v1209_v21, %v1128_v19 }
 0x108   : > { %1540 = vst.msk [vmem:[%s2453_s14 + $0xc] sm:$0xf] %vm1536_vm4, %v1531_v9  ;;  %v1580_v17 = vsel %vm414_vm0, %v1570_v16, 0.0  ;;  %v1116_v41 = vpop.f32.mrf.mxu1 }
 0x109   : > { %v1304_v22 = vpop.f32.mrf.mxu3  ;;  %v1581_v24 = vadd.f32 %v1580_v17, %v1579_v37  ;;  %v1129_v51 = vadd.f32 %v1116_v41, %v923_v29 }
 0x10a   : > { %v1318_v25 = vadd.f32 %v1304_v22, %v1223_v39 }
 0x10b   : > { %v1512_v54 = vpop.f32.mrf.mxu0 }
 0x10c   : > { %v1524_v27 = vadd.f32 %v1510_v13, %v1318_v25 }
 0x10e   : > { %v1532_v49 = vpack.c.bf16 %v1524_v27, %v1524_v27  ;;  %v1552_v42 = vsel %vm414_vm0, %v1524_v27, 0.0  ;;  %v1571_v30 = vmul.f32 %v1524_v27, %v1524_v27  ;;  %v1211_v56 = vpop.f32.mrf.mxu2 }
 0x10f   : > { %v1553_v55 = vadd.f32 %v1552_v42, %v1551_v20  ;;  %v1224_v44 = vadd.f32 %v1211_v56, %v1129_v51 }
 0x110   : > { %1541 = vst.msk [vmem:[%s2453_s14 + $0x10] sm:$0xf] %vm1536_vm4, %v1532_v49  ;;  %v1582_v14 = vsel %vm414_vm0, %v1571_v30, 0.0  ;;  %v1119_v33 = vpop.f32.mrf.mxu1 }
 0x111   : > { %v1306_v15 = vpop.f32.mrf.mxu3  ;;  %v1583_v46 = vadd.f32 %v1582_v14, %v1581_v24  ;;  %v1130_v62 = vadd.f32 %v1119_v33, %v924_v59 }
 0x112   : > { %v1319_v28 = vadd.f32 %v1306_v15, %v1224_v44 }
 0x113   : > { %v1515_v2 = vpop.f32.mrf.mxu0 }
 0x114   : > { %v1525_v58 = vadd.f32 %v1512_v54, %v1319_v28 }
 0x116   : > { %v1533_v60 = vpack.c.bf16 %v1525_v58, %v1525_v58  ;;  %v1554_v47 = vsel %vm414_vm0, %v1525_v58, 0.0  ;;  %v1572_v61 = vmul.f32 %v1525_v58, %v1525_v58  ;;  %v1214_v63 = vpop.f32.mrf.mxu2 }
 0x117   : > { %v1555_v34 = vadd.f32 %v1554_v47, %v1553_v55  ;;  %v1225_v48 = vadd.f32 %v1214_v63, %v1130_v62 }
 0x118   : > { %1542 = vst.msk [vmem:[%s2453_s14 + $0x14] sm:$0xf] %vm1536_vm4, %v1533_v60  ;;  %v1584_v18 = vsel %vm414_vm0, %v1572_v61, 0.0  ;;  %v1121_v45 = vpop.f32.mrf.mxu1 }
 0x119   : > { %v1309_v0 = vpop.f32.mrf.mxu3  ;;  %v1585_v52 = vadd.f32 %v1584_v18, %v1583_v46  ;;  %v1131_v7 = vadd.f32 %v1121_v45, %v925_v5 }
 0x11a   : > { %v1320_v3 = vadd.f32 %v1309_v0, %v1225_v48 }
 0x11b   : > { %v1517_v13 = vpop.f32.mrf.mxu0 }
 0x11c   : > { %v1526_v4 = vadd.f32 %v1515_v2, %v1320_v3 }
 0x11e   : > { %v1534_v6 = vpack.c.bf16 %v1526_v4, %v1526_v4  ;;  %v1556_v43 = vsel %vm414_vm0, %v1526_v4, 0.0  ;;  %v1573_v35 = vmul.f32 %v1526_v4, %v1526_v4  ;;  %v1216_v37 = vpop.f32.mrf.mxu2 }
 0x11f   : > { %v1557_v53 = vadd.f32 %v1556_v43, %v1555_v34  ;;  %v1226_v8 = vadd.f32 %v1216_v37, %v1131_v7 }
 0x120   : > { %1543 = vst.msk [vmem:[%s2453_s14 + $0x18] sm:$0xf] %vm1536_vm4, %v1534_v6  ;;  %v1586_v32 = vsel %vm414_vm0, %v1573_v35, 0.0 }
 0x121   : > { %v1587_v10 = vadd.f32 %v1586_v32, %v1585_v52  ;;  %v1311_v11 = vpop.f32.mrf.mxu3 }
 0x122   : > { %v1321_v12 = vadd.f32 %v1311_v11, %v1226_v8 }
 0x124   : > { %v1527_v9 = vadd.f32 %v1517_v13, %v1321_v12 }
 0x126   : > { %v1535_v38 = vpack.c.bf16 %v1527_v9, %v1527_v9  ;;  %v1558_v50 = vsel %vm414_vm0, %v1527_v9, 0.0  ;;  %v1574_v16 = vmul.f32 %v1527_v9, %v1527_v9 }
 0x127   : > { %v1559_v19 = vadd.f32 %v1558_v50, %v1557_v53 }
 0x128   : > { %1544 = vst.msk [vmem:[%s2453_s14 + $0x1c] sm:$0xf] %vm1536_vm4, %v1535_v38  ;;  %v1588_v20 = vsel %vm414_vm0, %v1574_v16, 0.0 }
 0x129   : > { %v1560_v21 = vrot.slane %v1559_v19, 4  ;;  %v1589_v22 = vadd.f32 %v1588_v20, %v1587_v10 }
 0x12b   : > { %v1561_v23 = vadd.f32 %v1560_v21, %v1559_v19  ;;  %v1590_v17 = vrot.slane %v1589_v22, 4 }
 0x12d   : > { %v1562_v39 = vrot.slane %v1561_v23, 2  ;;  %v1591_v41 = vadd.f32 %v1590_v17, %v1589_v22 }
 0x12f   : > { %v1563_v24 = vadd.f32 %v1562_v39, %v1561_v23  ;;  %v1592_v36 = vrot.slane %v1591_v41, 2 }
 0x131   : > { %v1564_v25 = vrot.slane %v1563_v24, 1  ;;  %v1593_v26 = vadd.f32 %v1592_v36, %v1591_v41 }
 0x133   : > { %v1565_v27 = vadd.f32 %v1564_v25, %v1563_v24  ;;  %v1594_v29 = vrot.slane %v1593_v26, 1 }
 0x135   : > { %v1595_v49 = vadd.f32 %v1594_v29, %v1593_v26  ;;  %1598 = vst.msk [vmem:[%s352_s17] sm:$0x1] %vm1597_vm5, %v1565_v27 }
 0x137   : > { %1599 = vst.msk [vmem:[%s355_s21] sm:$0x1] %vm1597_vm5, %v1595_v49 }
 0x138 PF: > { %s18_s24 = sadd.s32 1, %s2086_s24  }
 0x139   : > { %p15_p4 = scmp.ge.s32.totalorder %s18_s24, 4  }
 0x13b   :  { %17 = sbr.rel (!%p15_p4) target bundleno = 1 (0x1), region = 113 }

// kernel: bottleneck_forward.12
= control target key start
LH: loop header
LB: loop body
LE: loop exit
PB: predicated region body
PF: predicated region fallthrough
CT: control target
= control target key end

     0   :  { %s320_s0 = inlined_call_operand.vmem [shape: bf16[128,128], index: 0, kind: input, shape index: {}]   ;;  %s321_s1 = inlined_call_operand.vmem [shape: f32[1,128], index: 1, kind: input, shape index: {}]   ;;  %s322_s2 = inlined_call_operand.vmem [shape: f32[1,128], index: 2, kind: input, shape index: {}]   ;;  %s323_s3 = inlined_call_operand.vmem [shape: bf16[128,128], index: 3, kind: output, shape index: {}]  }
   0x1   :  { %v123_v0 = vld [vmem:[%s320_s0] sm:$0xff]   ;;  %v194_v5 = vld [vmem:[%s320_s0 + $0x8] sm:$0xff]   ;;  %v195_v8 = vld [vmem:[%s320_s0 + $0x10] sm:$0xff]  }
   0x2   :  { %v236_v1 = vld [vmem:[%s321_s1] ss:$0 sm:$0xff]  ;;  %v124_v2 = vunpack.c.l.bf16 %v123_v0  ;;  %v125_v3 = vunpack.c.h.bf16 %v123_v0  ;;  %v128_v6 = vunpack.c.l.bf16 %v194_v5  ;;  %v129_v7 = vunpack.c.h.bf16 %v194_v5  ;;  %v196_v9 = vld [vmem:[%s320_s0 + $0x18] sm:$0xff]   ;;  %v198_v27 = vld [vmem:[%s320_s0 + $0x28] sm:$0xff]  }
   0x3   :  { %v241_v4 = vld [vmem:[%s322_s2] ss:$0 sm:$0xff]  ;;  %v132_v12 = vunpack.c.l.bf16 %v195_v8  ;;  %v133_v13 = vunpack.c.h.bf16 %v195_v8  ;;  %v136_v16 = vunpack.c.l.bf16 %v196_v9  ;;  %v137_v17 = vunpack.c.h.bf16 %v196_v9  ;;  %v199_v32 = vld [vmem:[%s320_s0 + $0x30] sm:$0xff]   ;;  %v200_v37 = vld [vmem:[%s320_s0 + $0x38] sm:$0xff]  }
   0x4   :  { %v50_v10 = vmul.f32 %v236_v1, %v124_v2  ;;  %v51_v11 = vmul.f32 %v236_v1, %v125_v3  ;;  %v52_v14 = vmul.f32 %v236_v1, %v128_v6  ;;  %v53_v15 = vmul.f32 %v236_v1, %v129_v7  ;;  %v197_v18 = vld [vmem:[%s320_s0 + $0x20] sm:$0xff]  }
   0x5   :  { %v54_v21 = vmul.f32 %v236_v1, %v132_v12  ;;  %v55_v22 = vmul.f32 %v236_v1, %v133_v13  ;;  %v56_v25 = vmul.f32 %v236_v1, %v136_v16  ;;  %v57_v26 = vmul.f32 %v236_v1, %v137_v17 }
   0x6   :  { %v70_v19 = vadd.f32 %v241_v4, %v50_v10  ;;  %v71_v20 = vadd.f32 %v241_v4, %v51_v11  ;;  %v72_v23 = vadd.f32 %v241_v4, %v52_v14  ;;  %v73_v24 = vadd.f32 %v241_v4, %v53_v15 }
   0x7   :  { %v74_v29 = vadd.f32 %v241_v4, %v54_v21  ;;  %v75_v30 = vadd.f32 %v241_v4, %v55_v22  ;;  %v140_v31 = vunpack.c.l.bf16 %v197_v18  ;;  %v76_v34 = vadd.f32 %v241_v4, %v56_v25 }
   0x8   :  { %v157_v28 = vpack.c.bf16 %v71_v20, %v70_v19  ;;  %v162_v33 = vpack.c.bf16 %v73_v24, %v72_v23  ;;  %v77_v35 = vadd.f32 %v241_v4, %v57_v26  ;;  %v141_v36 = vunpack.c.h.bf16 %v197_v18 }
   0x9   :  { %v167_v38 = vpack.c.bf16 %v75_v30, %v74_v29  ;;  %v58_v39 = vmul.f32 %v236_v1, %v140_v31  ;;  %v144_v40 = vunpack.c.l.bf16 %v198_v27  ;;  %v145_v41 = vunpack.c.h.bf16 %v198_v27 }
   0xa   :  { %158 = vst [vmem:[%s323_s3] sm:$0xff] %v157_v28   ;;  %v172_v42 = vpack.c.bf16 %v77_v35, %v76_v34  ;;  %v59_v43 = vmul.f32 %v236_v1, %v141_v36  ;;  %v148_v44 = vunpack.c.l.bf16 %v199_v32  ;;  %v149_v45 = vunpack.c.h.bf16 %v199_v32 }
   0xb   :  { %201 = vst [vmem:[%s323_s3 + $0x8] sm:$0xff] %v162_v33   ;;  %v78_v46 = vadd.f32 %v241_v4, %v58_v39  ;;  %v60_v47 = vmul.f32 %v236_v1, %v144_v40  ;;  %v61_v48 = vmul.f32 %v236_v1, %v145_v41  ;;  %v152_v49 = vunpack.c.l.bf16 %v200_v37 }
   0xc   :  { %202 = vst [vmem:[%s323_s3 + $0x10] sm:$0xff] %v167_v38   ;;  %v79_v50 = vadd.f32 %v241_v4, %v59_v43  ;;  %v62_v51 = vmul.f32 %v236_v1, %v148_v44  ;;  %v63_v52 = vmul.f32 %v236_v1, %v149_v45  ;;  %v153_v53 = vunpack.c.h.bf16 %v200_v37 }
   0xd   :  { %203 = vst [vmem:[%s323_s3 + $0x18] sm:$0xff] %v172_v42   ;;  %v80_v54 = vadd.f32 %v241_v4, %v60_v47  ;;  %v81_v55 = vadd.f32 %v241_v4, %v61_v48  ;;  %v64_v56 = vmul.f32 %v236_v1, %v152_v49 }
   0xe   :  { %v177_v57 = vpack.c.bf16 %v79_v50, %v78_v46  ;;  %v82_v58 = vadd.f32 %v241_v4, %v62_v51  ;;  %v83_v59 = vadd.f32 %v241_v4, %v63_v52  ;;  %v65_v60 = vmul.f32 %v236_v1, %v153_v53 }
   0xf   :  { %v182_v61 = vpack.c.bf16 %v81_v55, %v80_v54  ;;  %v84_v62 = vadd.f32 %v241_v4, %v64_v56 }
  0x10   :  { %204 = vst [vmem:[%s323_s3 + $0x20] sm:$0xff] %v177_v57   ;;  %v187_v63 = vpack.c.bf16 %v83_v59, %v82_v58  ;;  %v85_v0 = vadd.f32 %v241_v4, %v65_v60 }
  0x11   :  { %205 = vst [vmem:[%s323_s3 + $0x28] sm:$0xff] %v182_v61  }
  0x12   :  { %206 = vst [vmem:[%s323_s3 + $0x30] sm:$0xff] %v187_v63   ;;  %v192_v2 = vpack.c.bf16 %v85_v0, %v84_v62 }
  0x14   :  { %207 = vst [vmem:[%s323_s3 + $0x38] sm:$0xff] %v192_v2  }

// kernel: bottleneck_forward.13
= control target key start
LH: loop header
LB: loop body
LE: loop exit
PB: predicated region body
PF: predicated region fallthrough
CT: control target
= control target key end

     0   :  { %11 = vsyncpa [#allocation3], 0  ;;  %s948_s0 = inlined_call_operand.vmem [shape: bf16[2,64,128], index: 0, kind: input, shape index: {}]   ;;  %s949_s1 = inlined_call_operand.vmem [shape: f32[1,1,128], index: 1, kind: input, shape index: {}]   ;;  %s950_s2 = inlined_call_operand.vmem [shape: f32[1,1,128], index: 2, kind: input, shape index: {}]   ;;  %s951_s3 = inlined_call_operand.vmem [shape: f32[128,8], index: 3, kind: input, shape index: {}]   ;;  %s952_s4 = inlined_call_operand.vmem [shape: f32[8,128], index: 4, kind: input, shape index: {}]   ;;  %s953_s5 = inlined_call_operand.vmem [shape: bf16[2,64,128], index: 5, kind: input, shape index: {}]   ;;  %s954_s6 = inlined_call_operand.hbm [shape: f32[2,64,128], index: 6, kind: output, shape index: {}]  }
   0x1   :  { %13 = vsyncpa [#allocation3 + $0x1], 0  ;;  %s760_s21 = smov 0   ;;  %s762_s22 = smov 0  }
   0x2   :  { %s764_s23 = smov 0   ;;  %s766_s24 = smov 0  }
   0x3 LB: > { %s781_s25 = sadd.s32 4294967295, %s720_s24   ;;  %s551_s26 = sadd.s32 4294967294, %s720_s24   ;;  %s720_s24 = sphi %s766_s24, %s960_s24   ;;  %s716_s23 = sphi %s764_s23, %s959_s23   ;;  %s712_s22 = sphi %s762_s22, %s958_s22   ;;  %s708_s21 = sphi %s760_s21, %s957_s21  }
   0x4   : > { %s785_s27 = sadd.s32 1, %s720_s24   ;;  %s162_s28 = sadd.s32 1, %s716_s23 }
   0x5   : > { %s159_s29 = ssub.s32 %s720_s24, %s785_s27  ;;  %p172_p0 = scmp.ne.s32.totalorder %s716_s23, %s712_s22 }
   0x6   : > { %p160_p1 = scmp.eq.s32.totalorder %s159_s29, 0  ;;  %p173_p2 = scmp.eq.s32.totalorder %s781_s25, 1 }
   0x7   : > { %p178_p3 = scmp.ne.s32.totalorder %s712_s22, %s708_s21  ;;  %p179_p4 = scmp.eq.s32.totalorder %s551_s26, 1 }
   0x8   : > { %s796_s30 = scalar_select %p160_p1, %s716_s23, %s162_s28  }
   0x9   : > { %p798_p5 = por %p173_p2, %p172_p0  ;;  %p802_p6 = por %p179_p4, %p178_p3 }
   0xa   : > { %p554_p7 = scmp.ge.s32.totalorder %s720_s24, 1  ;;  %p225_p8 = scmp.lt.s32.totalorder %s720_s24, 3 }
   0xc   : > { %p226_p9 = pnand %p554_p7, %p225_p8 }
   0xd   : > { %p260_p10 = scmp.lt.s32.totalorder (!%p226_p9), %s781_s25, 1  ;;  %s569_s14 = sshll.u32 (!%p226_p9), %s781_s25, 6 }
   0xe   : > { %229 = sbr.rel (%p226_p9) target bundleno = 359 (0x167), region = 44  ;;  %s473_s19 = scalar_lea.hbm (!%p226_p9), %s954_s6, %s569_s14 }
   0xf   : > { %s476_s26 = sshll.u32 (!%p226_p9), %s473_s19, 4  ;;  %s678_s12 = scalar_lea.hbm (!%p226_p9), %s954_s6, 128  ;;  %s477_s26 = int_to_ptr.hbm [resolvable:$true] %s476_s26 }
  0x13   : > { %v346_v0 = vld [vmem:[%s951_s3 + $0x78] sm:$0xff]  ;;  %v345_v1 = vld [vmem:[%s951_s3 + $0x70] sm:$0xff]  ;;  %v344_v2 = vld [vmem:[%s951_s3 + $0x68] sm:$0xff]  ;;  %s819_s15 = scalar_select %p260_p10, %s781_s25, 1  ;;  %v722_v24 = vmov 64.0   ;;  %vm369_vm1 = vcmask 64512  }
  0x14   : > { %347 = vmatpush.msra.mxu0 %v346_v0  ;;  %v343_v3 = vld [vmem:[%s951_s3 + $0x60] sm:$0xff]  ;;  %v342_v4 = vld [vmem:[%s951_s3 + $0x58] sm:$0xff]  ;;  %v341_v15 = vld [vmem:[%s951_s3 + $0x50] sm:$0xff]  ;;  %652 = vrcp.f32 %v722_v24 }
  0x15   : > { %s567_s18 = sshll.u32 %s819_s15, 5  ;;  %v650_v5 = vld [vmem:[%s949_s1] ss:$0 sm:$0xff]  ;;  %v340_v22 = vld [vmem:[%s951_s3 + $0x48] sm:$0xff]  ;;  %v338_v34 = vld [vmem:[%s951_s3 + $0x38] sm:$0xff]  ;;  %s257_s15 = sand.u32 1, %s712_s22  }
  0x16   : > { %348 = vmatpush.msra.mxu0 %v345_v1  ;;  %s264_s29 = scalar_lea.vmem %s948_s0, %s567_s18  ;;  %v651_v14 = vld [vmem:[%s950_s2] ss:$0 sm:$0xff]  ;;  %v337_v39 = vld [vmem:[%s951_s3 + $0x30] sm:$0xff]  ;;  %v336_v43 = vld [vmem:[%s951_s3 + $0x28] sm:$0xff]  ;;  %s269_s13 = scalar_lea.vmem %s953_s5, %s567_s18 }
  0x17   : > { %v571_v6 = vld [vmem:[%s264_s29] sm:$0xff]   ;;  %v602_v7 = vld [vmem:[%s264_s29 + $0x8] sm:$0xff]   ;;  %v603_v8 = vld [vmem:[%s264_s29 + $0x10] sm:$0xff]   ;;  %s555_s18 = sshll.u32 %s257_s15, 6  ;;  %s462_s28 = scalar_lea.sflag [#allocation3], %s257_s15 }
  0x18   : > { %349 = vmatpush.msra.mxu0 %v344_v2  ;;  %v572_v9 = vunpack.c.l.bf16 %v571_v6  ;;  %v573_v10 = vunpack.c.h.bf16 %v571_v6  ;;  %v576_v11 = vunpack.c.l.bf16 %v602_v7  ;;  %v577_v12 = vunpack.c.h.bf16 %v602_v7  ;;  %v604_v13 = vld [vmem:[%s264_s29 + $0x18] sm:$0xff]   ;;  %v339_v29 = vld [vmem:[%s951_s3 + $0x40] sm:$0xff]  ;;  %v333_v52 = vld [vmem:[%s951_s3 + $0x10] sm:$0xff]  ;;  %s259_s20 = scalar_lea.vmem [#allocation2], %s555_s18  ;;  %s672_s29 = sshra.s32 %s477_s26, 4  ;;  %s673_s29 = int_to_ptr.hbm [resolvable:$true] %s672_s29 }
  0x19   : > { %v580_v16 = vunpack.c.l.bf16 %v603_v8  ;;  %v581_v17 = vunpack.c.h.bf16 %v603_v8  ;;  %v584_v23 = vunpack.c.l.bf16 %v604_v13  ;;  %v585_v30 = vunpack.c.h.bf16 %v604_v13  ;;  %v335_v46 = vld [vmem:[%s951_s3 + $0x20] sm:$0xff]  ;;  %v334_v50 = vld [vmem:[%s951_s3 + $0x18] sm:$0xff]  ;;  %v332_v55 = vld [vmem:[%s951_s3 + $0x8] sm:$0xff]  ;;  %s474_s25 = sshll.u32 %s259_s20, 4  ;;  %s674_s9 = scalar_lea.hbm %s673_s29, 64  ;;  %s475_s25 = int_to_ptr.vmem [resolvable:$true] %s474_s25 }
  0x1a   : > { %350 = vmatpush.msra.mxu0 %v343_v3  ;;  %v290_v18 = vmul.f32 %v650_v5, %v572_v9  ;;  %v291_v19 = vmul.f32 %v650_v5, %v573_v10  ;;  %v292_v20 = vmul.f32 %v650_v5, %v576_v11  ;;  %v293_v21 = vmul.f32 %v650_v5, %v577_v12  ;;  %v653_v38 = vpop.eup %652  ;;  %v331_v57 = vld [vmem:[%s951_s3] sm:$0xff]  ;;  %p675_p11 = scmp.ne.s32.totalorder %s673_s29, %s674_s9  ;;  %p679_p0 = scmp.lt.s32.totalorder %s673_s29, %s954_s6 }
  0x1b   : > { %v294_v25 = vmul.f32 %v650_v5, %v580_v16  ;;  %v295_v31 = vmul.f32 %v650_v5, %v581_v17  ;;  %v296_v35 = vmul.f32 %v650_v5, %v584_v23  ;;  %v297_v40 = vmul.f32 %v650_v5, %v585_v30  ;;  %v368_v3 = vld [vmem:[%s952_s4] sm:$0xff]  ;;  %p680_p1 = scmp.lt.s32.totalorder %s678_s12, %s674_s9 }
  0x1c   : > { %351 = vmatpush.msra.mxu0 %v342_v4  ;;  %v845_v26 = vadd.f32 %v651_v14, %v290_v18  ;;  %v847_v27 = vadd.f32 %v651_v14, %v291_v19  ;;  %v849_v28 = vadd.f32 %v651_v14, %v292_v20  ;;  %v854_v32 = vadd.f32 %v651_v14, %v293_v21  ;;  %v587_v16 = vld [vmem:[%s269_s13] sm:$0xff]   ;;  %v605_v18 = vld [vmem:[%s269_s13 + $0x8] sm:$0xff]   ;;  %v606_v20 = vld [vmem:[%s269_s13 + $0x10] sm:$0xff]   ;;  %p676_p12 = pnand %p675_p11, %p798_p5 }
  0x1d   : > { %v861_v36 = vadd.f32 %v651_v14, %v294_v25  ;;  %v867_v41 = vadd.f32 %v651_v14, %v295_v31  ;;  %v873_v44 = vadd.f32 %v651_v14, %v296_v35  ;;  %v324_v47 = vmul.f32 64.0, %v653_v38  ;;  %388 = vmatpush.msra.mxu1 %v368_v3  ;;  %v607_v21 = vld [vmem:[%s269_s13 + $0x18] sm:$0xff]   ;;  %p681_p2 = por %p680_p1, %p679_p0 }
  0x1e   : > { %352 = vmatpush.msra.mxu0 %v341_v15  ;;  %v310_v33 = vadd.f32 %v847_v27, %v845_v26  ;;  %v879_v48 = vadd.f32 %v651_v14, %v297_v40  ;;  %vm328_vm0 = vweird.f32 %v653_v38  ;;  %v588_v23 = vunpack.c.l.bf16 %v587_v16  ;;  %p677_p13 = pneg %p676_p12 }
  0x1f   : > { %v325_v53 = vsub.f32 1.0, %v324_v47  ;;  %v589_v25 = vunpack.c.h.bf16 %v587_v16  ;;  %v593_v30 = vunpack.c.h.bf16 %v605_v18  ;;  %v600_v35 = vunpack.c.l.bf16 %v607_v21 }
  0x20   : > { %353 = vmatpush.msra.mxu0 %v340_v22  ;;  %v311_v37 = vadd.f32 %v310_v33, %v849_v28  ;;  %v596_v33 = vunpack.c.l.bf16 %v606_v20  ;;  %p682_p3 = pnand %p681_p2, %p677_p13 }
  0x21   : > { %v326_v58 = vmul.f32 %v653_v38, %v325_v53 }
  0x22   : > { %354 = vmatpush.msra.mxu0 %v339_v29  ;;  %v312_v42 = vadd.f32 %v311_v37, %v854_v32  ;;  %v592_v29 = vunpack.c.l.bf16 %v605_v18  ;;  %v601_v37 = vunpack.c.h.bf16 %v607_v21 }
  0x23   : > { %v327_v61 = vadd.f32 %v653_v38, %v326_v58 }
  0x24   : > { %355 = vmatpush.msra.mxu0 %v338_v34  ;;  %v313_v45 = vadd.f32 %v312_v42, %v861_v36  ;;  %v597_v34 = vunpack.c.h.bf16 %v606_v20 }
  0x25   : > { %v329_v0 = vsel %vm328_vm0, %v653_v38, %v327_v61 }
  0x26   : > { %356 = vmatpush.msra.mxu0 %v337_v39  ;;  %v314_v49 = vadd.f32 %v313_v45, %v867_v41 }
  0x28   : > { %357 = vmatpush.msra.mxu0 %v336_v43  ;;  %v315_v51 = vadd.f32 %v314_v49, %v873_v44 }
  0x2a   : > { %358 = vmatpush.msra.mxu0 %v335_v46  ;;  %v316_v54 = vadd.f32 %v315_v51, %v879_v48 }
  0x2c   : > { %359 = vmatpush.msra.mxu0 %v334_v50  ;;  %v317_v56 = vrot.slane %v316_v54, 4 }
  0x2e   : > { %360 = vmatpush.msra.mxu0 %v333_v52  ;;  %v318_v59 = vadd.f32 %v317_v56, %v316_v54 }
  0x30   : > { %361 = vmatpush.msra.mxu0 %v332_v55  ;;  %v319_v60 = vrot.slane %v318_v59, 2 }
  0x32   : > { %362 = vmatpush.msra.mxu0 %v331_v57  ;;  %v320_v62 = vadd.f32 %v319_v60, %v318_v59 }
  0x34   : > { %v321_v63 = vrot.slane %v320_v62, 1 }
  0x36   : > { %v322_v1 = vadd.f32 %v321_v63, %v320_v62 }
  0x38   : > { %v330_v2 = vmul.f32 %v329_v0, %v322_v1 }
  0x3a   : > { %363 = vmatmul.f32.vlgmr.msra.gmra.mxu0 %v330_v2 }
  0xb7   : > { %v364_v4 = vpop.f32.mrf.mxu0 }
  0xb8   : > { %v367_v5 = vmax.f32 %v364_v4, 0.0 }
  0xba   : > { %560 = vmatmul.msk.f32.vlgmr.msra.gmra.mxu1 %vm369_vm1, %v367_v5 }
 0x137   : > { %v390_v6 = vpop.f32.mrf.mxu1 }
 0x138   : > { %v561_v7 = vmul.f32 -1.442695, %v390_v6 }
 0x13a   : > { %654 = vpow2.f32 %v561_v7 }
 0x140   : > { %v655_v8 = vpop.eup %654 }
 0x141   : > { %v396_v9 = vadd.f32 1.0, %v655_v8 }
 0x143   : > { %656 = vrcp.f32 %v396_v9  ;;  %v408_v13 = vand.u32 2147483648, %v396_v9  ;;  %v406_v15 = vand.u32 2147483647, %v396_v9  ;;  %vm402_vm3 = vweird.f32 %v396_v9 }
 0x145   : > { %v409_v19 = vor.u32 1.1754944e-38, %v408_v13  ;;  %vm407_vm5 = vcmp.eq.f32.partialorder %v406_v15, 8.507059e+37 }
 0x149   : > { %v657_v10 = vpop.eup %656 }
 0x14a   : > { %v398_v11 = vmul.f32 %v657_v10, %v396_v9  ;;  %vm403_vm2 = vweird.f32 %v657_v10 }
 0x14b   : > { %vm404_vm4 = vmor %vm402_vm3, %vm403_vm2 }
 0x14c   : > { %v399_v12 = vsub.f32 1.0, %v398_v11 }
 0x14e   : > { %v400_v14 = vmul.f32 %v657_v10, %v399_v12 }
 0x150   : > { %v401_v17 = vadd.f32 %v657_v10, %v400_v14 }
 0x152   : > { %v405_v22 = vsel %vm404_vm4, %v657_v10, %v401_v17 }
 0x153   : > { %v410_v24 = vsel %vm407_vm5, %v409_v19, %v405_v22 }
 0x154   : > { %v412_v31 = vperm.slane %v410_v24, 0 }
 0x156   : > { %v413_v38 = vmul.f32 %v412_v31, %v845_v26  ;;  %v414_v39 = vmul.f32 %v412_v31, %v847_v27  ;;  %v415_v40 = vmul.f32 %v412_v31, %v849_v28  ;;  %v416_v42 = vmul.f32 %v412_v31, %v854_v32 }
 0x157   : > { %v417_v43 = vmul.f32 %v412_v31, %v861_v36  ;;  %v418_v45 = vmul.f32 %v412_v31, %v867_v41  ;;  %v419_v46 = vmul.f32 %v412_v31, %v873_v44  ;;  %v420_v47 = vmul.f32 %v412_v31, %v879_v48 }
 0x158   : > { %v437_v49 = vadd.f32 %v588_v23, %v413_v38  ;;  %v438_v50 = vadd.f32 %v589_v25, %v414_v39  ;;  %v439_v51 = vadd.f32 %v592_v29, %v415_v40  ;;  %v440_v52 = vadd.f32 %v593_v30, %v416_v42 }
 0x159   : > { %v441_v26 = vadd.f32 %v596_v33, %v417_v43  ;;  %v442_v53 = vadd.f32 %v597_v34, %v418_v45  ;;  %v443_v27 = vadd.f32 %v600_v35, %v419_v46  ;;  %v444_v32 = vadd.f32 %v601_v37, %v420_v47 }
 0x15a   : > { %v445_v54 = vmax.f32 %v437_v49, 0.0  ;;  %v446_v28 = vmax.f32 %v438_v50, 0.0  ;;  %v447_v55 = vmax.f32 %v439_v51, 0.0  ;;  %v448_v36 = vmax.f32 %v440_v52, 0.0 }
 0x15b   : > { %v449_v41 = vmax.f32 %v441_v26, 0.0  ;;  %v450_v44 = vmax.f32 %v442_v53, 0.0  ;;  %v451_v48 = vmax.f32 %v443_v27, 0.0  ;;  %v452_v56 = vmax.f32 %v444_v32, 0.0 }
 0x15c   : > { %453 = vst [vmem:[%s259_s20] sm:$0xff] %v445_v54 }
 0x15d   : > { %454 = vst [vmem:[%s259_s20 + $0x8] sm:$0xff] %v446_v28 }
 0x15e   : > { %455 = vst [vmem:[%s259_s20 + $0x10] sm:$0xff] %v447_v55 }
 0x15f   : > { %456 = vst [vmem:[%s259_s20 + $0x18] sm:$0xff] %v448_v36 }
 0x160   : > { %457 = vst [vmem:[%s259_s20 + $0x20] sm:$0xff] %v449_v41 }
 0x161   : > { %458 = vst [vmem:[%s259_s20 + $0x28] sm:$0xff] %v450_v44 }
 0x162   : > { %459 = vst [vmem:[%s259_s20 + $0x30] sm:$0xff] %v451_v48 }
 0x163   : > { %460 = vst [vmem:[%s259_s20 + $0x38] sm:$0xff] %v452_v56 }
 0x164   : > { %685 = shalt.err (!%p682_p3)
}
 0x165   : > { %s723_s15 = smov 128   ;;  %s724_s14 = smov 8  }
 0x166   : > { %608 = dma.vmem_to_hbm [thread:$0]  (%p798_p5), %s475_s25, 1024, %s477_s26, %s462_s28, %s723_s15, %s723_s15, %s724_s14  }
 0x167 PF: > { %p614_p4 = scmp.ge.s32.totalorder %s720_s24, 2  ;;  %s491_s16 = sand.u32 1, %s708_s21  }
 0x168   : > { %s492_s17 = scalar_lea.sflag [#allocation3], %s491_s16 }
 0x169   : > { %p611_p7 = pnand %p614_p4, %p802_p6 }
 0x16b   : > { %p612_p8 = pneg %p611_p7 }
 0x16d   : > { %703 = dma.done.wait (%p612_p8), %s492_s17, 1024  }
 0x16e   : > { %705 = vsyncadd (%p612_p8), %s492_s17, 4294966272  ;;  %p16_p9 = scmp.ge.s32.totalorder %s785_s27, 4   ;;  %s957_s21 = smov %s712_s22 }
 0x16f   : > { %s958_s22 = smov %s716_s23  ;;  %s959_s23 = smov %s796_s30 }
 0x170   : > { %s960_s24 = smov %s785_s27  ;;  %18 = sbr.rel (!%p16_p9) target bundleno = 3 (0x3), region = 82 }
 0x175   :  { %498 = vsyncpa [#allocation3], 1 }
 0x176   :  { %500 = vsyncpa [#allocation3 + $0x1], 1 }

</bundles_post_ra>
